<compile_context>
chip_gen: v6e
topology: v6e:2x2x1
jax: 0.10.0
libtpu: 0.0.40
codegen_flags: <defaults>
</compile_context>

<pallas_src>
import functools

import jax
import jax.numpy as jnp
from jax.experimental import pallas as pl
from jax.experimental.pallas import tpu as pltpu

EPS = 1e-5  # torch.nn.InstanceNorm2d default


def _masked_instance_norm(a, mask, count):
    """a: (L, C) f32, mask: (L, 1) 0/1 f32. Biased one-pass moments over
    mask==1 rows (matches torch InstanceNorm2d(affine=False))."""
    am = a * mask
    s = jnp.sum(am, axis=0, keepdims=True)
    ss = jnp.sum(am * a, axis=0, keepdims=True)     # mask in {0,1} => mask*a*a
    inv_n = 1.0 / float(count)
    mean = s * inv_n
    var = ss * inv_n - mean * mean                  # one-pass biased variance
    return (a - mean) * jax.lax.rsqrt(var + EPS)


def _resblock_kernel(x_ref, wa_ref, wb_ref, m1_ref, m2_ref, o_ref, *,
                     W, oh1, ow1, oh2, ow2, L1, L2):
    """One image per grid step.

    x_ref : (XP, C) f32 -- channels-last image flattened to rows (row = p*W+q),
            zero-padded with a few extra rows so every tap slice is in bounds.
    wa_ref/wb_ref : (9, C, C) bf16 -- conv weights, tap-major, (ic, oc) per tap.
    m1_ref/m2_ref : (L1,1)/(L2,1) f32 -- 1.0 on frame rows that correspond to
            real (non-wrapped) output pixels of conv_a / conv_b.
    o_ref : (L2, C) f32 -- conv_b output frame (wrapper drops wrapped columns).
    """
    x = x_ref[...]                      # f32 copy kept for the residual add
    xb = x.astype(jnp.bfloat16)         # bf16 MXU operand
    mask1 = m1_ref[...]
    mask2 = m2_ref[...]
    C = x_ref.shape[-1]

    # ---- conv_a: 9 row-shifted (L1, C) @ (C, C) MXU matmuls, f32 accumulate
    acc1 = jnp.zeros((L1, C), jnp.float32)
    for t in range(9):
        off = (t // 3) * W + (t % 3)
        acc1 = acc1 + jnp.dot(xb[off:off + L1, :], wa_ref[t],
                              preferred_element_type=jnp.float32)

    # ---- InstanceNorm + ReLU
    h1 = jnp.maximum(_masked_instance_norm(acc1, mask1, oh1 * ow1), 0.0)
    h1b = h1.astype(jnp.bfloat16)

    # ---- conv_b
    acc2 = jnp.zeros((L2, C), jnp.float32)
    for t in range(9):
        off = (t // 3) * W + (t % 3)
        acc2 = acc2 + jnp.dot(h1b[off:off + L2, :], wb_ref[t],
                              preferred_element_type=jnp.float32)

    # ---- InstanceNorm + cropped residual + ReLU
    y = _masked_instance_norm(acc2, mask2, oh2 * ow2)
    res = x[2 * W + 2:2 * W + 2 + L2, :]   # == x[p+2, q+2] for frame row p*W+q
    o_ref[...] = jnp.maximum(y + res, 0.0)


def resblock_forward(x_nchw, wa, wb):
    """PyTorch-semantics _resblock forward. Conv biases are omitted because
    they cancel exactly under the following InstanceNorm2d(affine=False)."""
    N, C, H, W = x_nchw.shape
    assert H >= 5 and W >= 5, "two valid 3x3 convs need spatial >= 5"
    assert wa.shape == (C, C, 3, 3) and wb.shape == (C, C, 3, 3)

    oh1, ow1 = H - 2, W - 2
    oh2, ow2 = H - 4, W - 4
    L1 = oh1 * W + 8             # conv_a frame rows (+ slack for conv_b taps)
    L2 = oh2 * W                 # conv_b frame rows
    XP = 2 * W + 2 + L1          # padded input rows (max tap offset + L1)

    # single boundary transpose to channels-last; flatten spatial; small pad.
    x2 = jnp.transpose(x_nchw, (0, 2, 3, 1)).reshape(N, H * W, C)
    x2 = jnp.pad(x2, ((0, 0), (0, XP - H * W), (0, 0)))

    # (OC, IC, 3, 3) -> (9 taps, IC, OC), bf16 MXU operands.
    wa_t = jnp.transpose(wa, (2, 3, 1, 0)).reshape(9, C, C).astype(jnp.bfloat16)
    wb_t = jnp.transpose(wb, (2, 3, 1, 0)).reshape(9, C, C).astype(jnp.bfloat16)

    # 0/1 masks marking frame rows that are real output pixels (not wrapped).
    r1 = jnp.arange(L1)
    m1 = (((r1 % W) < ow1) & (r1 < oh1 * W)).astype(jnp.float32)[:, None]
    r2 = jnp.arange(L2)
    m2 = ((r2 % W) < ow2).astype(jnp.float32)[:, None]

    kernel = functools.partial(_resblock_kernel, W=W, oh1=oh1, ow1=ow1,
                               oh2=oh2, ow2=ow2, L1=L1, L2=L2)

    out = pl.pallas_call(
        kernel,
        out_shape=jax.ShapeDtypeStruct((N, L2, C), jnp.float32),
        grid=(N,),
        in_specs=[
            pl.BlockSpec((None, XP, C), lambda n: (n, 0, 0)),
            pl.BlockSpec((9, C, C), lambda n: (0, 0, 0)),
            pl.BlockSpec((9, C, C), lambda n: (0, 0, 0)),
            pl.BlockSpec((L1, 1), lambda n: (0, 0)),
            pl.BlockSpec((L2, 1), lambda n: (0, 0)),
        ],
        out_specs=pl.BlockSpec((None, L2, C), lambda n: (n, 0, 0)),
        compiler_params=pltpu.CompilerParams(
            dimension_semantics=("parallel",)),   # v7x: one image per TC
    )(x2, wa_t, wb_t, m1, m2)

    out = out.reshape(N, oh2, W, C)[:, :, :ow2, :]   # drop wrapped columns
    return jnp.transpose(out, (0, 3, 1, 2))          # back to NCHW


def resblock_reference(x, wa, wb):
    """Pure-JAX f32 reference of the PyTorch _resblock forward."""
    dn = ("NCHW", "OIHW", "NCHW")

    def conv(h, w):
        return jax.lax.conv_general_dilated(h, w, (1, 1), "VALID",
                                            dimension_numbers=dn)

    def inorm(h):
        m = jnp.mean(h, axis=(2, 3), keepdims=True)
        v = jnp.mean((h - m) ** 2, axis=(2, 3), keepdims=True)
        return (h - m) * jax.lax.rsqrt(v + EPS)

    h = jnp.maximum(inorm(conv(x, wa)), 0.0)
    h = inorm(conv(h, wb))
    return jnp.maximum(h + x[:, :, 2:-2, 2:-2], 0.0)


if __name__ == "__main__":
    key = jax.random.PRNGKey(0)
    kx, ka, kb = jax.random.split(key, 3)

    N, C, H, W = 2, 128, 16, 16              # the ITN resblocks use C=128
    bound = 1.0 / float(C * 3 * 3) ** 0.5    # PyTorch Conv2d default init bound
    x = jax.random.normal(kx, (N, C, H, W), jnp.float32)
    wa = jax.random.uniform(ka, (C, C, 3, 3), jnp.float32, -bound, bound)
    wb = jax.random.uniform(kb, (C, C, 3, 3), jnp.float32, -bound, bound)

    fwd = jax.jit(resblock_forward)
    y = jax.block_until_ready(fwd(x, wa, wb))

    assert y.shape == (N, C, H - 4, W - 4), y.shape
    assert bool(jnp.isfinite(y).all())

    # Validate against the f32 reference (kernel uses bf16 MXU operands, so
    # allow a small relative deviation).
    y_ref = resblock_reference(x, wa, wb)
    rel = float(jnp.linalg.norm(y - y_ref) / (jnp.linalg.norm(y_ref) + 1e-12))
    assert rel < 5e-2, rel
    print("KERNEL_OK")
</pallas_src>

<mosaic_0001>
module attributes {stable_mosaic.version = 11 : i64} {
  func.func @_resblock_kernel(%arg0: i32, %arg1: memref<1x266x128xf32, #tpu.memory_space<vmem>>, %arg2: memref<9x128x128xbf16, #tpu.memory_space<vmem>>, %arg3: memref<9x128x128xbf16, #tpu.memory_space<vmem>>, %arg4: memref<232x1xf32, #tpu.memory_space<vmem>>, %arg5: memref<192x1xf32, #tpu.memory_space<vmem>>, %arg6: memref<1x192x128xf32, #tpu.memory_space<vmem>>) attributes {dimension_semantics = [#tpu.dimension_semantics<parallel>], iteration_bounds = array<i64: 2>, scalar_prefetch = 0 : i64, scratch_operands = 0 : i64, tpu.core_type = #tpu.core_type<tc>, window_params = [{transform_indices = @transform_0, window_bounds = array<i64: 1, 266, 128>}, {pipeline_mode = #tpu.pipeline_mode<synchronous>, transform_indices = @transform_1, window_bounds = array<i64: 9, 128, 128>}, {pipeline_mode = #tpu.pipeline_mode<synchronous>, transform_indices = @transform_2, window_bounds = array<i64: 9, 128, 128>}, {pipeline_mode = #tpu.pipeline_mode<synchronous>, transform_indices = @transform_3, window_bounds = array<i64: 232, 1>}, {pipeline_mode = #tpu.pipeline_mode<synchronous>, transform_indices = @transform_4, window_bounds = array<i64: 192, 1>}, {transform_indices = @transform_5, window_bounds = array<i64: 1, 192, 128>}]} {
    %c0 = arith.constant 0 : index
    %c0_0 = arith.constant 0 : index
    %c0_1 = arith.constant 0 : index
    %0 = vector.load %arg1[%c0, %c0_0, %c0_1] : memref<1x266x128xf32, #tpu.memory_space<vmem>>, vector<1x266x128xf32>
    %1 = vector.shape_cast %0 : vector<1x266x128xf32> to vector<266x128xf32>
    %2 = arith.truncf %1 : vector<266x128xf32> to vector<266x128xbf16>
    %c0_2 = arith.constant 0 : index
    %c0_3 = arith.constant 0 : index
    %3 = vector.load %arg4[%c0_2, %c0_3] : memref<232x1xf32, #tpu.memory_space<vmem>>, vector<232x1xf32>
    %c0_4 = arith.constant 0 : index
    %c0_5 = arith.constant 0 : index
    %4 = vector.load %arg5[%c0_4, %c0_5] : memref<192x1xf32, #tpu.memory_space<vmem>>, vector<192x1xf32>
    %cst = arith.constant 0.000000e+00 : f32
    %5 = vector.broadcast %cst : f32 to vector<232x128xf32>
    %6 = vector.extract_strided_slice %2 {offsets = [0, 0], sizes = [232, 128], strides = [1, 1]} : vector<266x128xbf16> to vector<232x128xbf16>
    %c0_6 = arith.constant 0 : index
    %c0_7 = arith.constant 0 : index
    %c0_8 = arith.constant 0 : index
    %7 = vector.load %arg2[%c0_6, %c0_7, %c0_8] : memref<9x128x128xbf16, #tpu.memory_space<vmem>>, vector<1x128x128xbf16>
    %8 = vector.shape_cast %7 : vector<1x128x128xbf16> to vector<128x128xbf16>
    %cst_9 = arith.constant dense<0.000000e+00> : vector<232x128xf32>
    %9 = tpu.matmul %6, %8, %cst_9 {dimension_numbers = #tpu.dot_dimension_numbers<[1], [0], [0], [1], [0, 0, 1, 1], [], []>} : vector<232x128xbf16>, vector<128x128xbf16>, vector<232x128xf32> -> vector<232x128xf32>
    %10 = arith.addf %5, %9 : vector<232x128xf32>
    %11 = vector.extract_strided_slice %2 {offsets = [1, 0], sizes = [232, 128], strides = [1, 1]} : vector<266x128xbf16> to vector<232x128xbf16>
    %c1 = arith.constant 1 : index
    %c0_10 = arith.constant 0 : index
    %c0_11 = arith.constant 0 : index
    %12 = vector.load %arg2[%c1, %c0_10, %c0_11] : memref<9x128x128xbf16, #tpu.memory_space<vmem>>, vector<1x128x128xbf16>
    %13 = vector.shape_cast %12 : vector<1x128x128xbf16> to vector<128x128xbf16>
    %cst_12 = arith.constant dense<0.000000e+00> : vector<232x128xf32>
    %14 = tpu.matmul %11, %13, %cst_12 {dimension_numbers = #tpu.dot_dimension_numbers<[1], [0], [0], [1], [0, 0, 1, 1], [], []>} : vector<232x128xbf16>, vector<128x128xbf16>, vector<232x128xf32> -> vector<232x128xf32>
    %15 = arith.addf %10, %14 : vector<232x128xf32>
    %16 = vector.extract_strided_slice %2 {offsets = [2, 0], sizes = [232, 128], strides = [1, 1]} : vector<266x128xbf16> to vector<232x128xbf16>
    %c2 = arith.constant 2 : index
    %c0_13 = arith.constant 0 : index
    %c0_14 = arith.constant 0 : index
    %17 = vector.load %arg2[%c2, %c0_13, %c0_14] : memref<9x128x128xbf16, #tpu.memory_space<vmem>>, vector<1x128x128xbf16>
    %18 = vector.shape_cast %17 : vector<1x128x128xbf16> to vector<128x128xbf16>
    %cst_15 = arith.constant dense<0.000000e+00> : vector<232x128xf32>
    %19 = tpu.matmul %16, %18, %cst_15 {dimension_numbers = #tpu.dot_dimension_numbers<[1], [0], [0], [1], [0, 0, 1, 1], [], []>} : vector<232x128xbf16>, vector<128x128xbf16>, vector<232x128xf32> -> vector<232x128xf32>
    %20 = arith.addf %15, %19 : vector<232x128xf32>
    %21 = vector.extract_strided_slice %2 {offsets = [16, 0], sizes = [232, 128], strides = [1, 1]} : vector<266x128xbf16> to vector<232x128xbf16>
    %c3 = arith.constant 3 : index
    %c0_16 = arith.constant 0 : index
    %c0_17 = arith.constant 0 : index
    %22 = vector.load %arg2[%c3, %c0_16, %c0_17] : memref<9x128x128xbf16, #tpu.memory_space<vmem>>, vector<1x128x128xbf16>
    %23 = vector.shape_cast %22 : vector<1x128x128xbf16> to vector<128x128xbf16>
    %cst_18 = arith.constant dense<0.000000e+00> : vector<232x128xf32>
    %24 = tpu.matmul %21, %23, %cst_18 {dimension_numbers = #tpu.dot_dimension_numbers<[1], [0], [0], [1], [0, 0, 1, 1], [], []>} : vector<232x128xbf16>, vector<128x128xbf16>, vector<232x128xf32> -> vector<232x128xf32>
    %25 = arith.addf %20, %24 : vector<232x128xf32>
    %26 = vector.extract_strided_slice %2 {offsets = [17, 0], sizes = [232, 128], strides = [1, 1]} : vector<266x128xbf16> to vector<232x128xbf16>
    %c4 = arith.constant 4 : index
    %c0_19 = arith.constant 0 : index
    %c0_20 = arith.constant 0 : index
    %27 = vector.load %arg2[%c4, %c0_19, %c0_20] : memref<9x128x128xbf16, #tpu.memory_space<vmem>>, vector<1x128x128xbf16>
    %28 = vector.shape_cast %27 : vector<1x128x128xbf16> to vector<128x128xbf16>
    %cst_21 = arith.constant dense<0.000000e+00> : vector<232x128xf32>
    %29 = tpu.matmul %26, %28, %cst_21 {dimension_numbers = #tpu.dot_dimension_numbers<[1], [0], [0], [1], [0, 0, 1, 1], [], []>} : vector<232x128xbf16>, vector<128x128xbf16>, vector<232x128xf32> -> vector<232x128xf32>
    %30 = arith.addf %25, %29 : vector<232x128xf32>
    %31 = vector.extract_strided_slice %2 {offsets = [18, 0], sizes = [232, 128], strides = [1, 1]} : vector<266x128xbf16> to vector<232x128xbf16>
    %c5 = arith.constant 5 : index
    %c0_22 = arith.constant 0 : index
    %c0_23 = arith.constant 0 : index
    %32 = vector.load %arg2[%c5, %c0_22, %c0_23] : memref<9x128x128xbf16, #tpu.memory_space<vmem>>, vector<1x128x128xbf16>
    %33 = vector.shape_cast %32 : vector<1x128x128xbf16> to vector<128x128xbf16>
    %cst_24 = arith.constant dense<0.000000e+00> : vector<232x128xf32>
    %34 = tpu.matmul %31, %33, %cst_24 {dimension_numbers = #tpu.dot_dimension_numbers<[1], [0], [0], [1], [0, 0, 1, 1], [], []>} : vector<232x128xbf16>, vector<128x128xbf16>, vector<232x128xf32> -> vector<232x128xf32>
    %35 = arith.addf %30, %34 : vector<232x128xf32>
    %36 = vector.extract_strided_slice %2 {offsets = [32, 0], sizes = [232, 128], strides = [1, 1]} : vector<266x128xbf16> to vector<232x128xbf16>
    %c6 = arith.constant 6 : index
    %c0_25 = arith.constant 0 : index
    %c0_26 = arith.constant 0 : index
    %37 = vector.load %arg2[%c6, %c0_25, %c0_26] : memref<9x128x128xbf16, #tpu.memory_space<vmem>>, vector<1x128x128xbf16>
    %38 = vector.shape_cast %37 : vector<1x128x128xbf16> to vector<128x128xbf16>
    %cst_27 = arith.constant dense<0.000000e+00> : vector<232x128xf32>
    %39 = tpu.matmul %36, %38, %cst_27 {dimension_numbers = #tpu.dot_dimension_numbers<[1], [0], [0], [1], [0, 0, 1, 1], [], []>} : vector<232x128xbf16>, vector<128x128xbf16>, vector<232x128xf32> -> vector<232x128xf32>
    %40 = arith.addf %35, %39 : vector<232x128xf32>
    %41 = vector.extract_strided_slice %2 {offsets = [33, 0], sizes = [232, 128], strides = [1, 1]} : vector<266x128xbf16> to vector<232x128xbf16>
    %c7 = arith.constant 7 : index
    %c0_28 = arith.constant 0 : index
    %c0_29 = arith.constant 0 : index
    %42 = vector.load %arg2[%c7, %c0_28, %c0_29] : memref<9x128x128xbf16, #tpu.memory_space<vmem>>, vector<1x128x128xbf16>
    %43 = vector.shape_cast %42 : vector<1x128x128xbf16> to vector<128x128xbf16>
    %cst_30 = arith.constant dense<0.000000e+00> : vector<232x128xf32>
    %44 = tpu.matmul %41, %43, %cst_30 {dimension_numbers = #tpu.dot_dimension_numbers<[1], [0], [0], [1], [0, 0, 1, 1], [], []>} : vector<232x128xbf16>, vector<128x128xbf16>, vector<232x128xf32> -> vector<232x128xf32>
    %45 = arith.addf %40, %44 : vector<232x128xf32>
    %46 = vector.extract_strided_slice %2 {offsets = [34, 0], sizes = [232, 128], strides = [1, 1]} : vector<266x128xbf16> to vector<232x128xbf16>
    %c8 = arith.constant 8 : index
    %c0_31 = arith.constant 0 : index
    %c0_32 = arith.constant 0 : index
    %47 = vector.load %arg2[%c8, %c0_31, %c0_32] : memref<9x128x128xbf16, #tpu.memory_space<vmem>>, vector<1x128x128xbf16>
    %48 = vector.shape_cast %47 : vector<1x128x128xbf16> to vector<128x128xbf16>
    %cst_33 = arith.constant dense<0.000000e+00> : vector<232x128xf32>
    %49 = tpu.matmul %46, %48, %cst_33 {dimension_numbers = #tpu.dot_dimension_numbers<[1], [0], [0], [1], [0, 0, 1, 1], [], []>} : vector<232x128xbf16>, vector<128x128xbf16>, vector<232x128xf32> -> vector<232x128xf32>
    %50 = arith.addf %45, %49 : vector<232x128xf32>
    %51 = vector.broadcast %3 : vector<232x1xf32> to vector<232x128xf32>
    %52 = arith.mulf %50, %51 : vector<232x128xf32>
    %cst_34 = arith.constant dense<0.000000e+00> : vector<128xf32>
    %53 = vector.multi_reduction <add>, %52, %cst_34 [0] : vector<232x128xf32> to vector<128xf32>
    %54 = vector.shape_cast %53 : vector<128xf32> to vector<1x128xf32>
    %55 = arith.mulf %52, %50 : vector<232x128xf32>
    %cst_35 = arith.constant dense<0.000000e+00> : vector<128xf32>
    %56 = vector.multi_reduction <add>, %55, %cst_35 [0] : vector<232x128xf32> to vector<128xf32>
    %57 = vector.shape_cast %56 : vector<128xf32> to vector<1x128xf32>
    %cst_36 = arith.constant 0.00510204071 : f32
    %58 = vector.broadcast %cst_36 : f32 to vector<1x128xf32>
    %59 = arith.mulf %54, %58 : vector<1x128xf32>
    %cst_37 = arith.constant 0.00510204071 : f32
    %60 = vector.broadcast %cst_37 : f32 to vector<1x128xf32>
    %61 = arith.mulf %57, %60 : vector<1x128xf32>
    %62 = arith.mulf %59, %59 : vector<1x128xf32>
    %63 = arith.subf %61, %62 : vector<1x128xf32>
    %64 = vector.broadcast %59 : vector<1x128xf32> to vector<232x128xf32>
    %65 = arith.subf %50, %64 : vector<232x128xf32>
    %cst_38 = arith.constant 9.99999974E-6 : f32
    %66 = vector.broadcast %cst_38 : f32 to vector<1x128xf32>
    %67 = arith.addf %63, %66 : vector<1x128xf32>
    %68 = math.rsqrt %67 : vector<1x128xf32>
    %69 = vector.broadcast %68 : vector<1x128xf32> to vector<232x128xf32>
    %70 = arith.mulf %65, %69 : vector<232x128xf32>
    %cst_39 = arith.constant 0.000000e+00 : f32
    %71 = vector.broadcast %cst_39 : f32 to vector<232x128xf32>
    %72 = arith.maximumf %70, %71 : vector<232x128xf32>
    %73 = arith.truncf %72 : vector<232x128xf32> to vector<232x128xbf16>
    %cst_40 = arith.constant 0.000000e+00 : f32
    %74 = vector.broadcast %cst_40 : f32 to vector<192x128xf32>
    %75 = vector.extract_strided_slice %73 {offsets = [0, 0], sizes = [192, 128], strides = [1, 1]} : vector<232x128xbf16> to vector<192x128xbf16>
    %c0_41 = arith.constant 0 : index
    %c0_42 = arith.constant 0 : index
    %c0_43 = arith.constant 0 : index
    %76 = vector.load %arg3[%c0_41, %c0_42, %c0_43] : memref<9x128x128xbf16, #tpu.memory_space<vmem>>, vector<1x128x128xbf16>
    %77 = vector.shape_cast %76 : vector<1x128x128xbf16> to vector<128x128xbf16>
    %cst_44 = arith.constant dense<0.000000e+00> : vector<192x128xf32>
    %78 = tpu.matmul %75, %77, %cst_44 {dimension_numbers = #tpu.dot_dimension_numbers<[1], [0], [0], [1], [0, 0, 1, 1], [], []>} : vector<192x128xbf16>, vector<128x128xbf16>, vector<192x128xf32> -> vector<192x128xf32>
    %79 = arith.addf %74, %78 : vector<192x128xf32>
    %80 = vector.extract_strided_slice %73 {offsets = [1, 0], sizes = [192, 128], strides = [1, 1]} : vector<232x128xbf16> to vector<192x128xbf16>
    %c1_45 = arith.constant 1 : index
    %c0_46 = arith.constant 0 : index
    %c0_47 = arith.constant 0 : index
    %81 = vector.load %arg3[%c1_45, %c0_46, %c0_47] : memref<9x128x128xbf16, #tpu.memory_space<vmem>>, vector<1x128x128xbf16>
    %82 = vector.shape_cast %81 : vector<1x128x128xbf16> to vector<128x128xbf16>
    %cst_48 = arith.constant dense<0.000000e+00> : vector<192x128xf32>
    %83 = tpu.matmul %80, %82, %cst_48 {dimension_numbers = #tpu.dot_dimension_numbers<[1], [0], [0], [1], [0, 0, 1, 1], [], []>} : vector<192x128xbf16>, vector<128x128xbf16>, vector<192x128xf32> -> vector<192x128xf32>
    %84 = arith.addf %79, %83 : vector<192x128xf32>
    %85 = vector.extract_strided_slice %73 {offsets = [2, 0], sizes = [192, 128], strides = [1, 1]} : vector<232x128xbf16> to vector<192x128xbf16>
    %c2_49 = arith.constant 2 : index
    %c0_50 = arith.constant 0 : index
    %c0_51 = arith.constant 0 : index
    %86 = vector.load %arg3[%c2_49, %c0_50, %c0_51] : memref<9x128x128xbf16, #tpu.memory_space<vmem>>, vector<1x128x128xbf16>
    %87 = vector.shape_cast %86 : vector<1x128x128xbf16> to vector<128x128xbf16>
    %cst_52 = arith.constant dense<0.000000e+00> : vector<192x128xf32>
    %88 = tpu.matmul %85, %87, %cst_52 {dimension_numbers = #tpu.dot_dimension_numbers<[1], [0], [0], [1], [0, 0, 1, 1], [], []>} : vector<192x128xbf16>, vector<128x128xbf16>, vector<192x128xf32> -> vector<192x128xf32>
    %89 = arith.addf %84, %88 : vector<192x128xf32>
    %90 = vector.extract_strided_slice %73 {offsets = [16, 0], sizes = [192, 128], strides = [1, 1]} : vector<232x128xbf16> to vector<192x128xbf16>
    %c3_53 = arith.constant 3 : index
    %c0_54 = arith.constant 0 : index
    %c0_55 = arith.constant 0 : index
    %91 = vector.load %arg3[%c3_53, %c0_54, %c0_55] : memref<9x128x128xbf16, #tpu.memory_space<vmem>>, vector<1x128x128xbf16>
    %92 = vector.shape_cast %91 : vector<1x128x128xbf16> to vector<128x128xbf16>
    %cst_56 = arith.constant dense<0.000000e+00> : vector<192x128xf32>
    %93 = tpu.matmul %90, %92, %cst_56 {dimension_numbers = #tpu.dot_dimension_numbers<[1], [0], [0], [1], [0, 0, 1, 1], [], []>} : vector<192x128xbf16>, vector<128x128xbf16>, vector<192x128xf32> -> vector<192x128xf32>
    %94 = arith.addf %89, %93 : vector<192x128xf32>
    %95 = vector.extract_strided_slice %73 {offsets = [17, 0], sizes = [192, 128], strides = [1, 1]} : vector<232x128xbf16> to vector<192x128xbf16>
    %c4_57 = arith.constant 4 : index
    %c0_58 = arith.constant 0 : index
    %c0_59 = arith.constant 0 : index
    %96 = vector.load %arg3[%c4_57, %c0_58, %c0_59] : memref<9x128x128xbf16, #tpu.memory_space<vmem>>, vector<1x128x128xbf16>
    %97 = vector.shape_cast %96 : vector<1x128x128xbf16> to vector<128x128xbf16>
    %cst_60 = arith.constant dense<0.000000e+00> : vector<192x128xf32>
    %98 = tpu.matmul %95, %97, %cst_60 {dimension_numbers = #tpu.dot_dimension_numbers<[1], [0], [0], [1], [0, 0, 1, 1], [], []>} : vector<192x128xbf16>, vector<128x128xbf16>, vector<192x128xf32> -> vector<192x128xf32>
    %99 = arith.addf %94, %98 : vector<192x128xf32>
    %100 = vector.extract_strided_slice %73 {offsets = [18, 0], sizes = [192, 128], strides = [1, 1]} : vector<232x128xbf16> to vector<192x128xbf16>
    %c5_61 = arith.constant 5 : index
    %c0_62 = arith.constant 0 : index
    %c0_63 = arith.constant 0 : index
    %101 = vector.load %arg3[%c5_61, %c0_62, %c0_63] : memref<9x128x128xbf16, #tpu.memory_space<vmem>>, vector<1x128x128xbf16>
    %102 = vector.shape_cast %101 : vector<1x128x128xbf16> to vector<128x128xbf16>
    %cst_64 = arith.constant dense<0.000000e+00> : vector<192x128xf32>
    %103 = tpu.matmul %100, %102, %cst_64 {dimension_numbers = #tpu.dot_dimension_numbers<[1], [0], [0], [1], [0, 0, 1, 1], [], []>} : vector<192x128xbf16>, vector<128x128xbf16>, vector<192x128xf32> -> vector<192x128xf32>
    %104 = arith.addf %99, %103 : vector<192x128xf32>
    %105 = vector.extract_strided_slice %73 {offsets = [32, 0], sizes = [192, 128], strides = [1, 1]} : vector<232x128xbf16> to vector<192x128xbf16>
    %c6_65 = arith.constant 6 : index
    %c0_66 = arith.constant 0 : index
    %c0_67 = arith.constant 0 : index
    %106 = vector.load %arg3[%c6_65, %c0_66, %c0_67] : memref<9x128x128xbf16, #tpu.memory_space<vmem>>, vector<1x128x128xbf16>
    %107 = vector.shape_cast %106 : vector<1x128x128xbf16> to vector<128x128xbf16>
    %cst_68 = arith.constant dense<0.000000e+00> : vector<192x128xf32>
    %108 = tpu.matmul %105, %107, %cst_68 {dimension_numbers = #tpu.dot_dimension_numbers<[1], [0], [0], [1], [0, 0, 1, 1], [], []>} : vector<192x128xbf16>, vector<128x128xbf16>, vector<192x128xf32> -> vector<192x128xf32>
    %109 = arith.addf %104, %108 : vector<192x128xf32>
    %110 = vector.extract_strided_slice %73 {offsets = [33, 0], sizes = [192, 128], strides = [1, 1]} : vector<232x128xbf16> to vector<192x128xbf16>
    %c7_69 = arith.constant 7 : index
    %c0_70 = arith.constant 0 : index
    %c0_71 = arith.constant 0 : index
    %111 = vector.load %arg3[%c7_69, %c0_70, %c0_71] : memref<9x128x128xbf16, #tpu.memory_space<vmem>>, vector<1x128x128xbf16>
    %112 = vector.shape_cast %111 : vector<1x128x128xbf16> to vector<128x128xbf16>
    %cst_72 = arith.constant dense<0.000000e+00> : vector<192x128xf32>
    %113 = tpu.matmul %110, %112, %cst_72 {dimension_numbers = #tpu.dot_dimension_numbers<[1], [0], [0], [1], [0, 0, 1, 1], [], []>} : vector<192x128xbf16>, vector<128x128xbf16>, vector<192x128xf32> -> vector<192x128xf32>
    %114 = arith.addf %109, %113 : vector<192x128xf32>
    %115 = vector.extract_strided_slice %73 {offsets = [34, 0], sizes = [192, 128], strides = [1, 1]} : vector<232x128xbf16> to vector<192x128xbf16>
    %c8_73 = arith.constant 8 : index
    %c0_74 = arith.constant 0 : index
    %c0_75 = arith.constant 0 : index
    %116 = vector.load %arg3[%c8_73, %c0_74, %c0_75] : memref<9x128x128xbf16, #tpu.memory_space<vmem>>, vector<1x128x128xbf16>
    %117 = vector.shape_cast %116 : vector<1x128x128xbf16> to vector<128x128xbf16>
    %cst_76 = arith.constant dense<0.000000e+00> : vector<192x128xf32>
    %118 = tpu.matmul %115, %117, %cst_76 {dimension_numbers = #tpu.dot_dimension_numbers<[1], [0], [0], [1], [0, 0, 1, 1], [], []>} : vector<192x128xbf16>, vector<128x128xbf16>, vector<192x128xf32> -> vector<192x128xf32>
    %119 = arith.addf %114, %118 : vector<192x128xf32>
    %120 = vector.broadcast %4 : vector<192x1xf32> to vector<192x128xf32>
    %121 = arith.mulf %119, %120 : vector<192x128xf32>
    %cst_77 = arith.constant dense<0.000000e+00> : vector<128xf32>
    %122 = vector.multi_reduction <add>, %121, %cst_77 [0] : vector<192x128xf32> to vector<128xf32>
    %123 = vector.shape_cast %122 : vector<128xf32> to vector<1x128xf32>
    %124 = arith.mulf %121, %119 : vector<192x128xf32>
    %cst_78 = arith.constant dense<0.000000e+00> : vector<128xf32>
    %125 = vector.multi_reduction <add>, %124, %cst_78 [0] : vector<192x128xf32> to vector<128xf32>
    %126 = vector.shape_cast %125 : vector<128xf32> to vector<1x128xf32>
    %cst_79 = arith.constant 0.0069444445 : f32
    %127 = vector.broadcast %cst_79 : f32 to vector<1x128xf32>
    %128 = arith.mulf %123, %127 : vector<1x128xf32>
    %cst_80 = arith.constant 0.0069444445 : f32
    %129 = vector.broadcast %cst_80 : f32 to vector<1x128xf32>
    %130 = arith.mulf %126, %129 : vector<1x128xf32>
    %131 = arith.mulf %128, %128 : vector<1x128xf32>
    %132 = arith.subf %130, %131 : vector<1x128xf32>
    %133 = vector.broadcast %128 : vector<1x128xf32> to vector<192x128xf32>
    %134 = arith.subf %119, %133 : vector<192x128xf32>
    %cst_81 = arith.constant 9.99999974E-6 : f32
    %135 = vector.broadcast %cst_81 : f32 to vector<1x128xf32>
    %136 = arith.addf %132, %135 : vector<1x128xf32>
    %137 = math.rsqrt %136 : vector<1x128xf32>
    %138 = vector.broadcast %137 : vector<1x128xf32> to vector<192x128xf32>
    %139 = arith.mulf %134, %138 : vector<192x128xf32>
    %140 = vector.extract_strided_slice %1 {offsets = [34, 0], sizes = [192, 128], strides = [1, 1]} : vector<266x128xf32> to vector<192x128xf32>
    %141 = arith.addf %139, %140 : vector<192x128xf32>
    %cst_82 = arith.constant 0.000000e+00 : f32
    %142 = vector.broadcast %cst_82 : f32 to vector<192x128xf32>
    %143 = arith.maximumf %141, %142 : vector<192x128xf32>
    %c0_83 = arith.constant 0 : index
    %c0_84 = arith.constant 0 : index
    %c0_85 = arith.constant 0 : index
    %144 = vector.load %arg6[%c0_83, %c0_84, %c0_85] : memref<1x192x128xf32, #tpu.memory_space<vmem>>, vector<1x192x128xf32>
    %145 = vector.shape_cast %144 : vector<1x192x128xf32> to vector<192x128xf32>
    %146 = vector.shape_cast %143 : vector<192x128xf32> to vector<1x192x128xf32>
    tpu.vector_store %arg6[%c0_83, %c0_84, %c0_85], %146 {strides = array<i32>} : memref<1x192x128xf32, #tpu.memory_space<vmem>>, vector<1x192x128xf32>,
    return
  }
  func.func @transform_0(%arg0: i32) -> (i32, i32, i32) {
    %c0_i32 = arith.constant 0 : i32
    %c0_i32_0 = arith.constant 0 : i32
    %c0_i32_1 = arith.constant 0 : i32
    return %arg0, %c0_i32, %c0_i32_0 : i32, i32, i32
  }
  func.func @transform_1(%arg0: i32) -> (i32, i32, i32) {
    %c0_i32 = arith.constant 0 : i32
    %c0_i32_0 = arith.constant 0 : i32
    %c0_i32_1 = arith.constant 0 : i32
    %c0_i32_2 = arith.constant 0 : i32
    return %c0_i32, %c0_i32_0, %c0_i32_1 : i32, i32, i32
  }
  func.func @transform_2(%arg0: i32) -> (i32, i32, i32) {
    %c0_i32 = arith.constant 0 : i32
    %c0_i32_0 = arith.constant 0 : i32
    %c0_i32_1 = arith.constant 0 : i32
    %c0_i32_2 = arith.constant 0 : i32
    return %c0_i32, %c0_i32_0, %c0_i32_1 : i32, i32, i32
  }
  func.func @transform_3(%arg0: i32) -> (i32, i32) {
    %c0_i32 = arith.constant 0 : i32
    %c0_i32_0 = arith.constant 0 : i32
    %c0_i32_1 = arith.constant 0 : i32
    return %c0_i32, %c0_i32_0 : i32, i32
  }
  func.func @transform_4(%arg0: i32) -> (i32, i32) {
    %c0_i32 = arith.constant 0 : i32
    %c0_i32_0 = arith.constant 0 : i32
    %c0_i32_1 = arith.constant 0 : i32
    return %c0_i32, %c0_i32_0 : i32, i32
  }
  func.func @transform_5(%arg0: i32) -> (i32, i32, i32) {
    %c0_i32 = arith.constant 0 : i32
    %c0_i32_0 = arith.constant 0 : i32
    %c0_i32_1 = arith.constant 0 : i32
    return %arg0, %c0_i32, %c0_i32_0 : i32, i32, i32
  }
}

</mosaic_0001>

<bundles_post_ra>
// kernel: resblock_forward.1
= control target key start
LH: loop header
LB: loop body
LE: loop exit
PB: predicated region body
PF: predicated region fallthrough
CT: control target
= control target key end

     0   :  { %s7761_s18 = smov 0   ;;  %s10808_s0 = inlined_call_operand.vmem [shape: f32[2,266,128], index: 0, kind: input, shape index: {}]   ;;  %s10809_s1 = inlined_call_operand.vmem [shape: bf16[9,128,128], index: 1, kind: input, shape index: {}]   ;;  %s10810_s2 = inlined_call_operand.vmem [shape: bf16[9,128,128], index: 2, kind: input, shape index: {}]   ;;  %s10811_s3 = inlined_call_operand.vmem [shape: f32[232,1], index: 3, kind: input, shape index: {}]   ;;  %s10812_s4 = inlined_call_operand.vmem [shape: f32[192,1], index: 4, kind: input, shape index: {}]   ;;  %s10813_s5 = inlined_call_operand.vmem [shape: f32[2,192,128], index: 5, kind: output, shape index: {}]  }
   0x1 LB: > { %s5696_s19 = sadd.s32 4294967295, %s7726_s18   ;;  %p5700_p0 = scmp.ge.s32.totalorder %s7726_s18, 1  ;;  %s7726_s18 = sphi %s7761_s18, %s15_s18  }
   0x2   : > { %p187_p1 = scmp.lt.s32.totalorder %s7726_s18, 3 }
   0x4   : > { %p188_p2 = pnand %p5700_p0, %p187_p1 }
   0x6   : > { %191 = sbr.rel (%p188_p2) target bundleno = 1428 (0x594), region = 40 }
   0xb   : > { %v7567_v0 = vld [vmem:[%s10809_s1 + $0x78] sm:$0xff]   ;;  %v10816_v1 = vmov 0.0   ;;  %v7569_v3 = vld [vmem:[%s10809_s1 + $0x70] sm:$0xff]   ;;  %vm7729_vm0 = vmmov 0   ;;  %p215_p3 = scmp.lt.s32.totalorder %s5696_s19, 1  ;;  %v7571_v5 = vld [vmem:[%s10809_s1 + $0x68] sm:$0xff]  }
   0xc   : > { %6492 = vmatprep.subr.bf16.mxu0 %v10816_v1  ;;  %6568 = vmatprep.subr.bf16.mxu1 %v10816_v1  ;;  %v7568_v2 = vld [vmem:[%s10809_s1 + $0x38] sm:$0xff]   ;;  %v7570_v4 = vld [vmem:[%s10809_s1 + $0x30] sm:$0xff]   ;;  %v7572_v6 = vld [vmem:[%s10809_s1 + $0x28] sm:$0xff]   ;;  %vm5495_vm1 = vcmask 1045504   ;;  %vm363_vm2 = vsmask.f32 7424 }
   0xd   : > { %6493 = vmatpush3.bf16.msra.mxu0 %v7567_v0  ;;  %6508 = vmatprep.mubr.msk.bf16.mxu0 %vm7729_vm0, %v10816_v1  ;;  %s11030_s19 = smov (!%p215_p3, %s5696_s19), 1  ;;  %v7573_v7 = vld [vmem:[%s10809_s1 + $0x60] sm:$0xff]   ;;  %v7575_v9 = vld [vmem:[%s10809_s1 + $0x58] sm:$0xff]   ;;  %v7577_v16 = vld [vmem:[%s10809_s1 + $0x50] sm:$0xff]   ;;  %vm930_vm3 = vcmask 1046528  }
   0xe   : > { %6569 = vmatpush3.bf16.msra.mxu1 %v7568_v2  ;;  %6494 = vmatprep.subr.bf16.mxu0 %v10816_v1  ;;  %s7552_s7 = smul.u32 272, %s11030_s19  ;;  %v7574_v8 = vld [vmem:[%s10809_s1 + $0x20] sm:$0xff]   ;;  %v7576_v10 = vld [vmem:[%s10809_s1 + $0x18] sm:$0xff]   ;;  %v7578_v19 = vld [vmem:[%s10809_s1 + $0x10] sm:$0xff]  }
   0xf   : > { %6570 = vmatprep.subr.bf16.mxu1 %v10816_v1  ;;  %6584 = vmatprep.mubr.msk.bf16.mxu1 %vm7729_vm0, %v10816_v1  ;;  %v7579_v28 = vld [vmem:[%s10809_s1 + $0x48] sm:$0xff]   ;;  %v7581_v40 = vld [vmem:[%s10809_s1 + $0x40] sm:$0xff]   ;;  %v7583_v55 = vld [vmem:[%s10809_s1 + $0xb8] sm:$0xff]  }
  0x10   : > { %s7811_s14 = scalar_lea.vmem %s10808_s0, %s7552_s7  ;;  %v7580_v33 = vld [vmem:[%s10809_s1 + $0x8] sm:$0xff]   ;;  %v7582_v41 = vld [vmem:[%s10809_s1] sm:$0xff]  }
  0x11   : > { %6495 = vmatpush3.bf16.msra.mxu0 %v7569_v3  ;;  %v226_v11 = vld [vmem:[%s7811_s14] sm:$0xff]  ;;  %v227_v12 = vld [vmem:[%s7811_s14 + $0x8] sm:$0xff]  ;;  %v228_v13 = vld [vmem:[%s7811_s14 + $0x10] sm:$0xff] }
  0x12   : > { %6571 = vmatpush3.bf16.msra.mxu1 %v7570_v4  ;;  %6496 = vmatprep.subr.bf16.mxu0 %v10816_v1  ;;  %v229_v14 = vld [vmem:[%s7811_s14 + $0x18] sm:$0xff]  ;;  %v7825_v15 = vpack.c.bf16 %v227_v12, %v226_v11  ;;  %v230_v18 = vld [vmem:[%s7811_s14 + $0x20] sm:$0xff]  ;;  %v231_v21 = vld [vmem:[%s7811_s14 + $0x28] sm:$0xff] }
  0x13   : > { %6572 = vmatprep.subr.bf16.mxu1 %v10816_v1  ;;  %v7830_v17 = vpack.c.bf16 %v229_v14, %v228_v13  ;;  %v5496_v22 = vrot.slane %v230_v18, 2  ;;  %v5497_v23 = vrot.slane %v231_v21, 2  ;;  %v232_v24 = vld [vmem:[%s7811_s14 + $0x30] sm:$0xff]  ;;  %v233_v26 = vld [vmem:[%s7811_s14 + $0x38] sm:$0xff]  ;;  %v7862_v36 = vld [vmem:[%s7811_s14 + $0x40] sm:$0xff]  ;;  %v7864_v37 = vpack.c.bf16 %v231_v21, %v230_v18 }
  0x14   : > { %v367_v20 = vshll.u32 %v7825_v15, 16  ;;  %v365_v25 = vshrl.u32 %v7825_v15, 16  ;;  %v5499_v27 = vrot.slane %v232_v24, 2  ;;  %v5501_v32 = vrot.slane %v233_v26, 2  ;;  %v7867_v38 = vld [vmem:[%s7811_s14 + $0x48] sm:$0xff]  ;;  %v7882_v46 = vld [vmem:[%s7811_s14 + $0x50] sm:$0xff] }
  0x15   : > { %6497 = vmatpush3.bf16.msra.mxu0 %v7571_v5  ;;  %v372_v30 = vshll.u32 %v7830_v17, 16  ;;  %v7848_v31 = vsel %vm5495_vm1, %v5496_v22, %v5497_v23  ;;  %v5503_v39 = vrot.slane %v7862_v36, 2  ;;  %v5505_v44 = vrot.slane %v7867_v38, 2  ;;  %v7885_v47 = vld [vmem:[%s7811_s14 + $0x58] sm:$0xff]  ;;  %v7896_v53 = vld [vmem:[%s7811_s14 + $0x60] sm:$0xff]  ;;  %v239_v58 = vld [vmem:[%s7811_s14 + $0x68] sm:$0xff] }
  0x16   : > { %6573 = vmatpush3.bf16.msra.mxu1 %v7572_v6  ;;  %6498 = vmatprep.subr.bf16.mxu0 %v10816_v1  ;;  %v369_v29 = vrot.slane %v367_v20, 1  ;;  %10841 = vst [vmem:[#allocation2_spill] sm:$0xff] %v7848_v31  ;;  %v7855_v34 = vsel %vm5495_vm1, %v5497_v23, %v5499_v27  ;;  %v7859_v35 = vsel %vm5495_vm1, %v5499_v27, %v5501_v32  ;;  %v5507_v49 = vrot.slane %v7882_v46, 2  ;;  %v240_v61 = vld [vmem:[%s7811_s14 + $0x70] sm:$0xff]  ;;  %v241_v63 = vld [vmem:[%s7811_s14 + $0x78] sm:$0xff]  ;;  %v7971_v27 = vld [vmem:[%s7811_s14 + $0xa0] sm:$0xff] }
  0x17   : > { %6574 = vmatprep.subr.bf16.mxu1 %v10816_v1  ;;  %10842 = vst [vmem:[#allocation3_spill] sm:$0xff] %v7855_v34  ;;  %10843 = vst [vmem:[#allocation4_spill] sm:$0xff] %v7859_v35  ;;  %v374_v43 = vrot.slane %v372_v30, 1  ;;  %v7879_v45 = vsel %vm5495_vm1, %v5501_v32, %v5503_v39  ;;  %v7889_v48 = vsel %vm5495_vm1, %v5503_v39, %v5505_v44  ;;  %v5509_v50 = vrot.slane %v7885_v47, 2  ;;  %v7584_v4 = vld [vmem:[%s10809_s1 + $0xb0] sm:$0xff]   ;;  %v7590_v13 = vld [vmem:[%s10809_s1 + $0xf8] sm:$0xff]  }
  0x18   : > { %v370_v42 = vor.u32 %v369_v29, %v365_v25  ;;  %10844 = vst [vmem:[#allocation5_spill] sm:$0xff] %v7879_v45  ;;  %10845 = vst [vmem:[#allocation6_spill] sm:$0xff] %v7889_v48  ;;  %v376_v51 = vshrl.u32 %v7830_v17, 16  ;;  %v380_v52 = vshll.u32 %v7864_v37, 16  ;;  %v7903_v56 = vsel %vm5495_vm1, %v5505_v44, %v5507_v49  ;;  %v7952_v18 = vld [vmem:[%s7811_s14 + $0x90] sm:$0xff]  ;;  %v7956_v20 = vld [vmem:[%s7811_s14 + $0x98] sm:$0xff] }
  0x19   : > { %6499 = vmatpush3.bf16.msra.mxu0 %v7573_v7  ;;  %10846 = vst [vmem:[#allocation7_spill] sm:$0xff] %v7903_v56  ;;  %v7906_v57 = vsel %vm5495_vm1, %v5507_v49, %v5509_v50  ;;  %v5511_v59 = vrot.slane %v7896_v53, 2  ;;  %v5513_v60 = vrot.slane %v239_v58, 2  ;;  %v5515_v0 = vrot.slane %v240_v61, 2  ;;  %v7926_v7 = vld [vmem:[%s7811_s14 + $0x80] sm:$0xff]  ;;  %v7591_v22 = vld [vmem:[%s10809_s1 + $0xf0] sm:$0xff]  }
  0x1a   : > { %6575 = vmatpush3.bf16.msra.mxu1 %v7574_v8  ;;  %6500 = vmatprep.subr.bf16.mxu0 %v10816_v1  ;;  %v375_v54 = vsel %vm363_vm2, %v370_v42, %v374_v43  ;;  %10847 = vst [vmem:[#allocation8_spill] sm:$0xff] %v7906_v57  ;;  %v382_v2 = vrot.slane %v380_v52, 1  ;;  %v7917_v3 = vpack.c.bf16 %v233_v26, %v232_v24  ;;  %v5517_v6 = vrot.slane %v241_v63, 2  ;;  %v7990_v39 = vld [vmem:[%s7811_s14 + $0xa8] sm:$0xff]  ;;  %v8002_v44 = vld [vmem:[%s7811_s14 + $0xb0] sm:$0xff] }
  0x1b   : > { %6576 = vmatprep.subr.bf16.mxu1 %v10816_v1  ;;  %v7913_v62 = vsel %vm5495_vm1, %v5509_v50, %v5511_v59  ;;  %v7923_v5 = vsel %vm5495_vm1, %v5511_v59, %v5513_v60  ;;  %v378_v8 = vor.u32 %v376_v51, %v374_v43  ;;  %v5519_v11 = vrot.slane %v7926_v7, 2  ;;  %v7586_v50 = vld [vmem:[%s10809_s1 + $0xa0] sm:$0xff]  }
  0x1c   : > { %10848 = vst [vmem:[#allocation9_spill] sm:$0xff] %v7913_v62  ;;  %10849 = vst [vmem:[#allocation10_spill] sm:$0xff] %v7923_v5  ;;  %v7941_v12 = vsel %vm5495_vm1, %v5515_v0, %v5517_v6  ;;  %v5523_v21 = vrot.slane %v7952_v18, 2  ;;  %v384_v24 = vshrl.u32 %v7864_v37, 16  ;;  %v5525_v26 = vrot.slane %v7956_v20, 2 }
  0x1d   : > { %6501 = vmatpush3.bf16.msra.mxu0 %v7575_v9  ;;  %v7930_v9 = vsel %vm5495_vm1, %v5513_v60, %v5515_v0  ;;  %10851 = vst [vmem:[#allocation12_spill] sm:$0xff] %v7941_v12  ;;  %v7948_v14 = vsel %vm5495_vm1, %v5517_v6, %v5519_v11  ;;  %v7963_v23 = vsel %vm363_vm2, %v378_v8, %v382_v2  ;;  %v5527_v30 = vrot.slane %v7971_v27, 2  ;;  %v7593_v60 = vld [vmem:[%s10809_s1 + $0xe0] sm:$0xff]   ;;  %v7587_v6 = vld [vmem:[%s10809_s1 + $0x98] sm:$0xff]  }
  0x1e   : > { %6577 = vmatpush3.bf16.msra.mxu1 %v7576_v10  ;;  %6502 = vmatprep.subr.bf16.mxu0 %v10816_v1  ;;  %10850 = vst [vmem:[#allocation11_spill] sm:$0xff] %v7930_v9  ;;  %v7933_v10 = vld [vmem:[%s7811_s14 + $0x88] sm:$0xff]  ;;  %10852 = vst [vmem:[#allocation13_spill] sm:$0xff] %v7948_v14  ;;  %v7984_v32 = vpack.c.bf16 %v7867_v38, %v7862_v36  ;;  %v5529_v43 = vrot.slane %v7990_v39, 2  ;;  %v386_v38 = vor.u32 %v384_v24, %v382_v2 }
  0x1f   : > { %6578 = vmatprep.subr.bf16.mxu1 %v10816_v1  ;;  %v7998_v42 = vsel %vm5495_vm1, %v5525_v26, %v5527_v30  ;;  %v7592_v36 = vld [vmem:[%s10809_s1 + $0xe8] sm:$0xff]   ;;  %v5531_v49 = vrot.slane %v8002_v44, 2  ;;  %v8022_v51 = vpack.c.bf16 %v241_v63, %v240_v61  ;;  %v392_v63 = vshrl.u32 %v7917_v3, 16 }
  0x20   : > { %10856 = vst [vmem:[#allocation17_spill] sm:$0xff] %v7998_v42  ;;  %v8025_v52 = vsel %vm5495_vm1, %v5527_v30, %v5529_v43 }
  0x21   : > { %6503 = vmatpush3.bf16.msra.mxu0 %v7577_v16  ;;  %v5521_v16 = vrot.slane %v7933_v10, 2  ;;  %10858 = vst [vmem:[#allocation19_spill] sm:$0xff] %v8025_v52  ;;  %v420_v2 = vshll.u32 %v8022_v51, 16  ;;  %v424_v24 = vshrl.u32 %v8022_v51, 16 }
  0x22   : > { %6579 = vmatpush3.bf16.msra.mxu1 %v7578_v19  ;;  %6504 = vmatprep.subr.bf16.mxu0 %v10816_v1  ;;  %v388_v19 = vshll.u32 %v7917_v3, 16 }
  0x23   : > { %6580 = vmatprep.subr.bf16.mxu1 %v10816_v1  ;;  %v7967_v25 = vsel %vm5495_vm1, %v5519_v11, %v5521_v16  ;;  %v7979_v29 = vsel %vm5495_vm1, %v5521_v16, %v5523_v21  ;;  %v400_v11 = vshrl.u32 %v7984_v32, 16 }
  0x24   : > { %10853 = vst [vmem:[#allocation14_spill] sm:$0xff] %v7967_v25  ;;  %10854 = vst [vmem:[#allocation15_spill] sm:$0xff] %v7979_v29 }
  0x25   : > { %6505 = vmatpush3.bf16.msra.mxu0 %v7579_v28  ;;  %v7585_v28 = vld [vmem:[%s10809_s1 + $0xa8] sm:$0xff]  }
  0x26   : > { %6581 = vmatpush3.bf16.msra.mxu1 %v7580_v33  ;;  %6506 = vmatprep.subr.bf16.mxu0 %v10816_v1  ;;  %v7987_v33 = vsel %vm5495_vm1, %v5523_v21, %v5525_v26  ;;  %v422_v26 = vrot.slane %v420_v2, 1 }
  0x27   : > { %6582 = vmatprep.subr.bf16.mxu1 %v10816_v1  ;;  %10855 = vst [vmem:[#allocation16_spill] sm:$0xff] %v7987_v33 }
  0x29   : > { %6507 = vmatpush3.bf16.msra.mxu0 %v7581_v40  ;;  %v390_v40 = vrot.slane %v388_v19, 1 }
  0x2a   : > { %6583 = vmatpush3.bf16.msra.mxu1 %v7582_v41  ;;  %6644 = vmatprep.subr.bf16.mxu0 %v10816_v1  ;;  %v7995_v41 = vpack.c.bf16 %v7885_v47, %v7882_v46  ;;  %v8011_v46 = vpack.c.bf16 %v239_v58, %v7896_v53  ;;  %v8014_v47 = vld [vmem:[%s7811_s14 + $0xb8] sm:$0xff] }
  0x2b   : > { %6720 = vmatprep.subr.bf16.mxu1 %v10816_v1  ;;  %10857 = vst [vmem:[#allocation18_spill] sm:$0xff] %v8014_v47  ;;  %v10814_v53 = vrot.slane %v8014_v47, 2  ;;  %v8044_v61 = vsel %vm363_vm2, %v386_v38, %v390_v40  ;;  %v394_v21 = vor.u32 %v392_v63, %v390_v40  ;;  %v7596_v40 = vld [vmem:[%s10809_s1 + $0xd0] sm:$0xff]   ;;  %v7597_v38 = vld [vmem:[%s10809_s1 + $0xc8] sm:$0xff]   ;;  %v8111_v63 = vpack.c.bf16 %v7956_v20, %v7952_v18 }
  0x2c   : > { %6509 = vmatmul.mubr.bf16.vlgmr.msra.gmra.mxu0 %v375_v54  ;;  %v396_v54 = vshll.u32 %v7984_v32, 16  ;;  %v404_v58 = vshll.u32 %v7995_v41, 16  ;;  %v412_v0 = vshll.u32 %v8011_v46, 16  ;;  %v416_v19 = vshrl.u32 %v8011_v46, 16 }
  0x2d   : > { %6585 = vmatmul.mubr.bf16.vlgmr.msra.gmra.mxu1 %v7825_v15  ;;  %6645 = vmatpush3.bf16.msra.mxu0 %v7583_v55  ;;  %v8031_v55 = vsel %vm5495_vm1, %v5529_v43, %v5531_v49  ;;  %v8038_v59 = vsel %vm5495_vm1, %v5531_v49, %v10814_v53  ;;  %v7589_v43 = vld [vmem:[%s10809_s1 + $0x88] sm:$0xff]   ;;  %10862 = vst [vmem:[#allocation23_spill] sm:$0xff] %v8111_v63  ;;  %v436_v2 = vshll.u32 %v8111_v63, 16 }
  0x2e   : > { %6512 = vmatprep.mubr.msk.bf16.mxu0 %vm7729_vm0, %v10816_v1  ;;  %6588 = vmatprep.mubr.msk.bf16.mxu1 %vm7729_vm0, %v10816_v1  ;;  %10859 = vst [vmem:[#allocation20_spill] sm:$0xff] %v8031_v55  ;;  %10860 = vst [vmem:[#allocation21_spill] sm:$0xff] %v8038_v59  ;;  %v398_v8 = vrot.slane %v396_v54, 1  ;;  %v406_v16 = vrot.slane %v404_v58, 1  ;;  %v7594_v54 = vld [vmem:[%s10809_s1 + $0x80] sm:$0xff]   ;;  %v8129_v20 = vpack.c.bf16 %v7990_v39, %v7971_v27 }
  0x2f   : > { %6646 = vmatprep.subr.bf16.mxu0 %v10816_v1  ;;  %6721 = vmatpush3.bf16.msra.mxu1 %v7590_v13  ;;  %v408_v13 = vshrl.u32 %v7995_v41, 16  ;;  %v7598_v58 = vld [vmem:[%s10809_s1 + $0xc0] sm:$0xff]   ;;  %v426_v27 = vor.u32 %v424_v24, %v422_v26 }
  0x30   : > { %6722 = vmatprep.subr.bf16.mxu1 %v10816_v1  ;;  %v402_v49 = vor.u32 %v400_v11, %v398_v8  ;;  %10863 = vst [vmem:[#allocation24_spill] sm:$0xff] %v8129_v20  ;;  %v438_v11 = vrot.slane %v436_v2, 1  ;;  %v250_v24 = vld [vmem:[%s7811_s14 + $0xc0] sm:$0xff] }
  0x31   : > { %6647 = vmatpush3.bf16.msra.mxu0 %v7584_v4  ;;  %v8052_v4 = vpack.c.bf16 %v7933_v10, %v7926_v7  ;;  %v7588_v7 = vld [vmem:[%s10809_s1 + $0x90] sm:$0xff]   ;;  %v7595_v10 = vld [vmem:[%s10809_s1 + $0xd8] sm:$0xff]  }
  0x32   : > { %6648 = vmatprep.subr.bf16.mxu0 %v10816_v1 }
  0x33   : > { %6723 = vmatpush3.bf16.msra.mxu1 %v7591_v22  ;;  %10861 = vst [vmem:[#allocation22_spill] sm:$0xff] %v8052_v4  ;;  %v414_v22 = vrot.slane %v412_v0, 1  ;;  %v432_v30 = vshrl.u32 %v8052_v4, 16  ;;  %v410_v0 = vor.u32 %v408_v13, %v406_v16  ;;  %v444_v13 = vshll.u32 %v8129_v20, 16 }
  0x34   : > { %6513 = vmatmul.mubr.bf16.gmra.mxu0 %v7963_v23  ;;  %6724 = vmatprep.subr.bf16.mxu1 %v10816_v1 }
  0x35   : > { %6589 = vmatmul.mubr.bf16.gmra.mxu1 %v7830_v17  ;;  %6516 = vmatprep.mubr.msk.bf16.mxu0 %vm7729_vm0, %v10816_v1  ;;  %v8125_v18 = vsel %vm363_vm2, %v410_v0, %v414_v22  ;;  %v446_v39 = vrot.slane %v444_v13, 1  ;;  %v254_v13 = vld [vmem:[%s7811_s14 + $0xe0] sm:$0xff] }
  0x36   : > { %6592 = vmatprep.mubr.msk.bf16.mxu1 %vm7729_vm0, %v10816_v1  ;;  %6649 = vmatpush3.bf16.msra.mxu0 %v7585_v28  ;;  %v428_v28 = vshll.u32 %v8052_v4, 16 }
  0x37   : > { %6650 = vmatprep.subr.bf16.mxu0 %v10816_v1  ;;  %6725 = vmatpush3.bf16.msra.mxu1 %v7592_v36  ;;  %v8085_v36 = vsel %vm363_vm2, %v394_v21, %v398_v8  ;;  %v418_v8 = vor.u32 %v416_v19, %v414_v22  ;;  %v448_v19 = vshrl.u32 %v8129_v20, 16  ;;  %v8159_v21 = vpack.c.bf16 %v8014_v47, %v8002_v44 }
  0x38   : > { %6726 = vmatprep.subr.bf16.mxu1 %v10816_v1 }
  0x39   : > { %10864 = vst [vmem:[#allocation25_spill] sm:$0xff] %v8159_v21 }
  0x3a   : > { %6651 = vmatpush3.bf16.msra.mxu0 %v7586_v50  ;;  %v430_v50 = vrot.slane %v428_v28, 1  ;;  %v452_v28 = vshll.u32 %v8159_v21, 16 }
  0x3b   : > { %6652 = vmatprep.subr.bf16.mxu0 %v10816_v1  ;;  %6727 = vmatpush3.bf16.msra.mxu1 %v7593_v60  ;;  %v8107_v60 = vsel %vm363_vm2, %v402_v49, %v406_v16  ;;  %v8139_v16 = vsel %vm363_vm2, %v418_v8, %v422_v26  ;;  %v251_v26 = vld [vmem:[%s7811_s14 + $0xc8] sm:$0xff] }
  0x3c   : > { %6517 = vmatmul.mubr.bf16.gmra.mxu0 %v8044_v61  ;;  %6728 = vmatprep.subr.bf16.mxu1 %v10816_v1 }
  0x3d   : > { %6593 = vmatmul.mubr.bf16.gmra.mxu1 %v7864_v37  ;;  %6520 = vmatprep.mubr.msk.bf16.mxu0 %vm7729_vm0, %v10816_v1 }
  0x3e   : > { %6596 = vmatprep.mubr.msk.bf16.mxu1 %vm7729_vm0, %v10816_v1  ;;  %6653 = vmatpush3.bf16.msra.mxu0 %v7587_v6  ;;  %v440_v6 = vshrl.u32 %v8111_v63, 16 }
  0x3f   : > { %6654 = vmatprep.subr.bf16.mxu0 %v10816_v1  ;;  %6729 = vmatpush3.bf16.msra.mxu1 %v7595_v10  ;;  %v434_v10 = vor.u32 %v432_v30, %v430_v50  ;;  %v8174_v30 = vpack.c.bf16 %v251_v26, %v250_v24 }
  0x40   : > { %6730 = vmatprep.subr.bf16.mxu1 %v10816_v1  ;;  %v442_v44 = vor.u32 %v440_v6, %v438_v11 }
  0x41   : > { %v8162_v22 = vsel %vm363_vm2, %v434_v10, %v438_v11  ;;  %10865 = vst [vmem:[#allocation26_spill] sm:$0xff] %v8174_v30  ;;  %v460_v49 = vshll.u32 %v8174_v30, 16 }
  0x42   : > { %6655 = vmatpush3.bf16.msra.mxu0 %v7588_v7  ;;  %v8149_v7 = vsel %vm363_vm2, %v426_v27, %v430_v50  ;;  %v450_v50 = vor.u32 %v448_v19, %v446_v39  ;;  %v464_v27 = vshrl.u32 %v8174_v30, 16 }
  0x43   : > { %6656 = vmatprep.subr.bf16.mxu0 %v10816_v1  ;;  %6731 = vmatpush3.bf16.msra.mxu1 %v7596_v40  ;;  %v456_v40 = vshrl.u32 %v8159_v21, 16  ;;  %v462_v2 = vrot.slane %v460_v49, 1 }
  0x44   : > { %6521 = vmatmul.mubr.bf16.gmra.mxu0 %v8085_v36  ;;  %6732 = vmatprep.subr.bf16.mxu1 %v10816_v1 }
  0x45   : > { %6597 = vmatmul.mubr.bf16.gmra.mxu1 %v7917_v3  ;;  %6524 = vmatprep.mubr.msk.bf16.mxu0 %vm7729_vm0, %v10816_v1  ;;  %v466_v26 = vor.u32 %v464_v27, %v462_v2  ;;  %v7606_v27 = vld [vmem:[%s10809_s1 + $0x178] sm:$0xff]  }
  0x46   : > { %6600 = vmatprep.mubr.msk.bf16.mxu1 %vm7729_vm0, %v10816_v1  ;;  %6657 = vmatpush3.bf16.msra.mxu0 %v7589_v43  ;;  %v8177_v43 = vsel %vm363_vm2, %v442_v44, %v446_v39  ;;  %v255_v39 = vld [vmem:[%s7811_s14 + $0xe8] sm:$0xff] }
  0x47   : > { %6658 = vmatprep.subr.bf16.mxu0 %v10816_v1  ;;  %6733 = vmatpush3.bf16.msra.mxu1 %v7597_v38  ;;  %v454_v38 = vrot.slane %v452_v28, 1  ;;  %v8206_v24 = vpack.c.bf16 %v255_v39, %v254_v13  ;;  %v7599_v13 = vld [vmem:[%s10809_s1 + $0x138] sm:$0xff]   ;;  %v7600_v39 = vld [vmem:[%s10809_s1 + $0x130] sm:$0xff]  }
  0x48   : > { %6734 = vmatprep.subr.bf16.mxu1 %v10816_v1 }
  0x49   : > { %v8189_v0 = vsel %vm363_vm2, %v450_v50, %v454_v38  ;;  %v458_v8 = vor.u32 %v456_v40, %v454_v38  ;;  %10867 = vst [vmem:[#allocation28_spill] sm:$0xff] %v8206_v24  ;;  %v476_v40 = vshll.u32 %v8206_v24, 16 }
  0x4a   : > { %6659 = vmatpush3.bf16.msra.mxu0 %v7594_v54  ;;  %v252_v54 = vld [vmem:[%s7811_s14 + $0xd0] sm:$0xff] }
  0x4b   : > { %6796 = vmatprep.subr.bf16.mxu0 %v10816_v1  ;;  %6735 = vmatpush3.bf16.msra.mxu1 %v7598_v58  ;;  %v253_v58 = vld [vmem:[%s7811_s14 + $0xd8] sm:$0xff]  ;;  %v8204_v19 = vsel %vm363_vm2, %v458_v8, %v462_v2  ;;  %v478_v49 = vrot.slane %v476_v40, 1  ;;  %v931_v2 = vrot.slane %v7825_v15, 1  ;;  %v932_v8 = vrot.slane %v7830_v17, 1 }
  0x4c   : > { %6525 = vmatmul.mubr.bf16.gmra.mxu0 %v8107_v60  ;;  %6872 = vmatprep.subr.bf16.mxu1 %v10816_v1  ;;  %v8191_v6 = vpack.c.bf16 %v253_v58, %v252_v54  ;;  %v480_v54 = vshrl.u32 %v8206_v24, 16  ;;  %v934_v15 = vrot.slane %v7864_v37, 1  ;;  %v936_v40 = vrot.slane %v7917_v3, 1 }
  0x4d   : > { %6601 = vmatmul.mubr.bf16.gmra.mxu1 %v7984_v32  ;;  %6528 = vmatprep.mubr.msk.bf16.mxu0 %vm7729_vm0, %v10816_v1 }
  0x4e   : > { %6604 = vmatprep.mubr.msk.bf16.mxu1 %vm7729_vm0, %v10816_v1  ;;  %10866 = vst [vmem:[#allocation27_spill] sm:$0xff] %v8191_v6  ;;  %v468_v11 = vshll.u32 %v8191_v6, 16  ;;  %v472_v28 = vshrl.u32 %v8191_v6, 16  ;;  %v8235_v58 = vor.u32 %v480_v54, %v478_v49  ;;  %v8293_v54 = vsel %vm930_vm3, %v934_v15, %v936_v40 }
  0x4f   : > { %10868 = vst [vmem:[#allocation29_spill] sm:$0xff] %v8293_v54 }
  0x50   : > { %v470_v10 = vrot.slane %v468_v11, 1  ;;  %v933_v11 = vsel %vm930_vm3, %v931_v2, %v932_v8  ;;  %v7603_v2 = vld [vmem:[%s10809_s1 + $0x118] sm:$0xff]  }
  0x52   : > { %v8217_v44 = vsel %vm363_vm2, %v466_v26, %v470_v10  ;;  %v474_v38 = vor.u32 %v472_v28, %v470_v10  ;;  %v7607_v10 = vld [vmem:[%s10809_s1 + $0x170] sm:$0xff]   ;;  %v7601_v26 = vld [vmem:[%s10809_s1 + $0x128] sm:$0xff]  }
  0x53   : > { %v7608_v28 = vld [vmem:[%s10809_s1 + $0x168] sm:$0xff]  }
  0x54   : > { %6529 = vmatmul.mubr.bf16.gmra.mxu0 %v8125_v18  ;;  %v8226_v50 = vsel %vm363_vm2, %v474_v38, %v478_v49  ;;  %v7602_v38 = vld [vmem:[%s10809_s1 + $0x120] sm:$0xff]  }
  0x55   : > { %6605 = vmatmul.mubr.bf16.gmra.mxu1 %v7995_v41  ;;  %6532 = vmatprep.mubr.msk.bf16.mxu0 %vm7729_vm0, %v10816_v1  ;;  %v7609_v49 = vld [vmem:[%s10809_s1 + $0x160] sm:$0xff]  }
  0x56   : > { %6608 = vmatprep.mubr.msk.bf16.mxu1 %vm7729_vm0, %v10816_v1 }
  0x5c   : > { %6533 = vmatmul.mubr.bf16.gmra.mxu0 %v8139_v16 }
  0x5d   : > { %6609 = vmatmul.mubr.bf16.gmra.mxu1 %v8011_v46  ;;  %6536 = vmatprep.mubr.msk.bf16.mxu0 %vm7729_vm0, %v10816_v1 }
  0x5e   : > { %6612 = vmatprep.mubr.msk.bf16.mxu1 %vm7729_vm0, %v10816_v1 }
  0x64   : > { %6537 = vmatmul.mubr.bf16.gmra.mxu0 %v8149_v7 }
  0x65   : > { %6613 = vmatmul.mubr.bf16.gmra.mxu1 %v8022_v51  ;;  %6540 = vmatprep.mubr.msk.bf16.mxu0 %vm7729_vm0, %v10816_v1 }
  0x66   : > { %6616 = vmatprep.mubr.msk.bf16.mxu1 %vm7729_vm0, %v10816_v1 }
  0x6c   : > { %6541 = vmatmul.mubr.bf16.gmra.mxu0 %v8162_v22 }
  0x6d   : > { %6617 = vmatmul.mubr.bf16.gmra.mxu1 %v8052_v4  ;;  %6544 = vmatprep.mubr.msk.bf16.mxu0 %vm7729_vm0, %v10816_v1 }
  0x6e   : > { %6620 = vmatprep.mubr.msk.bf16.mxu1 %vm7729_vm0, %v10816_v1 }
  0x74   : > { %6545 = vmatmul.mubr.bf16.gmra.mxu0 %v8177_v43 }
  0x75   : > { %6621 = vmatmul.mubr.bf16.gmra.mxu1 %v8111_v63  ;;  %6548 = vmatprep.mubr.msk.bf16.mxu0 %vm7729_vm0, %v10816_v1 }
  0x76   : > { %6624 = vmatprep.mubr.msk.bf16.mxu1 %vm7729_vm0, %v10816_v1 }
  0x7c   : > { %6549 = vmatmul.mubr.bf16.gmra.mxu0 %v8189_v0 }
  0x7d   : > { %6625 = vmatmul.mubr.bf16.gmra.mxu1 %v8129_v20  ;;  %6552 = vmatprep.mubr.msk.bf16.mxu0 %vm7729_vm0, %v10816_v1 }
  0x7e   : > { %6628 = vmatprep.mubr.msk.bf16.mxu1 %vm7729_vm0, %v10816_v1 }
  0x84   : > { %6553 = vmatmul.mubr.bf16.gmra.mxu0 %v8204_v19 }
  0x85   : > { %6629 = vmatmul.mubr.bf16.gmra.mxu1 %v8159_v21  ;;  %6556 = vmatprep.mubr.msk.bf16.mxu0 %vm7729_vm0, %v10816_v1 }
  0x86   : > { %6632 = vmatprep.mubr.msk.bf16.mxu1 %vm7729_vm0, %v10816_v1 }
  0x8c   : > { %6557 = vmatmul.mubr.bf16.gmra.mxu0 %v8217_v44 }
  0x8d   : > { %6633 = vmatmul.mubr.bf16.gmra.mxu1 %v8174_v30  ;;  %6560 = vmatprep.mubr.msk.bf16.mxu0 %vm7729_vm0, %v10816_v1 }
  0x8e   : > { %6636 = vmatprep.mubr.msk.bf16.mxu1 %vm7729_vm0, %v10816_v1 }
  0x94   : > { %6561 = vmatmul.mubr.bf16.gmra.mxu0 %v8226_v50 }
  0x95   : > { %6637 = vmatmul.mubr.bf16.gmra.mxu1 %v8191_v6  ;;  %6564 = vmatprep.mubr.msk.bf16.mxu0 %vm7729_vm0, %v10816_v1 }
  0x96   : > { %6640 = vmatprep.mubr.msk.bf16.mxu1 %vm7729_vm0, %v10816_v1 }
  0x9c   : > { %6565 = vmatmul.mubr.bf16.gmra.mxu0 %v8235_v58 }
  0x9d   : > { %6641 = vmatmul.mubr.bf16.gmra.mxu1 %v8206_v24  ;;  %6660 = vmatprep.mubr.msk.bf16.mxu0 %vm7729_vm0, %v10816_v1 }
  0x9e   : > { %6736 = vmatprep.mubr.msk.bf16.mxu1 %vm7729_vm0, %v10816_v1 }
  0xa4   : > { %6661 = vmatmul.mubr.bf16.vlgmr.msra.gmra.mxu0 %v933_v11  ;;  %v938_v11 = vrot.slane %v7984_v32, 1 }
  0xa5   : > { %6797 = vmatpush3.bf16.msra.mxu0 %v7599_v13  ;;  %6737 = vmatmul.mubr.bf16.vlgmr.msra.gmra.mxu1 %v7830_v17  ;;  %v8267_v17 = vsel %vm930_vm3, %v932_v8, %v934_v15  ;;  %v7611_v8 = vld [vmem:[%s10809_s1 + $0x158] sm:$0xff]   ;;  %v7604_v13 = vld [vmem:[%s10809_s1 + $0x110] sm:$0xff]  }
  0xa6   : > { %6664 = vmatprep.mubr.msk.bf16.mxu0 %vm7729_vm0, %v10816_v1  ;;  %6740 = vmatprep.mubr.msk.bf16.mxu1 %vm7729_vm0, %v10816_v1  ;;  %v8319_v15 = vsel %vm930_vm3, %v936_v40, %v938_v11  ;;  %v7614_v40 = vld [vmem:[%s10809_s1 + $0x140] sm:$0xff]  }
  0xa7   : > { %6798 = vmatprep.subr.bf16.mxu0 %v10816_v1  ;;  %6873 = vmatpush3.bf16.msra.mxu1 %v7606_v27  ;;  %v7612_v27 = vld [vmem:[%s10809_s1 + $0x150] sm:$0xff]   ;;  %10869 = vst [vmem:[#allocation30_spill] sm:$0xff] %v8319_v15 }
  0xa8   : > { %6874 = vmatprep.subr.bf16.mxu1 %v10816_v1 }
  0xa9   : > { %6799 = vmatpush3.bf16.msra.mxu0 %v7600_v39  ;;  %v7605_v39 = vld [vmem:[%s10809_s1 + $0x108] sm:$0xff]  }
  0xaa   : > { %6800 = vmatprep.subr.bf16.mxu0 %v10816_v1 }
  0xab   : > { %6875 = vmatpush3.bf16.msra.mxu1 %v7607_v10  ;;  %v7613_v10 = vld [vmem:[%s10809_s1 + $0x148] sm:$0xff]  }
  0xac   : > { %6665 = vmatmul.mubr.bf16.gmra.mxu0 %v8267_v17  ;;  %6876 = vmatprep.subr.bf16.mxu1 %v10816_v1 }
  0xad   : > { %6741 = vmatmul.mubr.bf16.gmra.mxu1 %v7864_v37  ;;  %6668 = vmatprep.mubr.msk.bf16.mxu0 %vm7729_vm0, %v10816_v1 }
  0xae   : > { %6744 = vmatprep.mubr.msk.bf16.mxu1 %vm7729_vm0, %v10816_v1  ;;  %6801 = vmatpush3.bf16.msra.mxu0 %v7601_v26  ;;  %v940_v26 = vrot.slane %v7995_v41, 1 }
  0xaf   : > { %6802 = vmatprep.subr.bf16.mxu0 %v10816_v1  ;;  %6877 = vmatpush3.bf16.msra.mxu1 %v7608_v28  ;;  %v7610_v28 = vld [vmem:[%s10809_s1 + $0x100] sm:$0xff]  }
  0xb0   : > { %6878 = vmatprep.subr.bf16.mxu1 %v10816_v1 }
  0xb2   : > { %6803 = vmatpush3.bf16.msra.mxu0 %v7602_v38  ;;  %v8345_v38 = vsel %vm930_vm3, %v938_v11, %v940_v26 }
  0xb3   : > { %6804 = vmatprep.subr.bf16.mxu0 %v10816_v1  ;;  %6879 = vmatpush3.bf16.msra.mxu1 %v7609_v49  ;;  %10870 = vst [vmem:[#allocation31_spill] sm:$0xff] %v8345_v38  ;;  %v942_v49 = vrot.slane %v8011_v46, 1 }
  0xb4   : > { %6669 = vmatmul.mubr.bf16.gmra.mxu0 %v8293_v54  ;;  %6880 = vmatprep.subr.bf16.mxu1 %v10816_v1 }
  0xb5   : > { %6745 = vmatmul.mubr.bf16.gmra.mxu1 %v7917_v3  ;;  %6672 = vmatprep.mubr.msk.bf16.mxu0 %vm7729_vm0, %v10816_v1 }
  0xb6   : > { %6748 = vmatprep.mubr.msk.bf16.mxu1 %vm7729_vm0, %v10816_v1  ;;  %6805 = vmatpush3.bf16.msra.mxu0 %v7603_v2  ;;  %v8357_v2 = vsel %vm930_vm3, %v940_v26, %v942_v49  ;;  %v950_v26 = vrot.slane %v8129_v20, 1 }
  0xb7   : > { %6806 = vmatprep.subr.bf16.mxu0 %v10816_v1  ;;  %6881 = vmatpush3.bf16.msra.mxu1 %v7611_v8  ;;  %10871 = vst [vmem:[#allocation32_spill] sm:$0xff] %v8357_v2  ;;  %v944_v8 = vrot.slane %v8022_v51, 1 }
  0xb8   : > { %6882 = vmatprep.subr.bf16.mxu1 %v10816_v1 }
  0xb9   : > { %v8367_v11 = vsel %vm930_vm3, %v942_v49, %v944_v8 }
  0xba   : > { %6807 = vmatpush3.bf16.msra.mxu0 %v7604_v13  ;;  %10872 = vst [vmem:[#allocation33_spill] sm:$0xff] %v8367_v11  ;;  %v946_v13 = vrot.slane %v8052_v4, 1 }
  0xbb   : > { %6808 = vmatprep.subr.bf16.mxu0 %v10816_v1  ;;  %6883 = vmatpush3.bf16.msra.mxu1 %v7612_v27 }
  0xbc   : > { %6673 = vmatmul.mubr.bf16.gmra.mxu0 %v8319_v15  ;;  %6884 = vmatprep.subr.bf16.mxu1 %v10816_v1  ;;  %v8377_v27 = vsel %vm930_vm3, %v944_v8, %v946_v13  ;;  %v952_v8 = vrot.slane %v8159_v21, 1 }
  0xbd   : > { %6749 = vmatmul.mubr.bf16.gmra.mxu1 %v7984_v32  ;;  %6676 = vmatprep.mubr.msk.bf16.mxu0 %vm7729_vm0, %v10816_v1  ;;  %10873 = vst [vmem:[#allocation34_spill] sm:$0xff] %v8377_v27 }
  0xbe   : > { %6752 = vmatprep.mubr.msk.bf16.mxu1 %vm7729_vm0, %v10816_v1  ;;  %6809 = vmatpush3.bf16.msra.mxu0 %v7605_v39  ;;  %v948_v39 = vrot.slane %v8111_v63, 1  ;;  %v8409_v52 = vsel %vm930_vm3, %v950_v26, %v952_v8 }
  0xbf   : > { %6810 = vmatprep.subr.bf16.mxu0 %v10816_v1  ;;  %6885 = vmatpush3.bf16.msra.mxu1 %v7613_v10  ;;  %10876 = vst [vmem:[#allocation37_spill] sm:$0xff] %v8409_v52 }
  0xc0   : > { %6886 = vmatprep.subr.bf16.mxu1 %v10816_v1  ;;  %v8387_v10 = vsel %vm930_vm3, %v946_v13, %v948_v39 }
  0xc1   : > { %10874 = vst [vmem:[#allocation35_spill] sm:$0xff] %v8387_v10 }
  0xc2   : > { %6811 = vmatpush3.bf16.msra.mxu0 %v7610_v28  ;;  %v8397_v28 = vsel %vm930_vm3, %v948_v39, %v950_v26 }
  0xc3   : > { %6887 = vmatpush3.bf16.msra.mxu1 %v7614_v40  ;;  %6948 = vmatprep.subr.bf16.mxu0 %v10816_v1  ;;  %10875 = vst [vmem:[#allocation36_spill] sm:$0xff] %v8397_v28 }
  0xc4   : > { %6677 = vmatmul.mubr.bf16.gmra.mxu0 %v8345_v38  ;;  %7024 = vmatprep.subr.bf16.mxu1 %v10816_v1 }
  0xc5   : > { %6753 = vmatmul.mubr.bf16.gmra.mxu1 %v7995_v41  ;;  %6680 = vmatprep.mubr.msk.bf16.mxu0 %vm7729_vm0, %v10816_v1 }
  0xc6   : > { %6756 = vmatprep.mubr.msk.bf16.mxu1 %vm7729_vm0, %v10816_v1 }
  0xcc   : > { %6681 = vmatmul.mubr.bf16.gmra.mxu0 %v8357_v2 }
  0xcd   : > { %6757 = vmatmul.mubr.bf16.gmra.mxu1 %v8011_v46  ;;  %6684 = vmatprep.mubr.msk.bf16.mxu0 %vm7729_vm0, %v10816_v1 }
  0xce   : > { %6760 = vmatprep.mubr.msk.bf16.mxu1 %vm7729_vm0, %v10816_v1 }
  0xd4   : > { %6685 = vmatmul.mubr.bf16.gmra.mxu0 %v8367_v11 }
  0xd5   : > { %6761 = vmatmul.mubr.bf16.gmra.mxu1 %v8022_v51  ;;  %6688 = vmatprep.mubr.msk.bf16.mxu0 %vm7729_vm0, %v10816_v1 }
  0xd6   : > { %6764 = vmatprep.mubr.msk.bf16.mxu1 %vm7729_vm0, %v10816_v1 }
  0xdc   : > { %6689 = vmatmul.mubr.bf16.gmra.mxu0 %v8377_v27 }
  0xdd   : > { %6765 = vmatmul.mubr.bf16.gmra.mxu1 %v8052_v4  ;;  %6692 = vmatprep.mubr.msk.bf16.mxu0 %vm7729_vm0, %v10816_v1 }
  0xde   : > { %6768 = vmatprep.mubr.msk.bf16.mxu1 %vm7729_vm0, %v10816_v1 }
  0xe4   : > { %6693 = vmatmul.mubr.bf16.gmra.mxu0 %v8387_v10 }
  0xe5   : > { %6769 = vmatmul.mubr.bf16.gmra.mxu1 %v8111_v63  ;;  %6696 = vmatprep.mubr.msk.bf16.mxu0 %vm7729_vm0, %v10816_v1 }
  0xe6   : > { %6772 = vmatprep.mubr.msk.bf16.mxu1 %vm7729_vm0, %v10816_v1 }
  0xec   : > { %v580_v40 = vpop.f32.mrf.mxu0  ;;  %6697 = vmatmul.mubr.bf16.gmra.mxu0 %v8397_v28 }
  0xed   : > { %v780_v49 = vpop.f32.mrf.mxu1  ;;  %6773 = vmatmul.mubr.bf16.gmra.mxu1 %v8129_v20  ;;  %6700 = vmatprep.mubr.msk.bf16.mxu0 %vm7729_vm0, %v10816_v1 }
  0xee   : > { %v8404_v13 = vadd.f32 %v780_v49, %v580_v40  ;;  %v6510_v53 = vpop.f32.mrf.mxu0  ;;  %6776 = vmatprep.mubr.msk.bf16.mxu1 %vm7729_vm0, %v10816_v1 }
  0xef   : > { %v6586_v59 = vpop.f32.mrf.mxu1  ;;  %v954_v53 = vrot.slane %v8174_v30, 1 }
  0xf0   : > { %v583_v39 = vpop.f32.mrf.mxu0 }
  0xf1   : > { %v783_v55 = vpop.f32.mrf.mxu1  ;;  %v8423_v26 = vsel %vm930_vm3, %v952_v8, %v954_v53 }
  0xf2   : > { %v8411_v42 = vadd.f32 %v783_v55, %v583_v39  ;;  %v6511_v33 = vpop.f32.mrf.mxu0  ;;  %10877 = vst [vmem:[#allocation38_spill] sm:$0xff] %v8423_v26 }
  0xf3   : > { %v6587_v29 = vpop.f32.mrf.mxu1 }
  0xf4   : > { %v588_v25 = vpop.f32.mrf.mxu0  ;;  %6701 = vmatmul.mubr.bf16.gmra.mxu0 %v8409_v52 }
  0xf5   : > { %v788_v14 = vpop.f32.mrf.mxu1  ;;  %6777 = vmatmul.mubr.bf16.gmra.mxu1 %v8159_v21  ;;  %6704 = vmatprep.mubr.msk.bf16.mxu0 %vm7729_vm0, %v10816_v1 }
  0xf6   : > { %v8418_v59 = vadd.f32 %v788_v14, %v588_v25  ;;  %v6514_v40 = vpop.f32.mrf.mxu0  ;;  %6780 = vmatprep.mubr.msk.bf16.mxu1 %vm7729_vm0, %v10816_v1  ;;  %v956_v14 = vrot.slane %v8191_v6, 1 }
  0xf7   : > { %v6590_v55 = vpop.f32.mrf.mxu1 }
  0xf8   : > { %v591_v33 = vpop.f32.mrf.mxu0 }
  0xf9   : > { %v791_v29 = vpop.f32.mrf.mxu1 }
  0xfa   : > { %v8425_v49 = vadd.f32 %v791_v29, %v591_v33  ;;  %v6515_v39 = vpop.f32.mrf.mxu0  ;;  %v8437_v33 = vsel %vm930_vm3, %v954_v53, %v956_v14 }
  0xfb   : > { %v6591_v12 = vpop.f32.mrf.mxu1  ;;  %10878 = vst [vmem:[#allocation39_spill] sm:$0xff] %v8437_v33 }
  0xfc   : > { %v596_v9 = vpop.f32.mrf.mxu0  ;;  %6705 = vmatmul.mubr.bf16.gmra.mxu0 %v8423_v26 }
  0xfd   : > { %v796_v5 = vpop.f32.mrf.mxu1  ;;  %6781 = vmatmul.mubr.bf16.gmra.mxu1 %v8174_v30  ;;  %6708 = vmatprep.mubr.msk.bf16.mxu0 %vm7729_vm0, %v10816_v1 }
  0xfe   : > { %v8432_v25 = vadd.f32 %v796_v5, %v596_v9  ;;  %v6518_v40 = vpop.f32.mrf.mxu0  ;;  %6784 = vmatprep.mubr.msk.bf16.mxu1 %vm7729_vm0, %v10816_v1  ;;  %v8446_v5 = vrot.slane %v8206_v24, 1 }
  0xff   : > { %v6594_v8 = vpop.f32.mrf.mxu1 }
 0x100   : > { %v599_v55 = vpop.f32.mrf.mxu0 }
 0x101   : > { %v799_v12 = vpop.f32.mrf.mxu1 }
 0x102   : > { %v8439_v29 = vadd.f32 %v799_v12, %v599_v55  ;;  %v6519_v39 = vpop.f32.mrf.mxu0  ;;  %v8454_v55 = vsel %vm930_vm3, %v956_v14, %v8446_v5  ;;  %v256_v14 = vld [vmem:[%s7811_s14 + $0xf0] sm:$0xff] }
 0x103   : > { %v6595_v62 = vpop.f32.mrf.mxu1  ;;  %10879 = vst [vmem:[#allocation40_spill] sm:$0xff] %v8454_v55 }
 0x104   : > { %v604_v57 = vpop.f32.mrf.mxu0  ;;  %6709 = vmatmul.mubr.bf16.gmra.mxu0 %v8437_v33 }
 0x105   : > { %v804_v56 = vpop.f32.mrf.mxu1  ;;  %6785 = vmatmul.mubr.bf16.gmra.mxu1 %v8191_v6  ;;  %6712 = vmatprep.mubr.msk.bf16.mxu0 %vm7729_vm0, %v10816_v1 }
 0x106   : > { %v8448_v9 = vadd.f32 %v804_v56, %v604_v57  ;;  %v6522_v53 = vpop.f32.mrf.mxu0  ;;  %6788 = vmatprep.mubr.msk.bf16.mxu1 %vm7729_vm0, %v10816_v1 }
 0x107   : > { %v6598_v62 = vpop.f32.mrf.mxu1 }
 0x108   : > { %v607_v40 = vpop.f32.mrf.mxu0  ;;  %v257_v62 = vld [vmem:[%s7811_s14 + $0xf8] sm:$0xff] }
 0x109   : > { %v807_v8 = vpop.f32.mrf.mxu1 }
 0x10a   : > { %v8456_v12 = vadd.f32 %v807_v8, %v607_v40  ;;  %v6523_v39 = vpop.f32.mrf.mxu0 }
 0x10b   : > { %v6599_v48 = vpop.f32.mrf.mxu1  ;;  %v8468_v39 = vpack.c.bf16 %v257_v62, %v256_v14 }
 0x10c   : > { %v612_v45 = vpop.f32.mrf.mxu0  ;;  %6713 = vmatmul.mubr.bf16.gmra.mxu0 %v8454_v55 }
 0x10d   : > { %v812_v56 = vpop.f32.mrf.mxu1  ;;  %6789 = vmatmul.mubr.bf16.gmra.mxu1 %v8206_v24  ;;  %6716 = vmatprep.mubr.msk.bf16.mxu0 %vm7729_vm0, %v10816_v1 }
 0x10e   : > { %v8462_v57 = vadd.f32 %v812_v56, %v612_v45  ;;  %v6526_v53 = vpop.f32.mrf.mxu0  ;;  %6792 = vmatprep.mubr.msk.bf16.mxu1 %vm7729_vm0, %v10816_v1 }
 0x10f   : > { %v6602_v40 = vpop.f32.mrf.mxu1 }
 0x110   : > { %v615_v8 = vpop.f32.mrf.mxu0 }
 0x111   : > { %v815_v48 = vpop.f32.mrf.mxu1 }
 0x112   : > { %v8470_v35 = vadd.f32 %v815_v48, %v615_v8  ;;  %v6527_v34 = vpop.f32.mrf.mxu0 }
 0x113   : > { %v6603_v31 = vpop.f32.mrf.mxu1 }
 0x114   : > { %v620_v47 = vpop.f32.mrf.mxu0  ;;  %6717 = vmatmul.mubr.bf16.gmra.mxu0 %v8446_v5  ;;  %v7615_v31 = vld [vmem:[%s10809_s1 + $0x1b8] sm:$0xff]  }
 0x115   : > { %v820_v45 = vpop.f32.mrf.mxu1  ;;  %6793 = vmatmul.mubr.bf16.gmra.mxu1 %v8468_v39  ;;  %6812 = vmatprep.mubr.msk.bf16.mxu0 %vm7729_vm0, %v10816_v1 }
 0x116   : > { %v8476_v56 = vadd.f32 %v820_v45, %v620_v47  ;;  %v6530_v53 = vpop.f32.mrf.mxu0  ;;  %6888 = vmatprep.mubr.msk.bf16.mxu1 %vm7729_vm0, %v10816_v1  ;;  %v7622_v47 = vld [vmem:[%s10809_s1 + $0x1f8] sm:$0xff]  }
 0x117   : > { %v6606_v14 = vpop.f32.mrf.mxu1 }
 0x118   : > { %v623_v62 = vpop.f32.mrf.mxu0  ;;  %v7616_v14 = vld [vmem:[%s10809_s1 + $0x1b0] sm:$0xff]  }
 0x119   : > { %v823_v40 = vpop.f32.mrf.mxu1 }
 0x11a   : > { %v8483_v34 = vadd.f32 %v823_v40, %v623_v62  ;;  %v6531_v8 = vpop.f32.mrf.mxu0  ;;  %v10880_v40 = vmov 0.0  }
 0x11b   : > { %v6607_v48 = vpop.f32.mrf.mxu1 }
 0x11c   : > { %v628_v45 = vpop.f32.mrf.mxu0  ;;  %6813 = vmatmul.mubr.bf16.vlgmr.msra.gmra.mxu0 %v7963_v23  ;;  %v7623_v23 = vld [vmem:[%s10809_s1 + $0x1f0] sm:$0xff]  }
 0x11d   : > { %v828_v53 = vpop.f32.mrf.mxu1  ;;  %6949 = vmatpush3.bf16.msra.mxu0 %v7615_v31  ;;  %6889 = vmatmul.mubr.bf16.vlgmr.msra.gmra.mxu1 %v8267_v17 }
 0x11e   : > { %v8493_v1 = vadd.f32 %v828_v53, %v628_v45  ;;  %v6534_v62 = vpop.f32.mrf.mxu0  ;;  %6816 = vmatprep.mubr.msk.bf16.mxu0 %vm7729_vm0, %v10880_v40  ;;  %6892 = vmatprep.mubr.msk.bf16.mxu1 %vm7729_vm0, %v10880_v40  ;;  %v7617_v53 = vld [vmem:[%s10809_s1 + $0x1a8] sm:$0xff]  }
 0x11f   : > { %v6610_v8 = vpop.f32.mrf.mxu1  ;;  %6950 = vmatprep.subr.bf16.mxu0 %v10880_v40  ;;  %7025 = vmatpush3.bf16.msra.mxu1 %v7622_v47  ;;  %v7624_v47 = vld [vmem:[%s10809_s1 + $0x1e8] sm:$0xff]  }
 0x120   : > { %v631_v17 = vpop.f32.mrf.mxu0  ;;  %7026 = vmatprep.subr.bf16.mxu1 %v10880_v40 }
 0x121   : > { %v831_v31 = vpop.f32.mrf.mxu1  ;;  %6951 = vmatpush3.bf16.msra.mxu0 %v7616_v14 }
 0x122   : > { %v8504_v48 = vadd.f32 %v831_v31, %v631_v17  ;;  %v6535_v45 = vpop.f32.mrf.mxu0  ;;  %6952 = vmatprep.subr.bf16.mxu0 %v10880_v40 }
 0x123   : > { %v6611_v62 = vpop.f32.mrf.mxu1  ;;  %7027 = vmatpush3.bf16.msra.mxu1 %v7623_v23  ;;  %v7618_v23 = vld [vmem:[%s10809_s1 + $0x1a0] sm:$0xff]  }
 0x124   : > { %v636_v8 = vpop.f32.mrf.mxu0  ;;  %6817 = vmatmul.mubr.bf16.gmra.mxu0 %v8044_v61  ;;  %7028 = vmatprep.subr.bf16.mxu1 %v10880_v40  ;;  %v7625_v62 = vld [vmem:[%s10809_s1 + $0x1e0] sm:$0xff]  }
 0x125   : > { %v836_v14 = vpop.f32.mrf.mxu1  ;;  %6893 = vmatmul.mubr.bf16.gmra.mxu1 %v8293_v54  ;;  %6820 = vmatprep.mubr.msk.bf16.mxu0 %vm7729_vm0, %v10880_v40 }
 0x126   : > { %v8518_v17 = vadd.f32 %v836_v14, %v636_v8  ;;  %v6538_v31 = vpop.f32.mrf.mxu0  ;;  %6896 = vmatprep.mubr.msk.bf16.mxu1 %vm7729_vm0, %v10880_v40  ;;  %6953 = vmatpush3.bf16.msra.mxu0 %v7617_v53  ;;  %v7619_v53 = vld [vmem:[%s10809_s1 + $0x198] sm:$0xff]  }
 0x127   : > { %v6614_v45 = vpop.f32.mrf.mxu1  ;;  %6954 = vmatprep.subr.bf16.mxu0 %v10880_v40  ;;  %7029 = vmatpush3.bf16.msra.mxu1 %v7624_v47  ;;  %v7627_v47 = vld [vmem:[%s10809_s1 + $0x1d8] sm:$0xff]  }
 0x128   : > { %v639_v54 = vpop.f32.mrf.mxu0  ;;  %7030 = vmatprep.subr.bf16.mxu1 %v10880_v40 }
 0x129   : > { %v839_v8 = vpop.f32.mrf.mxu1 }
 0x12a   : > { %v8530_v14 = vadd.f32 %v839_v8, %v639_v54  ;;  %v6539_v31 = vpop.f32.mrf.mxu0  ;;  %6955 = vmatpush3.bf16.msra.mxu0 %v7618_v23 }
 0x12b   : > { %v6615_v45 = vpop.f32.mrf.mxu1  ;;  %6956 = vmatprep.subr.bf16.mxu0 %v10880_v40  ;;  %7031 = vmatpush3.bf16.msra.mxu1 %v7625_v62  ;;  %v7620_v62 = vld [vmem:[%s10809_s1 + $0x190] sm:$0xff]  }
 0x12c   : > { %v644_v24 = vpop.f32.mrf.mxu0  ;;  %6821 = vmatmul.mubr.bf16.gmra.mxu0 %v8085_v36  ;;  %7032 = vmatprep.subr.bf16.mxu1 %v10880_v40  ;;  %v7628_v45 = vld [vmem:[%s10809_s1 + $0x1d0] sm:$0xff]  }
 0x12d   : > { %v844_v54 = vpop.f32.mrf.mxu1  ;;  %6897 = vmatmul.mubr.bf16.gmra.mxu1 %v8319_v15  ;;  %6824 = vmatprep.mubr.msk.bf16.mxu0 %vm7729_vm0, %v10880_v40 }
 0x12e   : > { %v8544_v23 = vadd.f32 %v844_v54, %v644_v24  ;;  %v6542_v8 = vpop.f32.mrf.mxu0  ;;  %6900 = vmatprep.mubr.msk.bf16.mxu1 %vm7729_vm0, %v10880_v40  ;;  %6957 = vmatpush3.bf16.msra.mxu0 %v7619_v53  ;;  %v7621_v53 = vld [vmem:[%s10809_s1 + $0x188] sm:$0xff]  }
 0x12f   : > { %v6618_v31 = vpop.f32.mrf.mxu1  ;;  %6958 = vmatprep.subr.bf16.mxu0 %v10880_v40  ;;  %7033 = vmatpush3.bf16.msra.mxu1 %v7627_v47  ;;  %v7629_v47 = vld [vmem:[%s10809_s1 + $0x1c8] sm:$0xff]  }
 0x130   : > { %v647_v15 = vpop.f32.mrf.mxu0  ;;  %7034 = vmatprep.subr.bf16.mxu1 %v10880_v40 }
 0x131   : > { %v847_v24 = vpop.f32.mrf.mxu1 }
 0x132   : > { %v8556_v54 = vadd.f32 %v847_v24, %v647_v15  ;;  %v6543_v8 = vpop.f32.mrf.mxu0  ;;  %6959 = vmatpush3.bf16.msra.mxu0 %v7620_v62 }
 0x133   : > { %v6619_v31 = vpop.f32.mrf.mxu1  ;;  %6960 = vmatprep.subr.bf16.mxu0 %v10880_v40  ;;  %7035 = vmatpush3.bf16.msra.mxu1 %v7628_v45  ;;  %v7626_v45 = vld [vmem:[%s10809_s1 + $0x180] sm:$0xff]  }
 0x134   : > { %v652_v6 = vpop.f32.mrf.mxu0  ;;  %6825 = vmatmul.mubr.bf16.gmra.mxu0 %v8107_v60  ;;  %7036 = vmatprep.subr.bf16.mxu1 %v10880_v40  ;;  %v7630_v31 = vld [vmem:[%s10809_s1 + $0x1c0] sm:$0xff]  }
 0x135   : > { %v852_v15 = vpop.f32.mrf.mxu1  ;;  %6901 = vmatmul.mubr.bf16.gmra.mxu1 %v8345_v38  ;;  %6828 = vmatprep.mubr.msk.bf16.mxu0 %vm7729_vm0, %v10880_v40 }
 0x136   : > { %v8570_v62 = vadd.f32 %v852_v15, %v652_v6  ;;  %v6546_v24 = vpop.f32.mrf.mxu0  ;;  %6904 = vmatprep.mubr.msk.bf16.mxu1 %vm7729_vm0, %v10880_v40  ;;  %6961 = vmatpush3.bf16.msra.mxu0 %v7621_v53 }
 0x137   : > { %v6622_v8 = vpop.f32.mrf.mxu1  ;;  %6962 = vmatprep.subr.bf16.mxu0 %v10880_v40  ;;  %7037 = vmatpush3.bf16.msra.mxu1 %v7629_v47 }
 0x138   : > { %v655_v38 = vpop.f32.mrf.mxu0  ;;  %7038 = vmatprep.subr.bf16.mxu1 %v10880_v40 }
 0x139   : > { %v855_v6 = vpop.f32.mrf.mxu1 }
 0x13a   : > { %v8582_v15 = vadd.f32 %v855_v6, %v655_v38  ;;  %v6547_v24 = vpop.f32.mrf.mxu0  ;;  %6963 = vmatpush3.bf16.msra.mxu0 %v7626_v45 }
 0x13b   : > { %v6623_v53 = vpop.f32.mrf.mxu1  ;;  %7039 = vmatpush3.bf16.msra.mxu1 %v7630_v31  ;;  %7100 = vmatprep.subr.bf16.mxu0 %v10880_v40 }
 0x13c   : > { %v660_v8 = vpop.f32.mrf.mxu0  ;;  %6829 = vmatmul.mubr.bf16.gmra.mxu0 %v8125_v18 }
 0x13d   : > { %v860_v47 = vpop.f32.mrf.mxu1  ;;  %6905 = vmatmul.mubr.bf16.gmra.mxu1 %v8357_v2  ;;  %6832 = vmatprep.mubr.msk.bf16.mxu0 %vm7729_vm0, %v10880_v40 }
 0x13e   : > { %v8589_v30 = vadd.f32 %v860_v47, %v660_v8  ;;  %v6550_v21 = vpop.f32.mrf.mxu0  ;;  %6908 = vmatprep.mubr.msk.bf16.mxu1 %vm7729_vm0, %v10880_v40 }
 0x13f   : > { %v6626_v38 = vpop.f32.mrf.mxu1 }
 0x140   : > { %v663_v45 = vpop.f32.mrf.mxu0 }
 0x141   : > { %v863_v31 = vpop.f32.mrf.mxu1 }
 0x142   : > { %v8593_v6 = vadd.f32 %v863_v31, %v663_v45  ;;  %v6551_v24 = vpop.f32.mrf.mxu0 }
 0x143   : > { %v6627_v53 = vpop.f32.mrf.mxu1 }
 0x144   : > { %v668_v20 = vpop.f32.mrf.mxu0  ;;  %6833 = vmatmul.mubr.bf16.gmra.mxu0 %v8139_v16 }
 0x145   : > { %v868_v2 = vpop.f32.mrf.mxu1  ;;  %6909 = vmatmul.mubr.bf16.gmra.mxu1 %v8367_v11  ;;  %6836 = vmatprep.mubr.msk.bf16.mxu0 %vm7729_vm0, %v10880_v40 }
 0x146   : > { %v8599_v21 = vadd.f32 %v868_v2, %v668_v20  ;;  %v6554_v8 = vpop.f32.mrf.mxu0  ;;  %6912 = vmatprep.mubr.msk.bf16.mxu1 %vm7729_vm0, %v10880_v40 }
 0x147   : > { %v6630_v47 = vpop.f32.mrf.mxu1 }
 0x148   : > { %v671_v38 = vpop.f32.mrf.mxu0 }
 0x149   : > { %v871_v45 = vpop.f32.mrf.mxu1 }
 0x14a   : > { %v8603_v31 = vadd.f32 %v871_v45, %v671_v38  ;;  %v6555_v24 = vpop.f32.mrf.mxu0 }
 0x14b   : > { %v6631_v53 = vpop.f32.mrf.mxu1 }
 0x14c   : > { %v676_v63 = vpop.f32.mrf.mxu0  ;;  %6837 = vmatmul.mubr.bf16.gmra.mxu0 %v8149_v7 }
 0x14d   : > { %v876_v11 = vpop.f32.mrf.mxu1  ;;  %6913 = vmatmul.mubr.bf16.gmra.mxu1 %v8377_v27  ;;  %6840 = vmatprep.mubr.msk.bf16.mxu0 %vm7729_vm0, %v10880_v40 }
 0x14e   : > { %v8609_v20 = vadd.f32 %v876_v11, %v676_v63  ;;  %v6558_v2 = vpop.f32.mrf.mxu0  ;;  %6916 = vmatprep.mubr.msk.bf16.mxu1 %vm7729_vm0, %v10880_v40 }
 0x14f   : > { %v6634_v8 = vpop.f32.mrf.mxu1 }
 0x150   : > { %v679_v47 = vpop.f32.mrf.mxu0 }
 0x151   : > { %v879_v38 = vpop.f32.mrf.mxu1 }
 0x152   : > { %v8613_v45 = vadd.f32 %v879_v38, %v679_v47  ;;  %v6559_v24 = vpop.f32.mrf.mxu0 }
 0x153   : > { %v6635_v53 = vpop.f32.mrf.mxu1 }
 0x154   : > { %10881 = vst [vmem:[#allocation41_spill] sm:$0xff] %v8613_v45  ;;  %v684_v4 = vpop.f32.mrf.mxu0  ;;  %6841 = vmatmul.mubr.bf16.gmra.mxu0 %v8162_v22 }
 0x155   : > { %v884_v27 = vpop.f32.mrf.mxu1  ;;  %6917 = vmatmul.mubr.bf16.gmra.mxu1 %v8387_v10  ;;  %6844 = vmatprep.mubr.msk.bf16.mxu0 %vm7729_vm0, %v10880_v40 }
 0x156   : > { %v8619_v63 = vadd.f32 %v884_v27, %v684_v4  ;;  %v6562_v11 = vpop.f32.mrf.mxu0  ;;  %6920 = vmatprep.mubr.msk.bf16.mxu1 %vm7729_vm0, %v10880_v40 }
 0x157   : > { %v6638_v2 = vpop.f32.mrf.mxu1 }
 0x158   : > { %v687_v8 = vpop.f32.mrf.mxu0 }
 0x159   : > { %v887_v47 = vpop.f32.mrf.mxu1 }
 0x15a   : > { %v8623_v38 = vadd.f32 %v887_v47, %v687_v8  ;;  %v6563_v24 = vpop.f32.mrf.mxu0 }
 0x15b   : > { %v6639_v53 = vpop.f32.mrf.mxu1 }
 0x15c   : > { %10882 = vst [vmem:[#allocation42_spill] sm:$0xff] %v8623_v38  ;;  %v692_v45 = vpop.f32.mrf.mxu0  ;;  %6845 = vmatmul.mubr.bf16.gmra.mxu0 %v8177_v43 }
 0x15d   : > { %v892_v10 = vpop.f32.mrf.mxu1  ;;  %6921 = vmatmul.mubr.bf16.gmra.mxu1 %v8397_v28  ;;  %6848 = vmatprep.mubr.msk.bf16.mxu0 %vm7729_vm0, %v10880_v40 }
 0x15e   : > { %v8629_v4 = vadd.f32 %v892_v10, %v692_v45  ;;  %v6566_v27 = vpop.f32.mrf.mxu0  ;;  %6924 = vmatprep.mubr.msk.bf16.mxu1 %vm7729_vm0, %v10880_v40 }
 0x15f   : > { %v6642_v11 = vpop.f32.mrf.mxu1 }
 0x160   : > { %v695_v2 = vpop.f32.mrf.mxu0 }
 0x161   : > { %v895_v8 = vpop.f32.mrf.mxu1 }
 0x162   : > { %v6567_v47 = vpop.f32.mrf.mxu0 }
 0x163   : > { %v6643_v24 = vpop.f32.mrf.mxu1 }
 0x164   : > { %v1057_v53 = vpop.f32.mrf.mxu0  ;;  %6849 = vmatmul.mubr.bf16.gmra.mxu0 %v8189_v0 }
 0x165   : > { %v1175_v38 = vadd.f32 %v1057_v53, %v8404_v13  ;;  %v1303_v28 = vpop.f32.mrf.mxu1  ;;  %6925 = vmatmul.mubr.bf16.gmra.mxu1 %v8409_v52  ;;  %6852 = vmatprep.mubr.msk.bf16.mxu0 %vm7729_vm0, %v10880_v40 }
 0x166   : > { %v6662_v10 = vpop.f32.mrf.mxu0  ;;  %6928 = vmatprep.mubr.msk.bf16.mxu1 %vm7729_vm0, %v10880_v40 }
 0x167   : > { %v8640_v45 = vadd.f32 %v1303_v28, %v1175_v38  ;;  %v6738_v27 = vpop.f32.mrf.mxu1 }
 0x168   : > { %v1060_v11 = vpop.f32.mrf.mxu0 }
 0x169   : > { %v1176_v2 = vadd.f32 %v1060_v11, %v8411_v42  ;;  %v1306_v8 = vpop.f32.mrf.mxu1 }
 0x16a   : > { %v6663_v47 = vpop.f32.mrf.mxu0 }
 0x16b   : > { %v8643_v24 = vadd.f32 %v1306_v8, %v1176_v2  ;;  %v6739_v13 = vpop.f32.mrf.mxu1 }
 0x16c   : > { %v1065_v53 = vpop.f32.mrf.mxu0  ;;  %6853 = vmatmul.mubr.bf16.gmra.mxu0 %v8204_v19 }
 0x16d   : > { %v1177_v52 = vadd.f32 %v1065_v53, %v8418_v59  ;;  %v1311_v10 = vpop.f32.mrf.mxu1  ;;  %6929 = vmatmul.mubr.bf16.gmra.mxu1 %v8423_v26  ;;  %6856 = vmatprep.mubr.msk.bf16.mxu0 %vm7729_vm0, %v10880_v40 }
 0x16e   : > { %v6666_v28 = vpop.f32.mrf.mxu0  ;;  %6932 = vmatprep.mubr.msk.bf16.mxu1 %vm7729_vm0, %v10880_v40 }
 0x16f   : > { %v8652_v42 = vadd.f32 %v1311_v10, %v1177_v52  ;;  %v6742_v38 = vpop.f32.mrf.mxu1 }
 0x170   : > { %v1068_v27 = vpop.f32.mrf.mxu0 }
 0x171   : > { %v1178_v11 = vadd.f32 %v1068_v27, %v8425_v49  ;;  %v1314_v2 = vpop.f32.mrf.mxu1 }
 0x172   : > { %v6667_v8 = vpop.f32.mrf.mxu0 }
 0x173   : > { %v8655_v47 = vadd.f32 %v1314_v2, %v1178_v11  ;;  %v6743_v59 = vpop.f32.mrf.mxu1  ;;  %v1468_v2 = vshll.u32 %v8468_v39, 16 }
 0x174   : > { %v1073_v13 = vpop.f32.mrf.mxu0  ;;  %6857 = vmatmul.mubr.bf16.gmra.mxu0 %v8217_v44 }
 0x175   : > { %v1179_v53 = vadd.f32 %v1073_v13, %v8432_v25  ;;  %v1319_v28 = vpop.f32.mrf.mxu1  ;;  %6933 = vmatmul.mubr.bf16.gmra.mxu1 %v8437_v33  ;;  %6860 = vmatprep.mubr.msk.bf16.mxu0 %vm7729_vm0, %v10880_v40 }
 0x176   : > { %v6670_v52 = vpop.f32.mrf.mxu0  ;;  %6936 = vmatprep.mubr.msk.bf16.mxu1 %vm7729_vm0, %v10880_v40 }
 0x177   : > { %v8664_v49 = vadd.f32 %v1319_v28, %v1179_v53  ;;  %v6746_v10 = vpop.f32.mrf.mxu1  ;;  %v1470_v53 = vrot.slane %v1468_v2, 1  ;;  %v8678_v28 = vrot.slane %v8468_v39, 1 }
 0x178   : > { %v1076_v38 = vpop.f32.mrf.mxu0 }
 0x179   : > { %v1180_v27 = vadd.f32 %v1076_v38, %v8439_v29  ;;  %v1322_v11 = vpop.f32.mrf.mxu1  ;;  %v8690_v2 = vsel %vm930_vm3, %v8446_v5, %v8678_v28 }
 0x17a   : > { %v6671_v25 = vpop.f32.mrf.mxu0  ;;  %10883 = vst [vmem:[#allocation43_spill] sm:$0xff] %v8690_v2 }
 0x17b   : > { %v8668_v8 = vadd.f32 %v1322_v11, %v1180_v27  ;;  %v6747_v59 = vpop.f32.mrf.mxu1  ;;  %v8685_v25 = vsel %vm363_vm2, %v8235_v58, %v1470_v53 }
 0x17c   : > { %v1081_v13 = vpop.f32.mrf.mxu0  ;;  %6861 = vmatmul.mubr.bf16.gmra.mxu0 %v8226_v50 }
 0x17d   : > { %v1181_v52 = vadd.f32 %v1081_v13, %v8448_v9  ;;  %v1327_v33 = vpop.f32.mrf.mxu1  ;;  %6937 = vmatmul.mubr.bf16.gmra.mxu1 %v8454_v55  ;;  %6864 = vmatprep.mubr.msk.bf16.mxu0 %vm7729_vm0, %v10880_v40 }
 0x17e   : > { %v6674_v29 = vpop.f32.mrf.mxu0  ;;  %6940 = vmatprep.mubr.msk.bf16.mxu1 %vm7729_vm0, %v10880_v40 }
 0x17f   : > { %v8680_v10 = vadd.f32 %v1327_v33, %v1181_v52  ;;  %v6750_v38 = vpop.f32.mrf.mxu1  ;;  %v1472_v52 = vshrl.u32 %v8468_v39, 16 }
 0x180   : > { %v1084_v27 = vpop.f32.mrf.mxu0 }
 0x181   : > { %v1182_v9 = vadd.f32 %v1084_v27, %v8456_v12  ;;  %v1330_v11 = vpop.f32.mrf.mxu1 }
 0x182   : > { %v6675_v59 = vpop.f32.mrf.mxu0 }
 0x183   : > { %v8692_v13 = vadd.f32 %v1330_v11, %v1182_v9  ;;  %v6751_v29 = vpop.f32.mrf.mxu1  ;;  %v8704_v11 = vor.u32 %v1472_v52, %v1470_v53 }
 0x184   : > { %v1089_v33 = vpop.f32.mrf.mxu0  ;;  %6865 = vmatmul.mubr.bf16.gmra.mxu0 %v8685_v25 }
 0x185   : > { %v1183_v12 = vadd.f32 %v1089_v33, %v8462_v57  ;;  %v1335_v38 = vpop.f32.mrf.mxu1  ;;  %6941 = vmatmul.mubr.bf16.gmra.mxu1 %v8690_v2  ;;  %6868 = vmatprep.mubr.msk.bf16.mxu0 %vm7729_vm0, %v10880_v40 }
 0x186   : > { %v6678_v58 = vpop.f32.mrf.mxu0  ;;  %6944 = vmatprep.mubr.msk.bf16.mxu1 %vm7729_vm0, %v10880_v40 }
 0x187   : > { %v8702_v5 = vadd.f32 %v1335_v38, %v1183_v12  ;;  %v6754_v27 = vpop.f32.mrf.mxu1 }
 0x188   : > { %v1092_v9 = vpop.f32.mrf.mxu0 }
 0x189   : > { %v1184_v59 = vadd.f32 %v1092_v9, %v8470_v35  ;;  %v1338_v29 = vpop.f32.mrf.mxu1 }
 0x18a   : > { %v6679_v57 = vpop.f32.mrf.mxu0 }
 0x18b   : > { %v8707_v33 = vadd.f32 %v1338_v29, %v1184_v59  ;;  %v6755_v2 = vpop.f32.mrf.mxu1 }
 0x18c   : > { %v1097_v55 = vpop.f32.mrf.mxu0  ;;  %6869 = vmatmul.mubr.bf16.gmra.mxu0 %v8704_v11 }
 0x18d   : > { %v1185_v58 = vadd.f32 %v1097_v55, %v8476_v56  ;;  %v1343_v26 = vpop.f32.mrf.mxu1  ;;  %6945 = vmatmul.mubr.bf16.gmra.mxu1 %v8678_v28  ;;  %6964 = vmatprep.mubr.msk.bf16.mxu0 %vm7729_vm0, %v10880_v40  ;;  %v7631_v55 = vld [vmem:[%s10809_s1 + $0x238] sm:$0xff]  }
 0x18e   : > { %v6682_v53 = vpop.f32.mrf.mxu0  ;;  %7040 = vmatprep.mubr.msk.bf16.mxu1 %vm7729_vm0, %v10880_v40 }
 0x18f   : > { %v8716_v35 = vadd.f32 %v1343_v26, %v1185_v58  ;;  %v6758_v52 = vpop.f32.mrf.mxu1 }
 0x190   : > { %v1100_v12 = vpop.f32.mrf.mxu0 }
 0x191   : > { %v1186_v2 = vadd.f32 %v1100_v12, %v8483_v34  ;;  %v1346_v38 = vpop.f32.mrf.mxu1  ;;  %v7632_v34 = vld [vmem:[%s10809_s1 + $0x230] sm:$0xff]   ;;  %v7633_v12 = vld [vmem:[%s10809_s1 + $0x228] sm:$0xff]  }
 0x192   : > { %v6683_v56 = vpop.f32.mrf.mxu0 }
 0x193   : > { %v8722_v27 = vadd.f32 %v1346_v38, %v1186_v2  ;;  %v6759_v9 = vpop.f32.mrf.mxu1 }
 0x194   : > { %v1105_v59 = vpop.f32.mrf.mxu0  ;;  %6965 = vmatmul.mubr.bf16.vlgmr.msra.gmra.mxu0 %v7864_v37 }
 0x195   : > { %v1187_v29 = vadd.f32 %v1105_v59, %v8493_v1  ;;  %7101 = vmatpush3.bf16.msra.mxu0 %v7631_v55  ;;  %v1351_v26 = vpop.f32.mrf.mxu1  ;;  %7041 = vmatmul.mubr.bf16.vlgmr.msra.gmra.mxu1 %v8044_v61  ;;  %v7634_v59 = vld [vmem:[%s10809_s1 + $0x220] sm:$0xff]  }
 0x196   : > { %v6686_v57 = vpop.f32.mrf.mxu0  ;;  %6968 = vmatprep.mubr.msk.bf16.mxu0 %vm7729_vm0, %v10880_v40  ;;  %7044 = vmatprep.mubr.msk.bf16.mxu1 %vm7729_vm0, %v10880_v40 }
 0x197   : > { %v8734_v58 = vadd.f32 %v1351_v26, %v1187_v29  ;;  %v6762_v37 = vpop.f32.mrf.mxu1  ;;  %7102 = vmatprep.subr.bf16.mxu0 %v10880_v40  ;;  %v277_v57 = vld [vmem:[%s10811_s3] sm:$0xff] }
 0x198   : > { %v1108_v1 = vpop.f32.mrf.mxu0 }
 0x199   : > { %v1188_v53 = vadd.f32 %v1108_v1, %v8504_v48  ;;  %v1354_v61 = vpop.f32.mrf.mxu1  ;;  %7103 = vmatpush3.bf16.msra.mxu0 %v7632_v34  ;;  %v7730_v34 = vmov 0   ;;  %v7635_v1 = vld [vmem:[%s10809_s1 + $0x218] sm:$0xff]  }
 0x19a   : > { %v6687_v52 = vpop.f32.mrf.mxu0  ;;  %7104 = vmatprep.subr.bf16.mxu0 %v10880_v40  ;;  %7565 = vset.pattern.permute.xlu0 %v7730_v34 }
 0x19b   : > { %v8742_v2 = vadd.f32 %v1354_v61, %v1188_v53  ;;  %v6763_v38 = vpop.f32.mrf.mxu1  ;;  %7566 = vset.pattern.permute.xlu1 %v7730_v34  ;;  %2712 = vperm.xlu0 %7565, %v277_v57  }
 0x19c   : > { %v1113_v55 = vpop.f32.mrf.mxu0  ;;  %6969 = vmatmul.mubr.bf16.gmra.mxu0 %v7917_v3  ;;  %v278_v38 = vld [vmem:[%s10811_s3 + $0x8] sm:$0xff] }
 0x19d   : > { %v1189_v56 = vadd.f32 %v1113_v55, %v8518_v17  ;;  %v1359_v9 = vpop.f32.mrf.mxu1  ;;  %7045 = vmatmul.mubr.bf16.gmra.mxu1 %v8085_v36  ;;  %6972 = vmatprep.mubr.msk.bf16.mxu0 %vm7729_vm0, %v10880_v40 }
 0x19e   : > { %v6690_v48 = vpop.f32.mrf.mxu0  ;;  %7048 = vmatprep.mubr.msk.bf16.mxu1 %vm7729_vm0, %v10880_v40  ;;  %7105 = vmatpush3.bf16.msra.mxu0 %v7633_v12 }
 0x19f   : > { %v8754_v29 = vadd.f32 %v1359_v9, %v1189_v56  ;;  %v6766_v3 = vpop.f32.mrf.mxu1  ;;  %7106 = vmatprep.subr.bf16.mxu0 %v10880_v40  ;;  %2717 = vperm.xlu0 %7565, %v278_v38  }
 0x1a0   : > { %v1116_v17 = vpop.f32.mrf.mxu0  ;;  %v281_v3 = vld [vmem:[%s10811_s3 + $0x20] sm:$0xff] }
 0x1a1   : > { %v1190_v36 = vadd.f32 %v1116_v17, %v8530_v14  ;;  %v1362_v26 = vpop.f32.mrf.mxu1 }
 0x1a2   : > { %v6691_v37 = vpop.f32.mrf.mxu0  ;;  %7107 = vmatpush3.bf16.msra.mxu0 %v7634_v59  ;;  %v279_v59 = vld [vmem:[%s10811_s3 + $0x10] sm:$0xff] }
 0x1a3   : > { %v8764_v53 = vadd.f32 %v1362_v26, %v1190_v36  ;;  %v6767_v61 = vpop.f32.mrf.mxu1  ;;  %7108 = vmatprep.subr.bf16.mxu0 %v10880_v40  ;;  %v7637_v36 = vld [vmem:[%s10809_s1 + $0x208] sm:$0xff]   ;;  %2722 = vperm.xlu1 %7566, %v279_v59  }
 0x1a4   : > { %v1121_v14 = vpop.f32.mrf.mxu0  ;;  %6973 = vmatmul.mubr.bf16.gmra.mxu0 %v7984_v32  ;;  %v7636_v32 = vld [vmem:[%s10809_s1 + $0x210] sm:$0xff]   ;;  %2732 = vperm.xlu0 %7565, %v281_v3   ;;  %v284_v3 = vld [vmem:[%s10811_s3 + $0x38] sm:$0xff] }
 0x1a5   : > { %v1191_v52 = vadd.f32 %v1121_v14, %v8544_v23  ;;  %v1367_v12 = vpop.f32.mrf.mxu1  ;;  %7049 = vmatmul.mubr.bf16.gmra.mxu1 %v8107_v60  ;;  %6976 = vmatprep.mubr.msk.bf16.mxu0 %vm7729_vm0, %v10880_v40  ;;  %v283_v61 = vld [vmem:[%s10811_s3 + $0x30] sm:$0xff] }
 0x1a6   : > { %v6694_v55 = vpop.f32.mrf.mxu0  ;;  %7052 = vmatprep.mubr.msk.bf16.mxu1 %vm7729_vm0, %v10880_v40  ;;  %7109 = vmatpush3.bf16.msra.mxu0 %v7635_v1  ;;  %v280_v1 = vld [vmem:[%s10811_s3 + $0x18] sm:$0xff] }
 0x1a7   : > { %v8780_v23 = vadd.f32 %v1367_v12, %v1191_v52  ;;  %v6770_v56 = vpop.f32.mrf.mxu1  ;;  %7110 = vmatprep.subr.bf16.mxu0 %v10880_v40  ;;  %2727 = vperm.xlu1 %7566, %v280_v1   ;;  %v282_v55 = vld [vmem:[%s10811_s3 + $0x28] sm:$0xff] }
 0x1a8   : > { %v1124_v60 = vpop.f32.mrf.mxu0  ;;  %2742 = vperm.xlu0 %7565, %v283_v61  }
 0x1a9   : > { %v1192_v9 = vadd.f32 %v1124_v60, %v8556_v54  ;;  %v1370_v48 = vpop.f32.mrf.mxu1 }
 0x1aa   : > { %v6695_v17 = vpop.f32.mrf.mxu0  ;;  %7111 = vmatpush3.bf16.msra.mxu0 %v7636_v32  ;;  %v285_v32 = vld [vmem:[%s10811_s3 + $0x40] sm:$0xff] }
 0x1ab   : > { %v8793_v26 = vadd.f32 %v1370_v48, %v1192_v9  ;;  %v6771_v34 = vpop.f32.mrf.mxu1  ;;  %7112 = vmatprep.subr.bf16.mxu0 %v10880_v40  ;;  %2737 = vperm.xlu1 %7566, %v282_v55   ;;  %v287_v17 = vld [vmem:[%s10811_s3 + $0x50] sm:$0xff] }
 0x1ac   : > { %v1129_v54 = vpop.f32.mrf.mxu0  ;;  %6977 = vmatmul.mubr.bf16.gmra.mxu0 %v7995_v41  ;;  %v7638_v41 = vld [vmem:[%s10809_s1 + $0x200] sm:$0xff]   ;;  %2752 = vperm.xlu0 %7565, %v285_v32  }
 0x1ad   : > { %v1193_v57 = vadd.f32 %v1129_v54, %v8570_v62  ;;  %v1375_v37 = vpop.f32.mrf.mxu1  ;;  %7053 = vmatmul.mubr.bf16.gmra.mxu1 %v8125_v18  ;;  %6980 = vmatprep.mubr.msk.bf16.mxu0 %vm7729_vm0, %v10880_v40 }
 0x1ae   : > { %v6698_v14 = vpop.f32.mrf.mxu0  ;;  %7056 = vmatprep.mubr.msk.bf16.mxu1 %vm7729_vm0, %v10880_v40  ;;  %7113 = vmatpush3.bf16.msra.mxu0 %v7637_v36 }
 0x1af   : > { %v8812_v18 = vadd.f32 %v1375_v37, %v1193_v57  ;;  %v6774_v62 = vpop.f32.mrf.mxu1  ;;  %7114 = vmatprep.subr.bf16.mxu0 %v10880_v40  ;;  %2747 = vperm.xlu1 %7566, %v284_v3   ;;  %v286_v57 = vld [vmem:[%s10811_s3 + $0x48] sm:$0xff]  ;;  %v289_v37 = vld [vmem:[%s10811_s3 + $0x60] sm:$0xff] }
 0x1b0   : > { %v1132_v52 = vpop.f32.mrf.mxu0  ;;  %2762 = vperm.xlu0 %7565, %v287_v17   ;;  %v10884_v17 = vld [vmem:[#allocation22_spill] sm:$0xff] }
 0x1b1   : > { %v1194_v12 = vadd.f32 %v1132_v52, %v8582_v15  ;;  %v1378_v38 = vpop.f32.mrf.mxu1  ;;  %v288_v52 = vld [vmem:[%s10811_s3 + $0x58] sm:$0xff] }
 0x1b2   : > { %v6699_v56 = vpop.f32.mrf.mxu0  ;;  %7115 = vmatpush3.bf16.msra.mxu0 %v7638_v41 }
 0x1b3   : > { %v8822_v60 = vadd.f32 %v1378_v38, %v1194_v12  ;;  %v6775_v9 = vpop.f32.mrf.mxu1  ;;  %2757 = vperm.xlu1 %7566, %v286_v57   ;;  %v291_v12 = vld [vmem:[%s10811_s3 + $0x70] sm:$0xff]  ;;  %v290_v56 = vld [vmem:[%s10811_s3 + $0x68] sm:$0xff]  ;;  %v10885_v57 = vld [vmem:[#allocation41_spill] sm:$0xff] }
 0x1b4   : > { %v1137_v48 = vpop.f32.mrf.mxu0  ;;  %6981 = vmatmul.mubr.bf16.gmra.mxu0 %v8011_v46  ;;  %2772 = vperm.xlu0 %7565, %v289_v37   ;;  %v293_v9 = vld [vmem:[%s10811_s3 + $0x80] sm:$0xff] }
 0x1b5   : > { %v1195_v15 = vadd.f32 %v1137_v48, %v8589_v30  ;;  %v1383_v59 = vpop.f32.mrf.mxu1  ;;  %7057 = vmatmul.mubr.bf16.gmra.mxu1 %v8139_v16  ;;  %6984 = vmatprep.mubr.msk.bf16.mxu0 %vm7729_vm0, %v10880_v40 }
 0x1b6   : > { %v6702_v36 = vpop.f32.mrf.mxu0  ;;  %7060 = vmatprep.mubr.msk.bf16.mxu1 %vm7729_vm0, %v10880_v40 }
 0x1b7   : > { %v8837_v46 = vadd.f32 %v1383_v59, %v1195_v15  ;;  %v6778_v30 = vpop.f32.mrf.mxu1  ;;  %2767 = vperm.xlu1 %7566, %v288_v52  }
 0x1b8   : > { %v1140_v16 = vpop.f32.mrf.mxu0  ;;  %2782 = vperm.xlu0 %7565, %v291_v12   ;;  %v292_v30 = vld [vmem:[%s10811_s3 + $0x78] sm:$0xff] }
 0x1b9   : > { %v1196_v34 = vadd.f32 %v1140_v16, %v8593_v6  ;;  %v1386_v54 = vpop.f32.mrf.mxu1  ;;  %v295_v16 = vld [vmem:[%s10811_s3 + $0x90] sm:$0xff] }
 0x1ba   : > { %v6703_v1 = vpop.f32.mrf.mxu0 }
 0x1bb   : > { %v8846_v61 = vadd.f32 %v1386_v54, %v1196_v34  ;;  %v6779_v14 = vpop.f32.mrf.mxu1  ;;  %2777 = vperm.xlu1 %7566, %v290_v56  }
 0x1bc   : > { %v1145_v41 = vpop.f32.mrf.mxu0  ;;  %6985 = vmatmul.mubr.bf16.gmra.mxu0 %v8022_v51  ;;  %2792 = vperm.xlu0 %7565, %v293_v9   ;;  %v294_v14 = vld [vmem:[%s10811_s3 + $0x88] sm:$0xff] }
 0x1bd   : > { %v1197_v6 = vadd.f32 %v1145_v41, %v8599_v21  ;;  %v1391_v62 = vpop.f32.mrf.mxu1  ;;  %7061 = vmatmul.mubr.bf16.gmra.mxu1 %v8149_v7  ;;  %6988 = vmatprep.mubr.msk.bf16.mxu0 %vm7729_vm0, %v10880_v40  ;;  %v297_v41 = vld [vmem:[%s10811_s3 + $0xa0] sm:$0xff] }
 0x1be   : > { %v6706_v38 = vpop.f32.mrf.mxu0  ;;  %7064 = vmatprep.mubr.msk.bf16.mxu1 %vm7729_vm0, %v10880_v40 }
 0x1bf   : > { %v8861_v51 = vadd.f32 %v1391_v62, %v1197_v6  ;;  %v6782_v21 = vpop.f32.mrf.mxu1  ;;  %2787 = vperm.xlu1 %7566, %v292_v30   ;;  %v10886_v38 = vld [vmem:[#allocation23_spill] sm:$0xff] }
 0x1c0   : > { %v1148_v7 = vpop.f32.mrf.mxu0  ;;  %2802 = vperm.xlu0 %7565, %v295_v16  }
 0x1c1   : > { %v1198_v55 = vadd.f32 %v1148_v7, %v8603_v31  ;;  %v1394_v32 = vpop.f32.mrf.mxu1 }
 0x1c2   : > { %v6707_v48 = vpop.f32.mrf.mxu0 }
 0x1c3   : > { %v8870_v15 = vadd.f32 %v1394_v32, %v1198_v55  ;;  %v6783_v59 = vpop.f32.mrf.mxu1  ;;  %2797 = vperm.xlu1 %7566, %v294_v14   ;;  %v296_v55 = vld [vmem:[%s10811_s3 + $0x98] sm:$0xff]  ;;  %v299_v32 = vld [vmem:[%s10811_s3 + $0xb0] sm:$0xff]  ;;  %v298_v48 = vld [vmem:[%s10811_s3 + $0xa8] sm:$0xff] }
 0x1c4   : > { %v1153_v3 = vpop.f32.mrf.mxu0  ;;  %6989 = vmatmul.mubr.bf16.gmra.mxu0 %v10884_v17  ;;  %2812 = vperm.xlu0 %7565, %v297_v41   ;;  %v10887_v59 = vld [vmem:[#allocation42_spill] sm:$0xff] }
 0x1c5   : > { %v1199_v31 = vadd.f32 %v1153_v3, %v8609_v20  ;;  %v1399_v36 = vpop.f32.mrf.mxu1  ;;  %7065 = vmatmul.mubr.bf16.gmra.mxu1 %v8162_v22  ;;  %6992 = vmatprep.mubr.msk.bf16.mxu0 %vm7729_vm0, %v10880_v40 }
 0x1c6   : > { %v6710_v34 = vpop.f32.mrf.mxu0  ;;  %7068 = vmatprep.mubr.msk.bf16.mxu1 %vm7729_vm0, %v10880_v40 }
 0x1c7   : > { %v8885_v54 = vadd.f32 %v1399_v36, %v1199_v31  ;;  %v6786_v20 = vpop.f32.mrf.mxu1  ;;  %2807 = vperm.xlu1 %7566, %v296_v55   ;;  %v301_v31 = vld [vmem:[%s10811_s3 + $0xc0] sm:$0xff]  ;;  %v10889_v55 = vld [vmem:[#allocation25_spill] sm:$0xff] }
 0x1c8   : > { %v1156_v22 = vpop.f32.mrf.mxu0  ;;  %2822 = vperm.xlu0 %7565, %v299_v32   ;;  %v10888_v20 = vld [vmem:[#allocation24_spill] sm:$0xff] }
 0x1c9   : > { %v1200_v37 = vadd.f32 %v1156_v22, %v10885_v57  ;;  %v1402_v1 = vpop.f32.mrf.mxu1 }
 0x1ca   : > { %v6711_v6 = vpop.f32.mrf.mxu0 }
 0x1cb   : > { %v8894_v62 = vadd.f32 %v1402_v1, %v1200_v37  ;;  %v6787_v52 = vpop.f32.mrf.mxu1  ;;  %2817 = vperm.xlu1 %7566, %v298_v48   ;;  %v300_v37 = vld [vmem:[%s10811_s3 + $0xb8] sm:$0xff]  ;;  %v303_v1 = vld [vmem:[%s10811_s3 + $0xd0] sm:$0xff] }
 0x1cc   : > { %v1161_v12 = vpop.f32.mrf.mxu0  ;;  %6993 = vmatmul.mubr.bf16.gmra.mxu0 %v10886_v38  ;;  %2832 = vperm.xlu0 %7565, %v301_v31   ;;  %v302_v52 = vld [vmem:[%s10811_s3 + $0xc8] sm:$0xff]  ;;  %v306_v31 = vld [vmem:[%s10812_s4] sm:$0xff] }
 0x1cd   : > { %v1201_v21 = vadd.f32 %v1161_v12, %v8619_v63  ;;  %v1407_v7 = vpop.f32.mrf.mxu1  ;;  %7069 = vmatmul.mubr.bf16.gmra.mxu1 %v8177_v43  ;;  %6996 = vmatprep.mubr.msk.bf16.mxu0 %vm7729_vm0, %v10880_v40  ;;  %v305_v12 = vld [vmem:[%s10811_s3 + $0xe0] sm:$0xff] }
 0x1ce   : > { %v6714_v56 = vpop.f32.mrf.mxu0  ;;  %7072 = vmatprep.mubr.msk.bf16.mxu1 %vm7729_vm0, %v10880_v40 }
 0x1cf   : > { %v8909_v9 = vadd.f32 %v1407_v7, %v1201_v21  ;;  %v6790_v63 = vpop.f32.mrf.mxu1  ;;  %2827 = vperm.xlu1 %7566, %v300_v37  }
 0x1d0   : > { %v1164_v43 = vpop.f32.mrf.mxu0  ;;  %2842 = vperm.xlu0 %7565, %v303_v1   ;;  %v304_v63 = vld [vmem:[%s10811_s3 + $0xd8] sm:$0xff]  ;;  %v308_v1 = vld [vmem:[%s10812_s4 + $0x10] sm:$0xff] }
 0x1d1   : > { %v1202_v3 = vadd.f32 %v1164_v43, %v10887_v59  ;;  %v1410_v17 = vpop.f32.mrf.mxu1  ;;  %v307_v43 = vld [vmem:[%s10812_s4 + $0x8] sm:$0xff] }
 0x1d2   : > { %v6715_v36 = vpop.f32.mrf.mxu0 }
 0x1d3   : > { %v8918_v30 = vadd.f32 %v1410_v17, %v1202_v3  ;;  %v6791_v16 = vpop.f32.mrf.mxu1  ;;  %2837 = vperm.xlu1 %7566, %v302_v52   ;;  %v309_v36 = vld [vmem:[%s10812_s4 + $0x18] sm:$0xff] }
 0x1d4   : > { %v1169_v34 = vpop.f32.mrf.mxu0  ;;  %6997 = vmatmul.mubr.bf16.gmra.mxu0 %v10888_v20  ;;  %2852 = vperm.xlu0 %7565, %v305_v12   ;;  %v310_v12 = vld [vmem:[%s10812_s4 + $0x20] sm:$0xff] }
 0x1d5   : > { %v1203_v22 = vadd.f32 %v1169_v34, %v8629_v4  ;;  %v1415_v57 = vpop.f32.mrf.mxu1  ;;  %7073 = vmatmul.mubr.bf16.gmra.mxu1 %v8189_v0  ;;  %7000 = vmatprep.mubr.msk.bf16.mxu0 %vm7729_vm0, %v10880_v40 }
 0x1d6   : > { %v6718_v14 = vpop.f32.mrf.mxu0  ;;  %7076 = vmatprep.mubr.msk.bf16.mxu1 %vm7729_vm0, %v10880_v40 }
 0x1d7   : > { %v8933_v41 = vadd.f32 %v1415_v57, %v1203_v22  ;;  %v6794_v4 = vpop.f32.mrf.mxu1  ;;  %2847 = vperm.xlu1 %7566, %v304_v63   ;;  %v10890_v57 = vld [vmem:[#allocation26_spill] sm:$0xff]  ;;  %v311_v14 = vld [vmem:[%s10812_s4 + $0x28] sm:$0xff] }
 0x1d8   : > { %v1172_v0 = vpop.f32.mrf.mxu0  ;;  %5197 = vperm.xlu0 %7565, %v307_v43   ;;  %v10891_v43 = vld [vmem:[#allocation27_spill] sm:$0xff] }
 0x1d9   : > { %v1418_v6 = vpop.f32.mrf.mxu1 }
 0x1da   : > { %v6719_v38 = vpop.f32.mrf.mxu0 }
 0x1db   : > { %v6795_v21 = vpop.f32.mrf.mxu1  ;;  %5192 = vperm.xlu1 %7566, %v306_v31   ;;  %v313_v38 = vld [vmem:[%s10812_s4 + $0x38] sm:$0xff] }
 0x1dc   : > { %v1559_v7 = vpop.f32.mrf.mxu0  ;;  %7001 = vmatmul.mubr.bf16.gmra.mxu0 %v10889_v55  ;;  %5207 = vperm.xlu0 %7565, %v309_v36  }
 0x1dd   : > { %v1677_v32 = vadd.f32 %v1559_v7, %v8640_v45  ;;  %v1810_v56 = vpop.f32.mrf.mxu1  ;;  %7077 = vmatmul.mubr.bf16.gmra.mxu1 %v8204_v19  ;;  %7004 = vmatprep.mubr.msk.bf16.mxu0 %vm7729_vm0, %v10880_v40 }
 0x1de   : > { %v6814_v48 = vpop.f32.mrf.mxu0  ;;  %7080 = vmatprep.mubr.msk.bf16.mxu1 %vm7729_vm0, %v10880_v40 }
 0x1df   : > { %v8954_v59 = vadd.f32 %v1810_v56, %v1677_v32  ;;  %v6890_v45 = vpop.f32.mrf.mxu1  ;;  %5202 = vperm.xlu1 %7566, %v308_v1   ;;  %v258_v32 = vld [vmem:[%s7811_s14 + $0x100] sm:$0xff]  ;;  %v259_v56 = vld [vmem:[%s7811_s14 + $0x108] sm:$0x3] }
 0x1e0   : > { %v1562_v19 = vpop.f32.mrf.mxu0  ;;  %5217 = vperm.xlu0 %7565, %v311_v14   ;;  %v312_v45 = vld [vmem:[%s10812_s4 + $0x30] sm:$0xff] }
 0x1e1   : > { %v1678_v3 = vadd.f32 %v1562_v19, %v8643_v24  ;;  %v1813_v17 = vpop.f32.mrf.mxu1  ;;  %v315_v19 = vld [vmem:[%s10812_s4 + $0x48] sm:$0xff] }
 0x1e2   : > { %v6815_v16 = vpop.f32.mrf.mxu0 }
 0x1e3   : > { %v8963_v34 = vadd.f32 %v1813_v17, %v1678_v3  ;;  %v6891_v20 = vpop.f32.mrf.mxu1  ;;  %5212 = vperm.xlu1 %7566, %v310_v12   ;;  %v9004_v17 = vpack.c.bf16 %v259_v56, %v258_v32  ;;  %v318_v32 = vld [vmem:[%s10812_s4 + $0x60] sm:$0xff]  ;;  %v321_v56 = vld [vmem:[%s10812_s4 + $0x78] sm:$0xff] }
 0x1e4   : > { %v1567_v22 = vpop.f32.mrf.mxu0  ;;  %7005 = vmatmul.mubr.bf16.gmra.mxu0 %v10890_v57  ;;  %5227 = vperm.xlu0 %7565, %v313_v38   ;;  %v314_v20 = vld [vmem:[%s10812_s4 + $0x40] sm:$0xff] }
 0x1e5   : > { %v1679_v24 = vadd.f32 %v1567_v22, %v8652_v42  ;;  %v1818_v37 = vpop.f32.mrf.mxu1  ;;  %7081 = vmatmul.mubr.bf16.gmra.mxu1 %v8217_v44  ;;  %7008 = vmatprep.mubr.msk.bf16.mxu0 %vm7729_vm0, %v10880_v40  ;;  %v317_v22 = vld [vmem:[%s10812_s4 + $0x58] sm:$0xff] }
 0x1e6   : > { %v6818_v4 = vpop.f32.mrf.mxu0  ;;  %7084 = vmatprep.mubr.msk.bf16.mxu1 %vm7729_vm0, %v10880_v40 }
 0x1e7   : > { %v8978_v42 = vadd.f32 %v1818_v37, %v1679_v24  ;;  %v6894_v44 = vpop.f32.mrf.mxu1  ;;  %5222 = vperm.xlu1 %7566, %v312_v45   ;;  %v2221_v24 = vshll.u32 %v9004_v17, 16  ;;  %v10892_v4 = vld [vmem:[#allocation28_spill] sm:$0xff] }
 0x1e8   : > { %v1570_v0 = vpop.f32.mrf.mxu0  ;;  %5237 = vperm.xlu0 %7565, %v315_v19  }
 0x1e9   : > { %v1680_v6 = vadd.f32 %v1570_v0, %v8655_v47  ;;  %v1821_v52 = vpop.f32.mrf.mxu1  ;;  %v316_v0 = vld [vmem:[%s10812_s4 + $0x50] sm:$0xff]  ;;  %v2223_v12 = vrot.slane %v2221_v24, 1  ;;  %v325_v24 = vld [vmem:[%s10812_s4 + $0x98] sm:$0xff] }
 0x1ea   : > { %v6819_v21 = vpop.f32.mrf.mxu0 }
 0x1eb   : > { %v8987_v7 = vadd.f32 %v1821_v52, %v1680_v6  ;;  %v6895_v55 = vpop.f32.mrf.mxu1  ;;  %5232 = vperm.xlu1 %7566, %v314_v20   ;;  %v319_v6 = vld [vmem:[%s10812_s4 + $0x68] sm:$0xff] }
 0x1ec   : > { %v1575_v63 = vpop.f32.mrf.mxu0  ;;  %7009 = vmatmul.mubr.bf16.gmra.mxu0 %v10891_v43  ;;  %5247 = vperm.xlu0 %7565, %v317_v22   ;;  %v2224_v43 = vsel %vm363_vm2, %v8704_v11, %v2223_v12  ;;  %v320_v11 = vld [vmem:[%s10812_s4 + $0x70] sm:$0xff] }
 0x1ed   : > { %v1681_v47 = vadd.f32 %v1575_v63, %v8664_v49  ;;  %v1826_v48 = vpop.f32.mrf.mxu1  ;;  %7085 = vmatmul.mubr.bf16.gmra.mxu1 %v8226_v50  ;;  %7012 = vmatprep.mubr.msk.bf16.mxu0 %vm7729_vm0, %v10880_v40 }
 0x1ee   : > { %v6822_v3 = vpop.f32.mrf.mxu0  ;;  %7088 = vmatprep.mubr.msk.bf16.mxu1 %vm7729_vm0, %v10880_v40 }
 0x1ef   : > { %v9006_v49 = vadd.f32 %v1826_v48, %v1681_v47  ;;  %v6898_v50 = vpop.f32.mrf.mxu1  ;;  %5242 = vperm.xlu1 %7566, %v316_v0   ;;  %v2225_v3 = vshrl.u32 %v9004_v17, 16  ;;  %v324_v0 = vld [vmem:[%s10812_s4 + $0x90] sm:$0xff] }
 0x1f0   : > { %v1578_v31 = vpop.f32.mrf.mxu0  ;;  %5257 = vperm.xlu0 %7565, %v319_v6   ;;  %v323_v50 = vld [vmem:[%s10812_s4 + $0x88] sm:$0xff] }
 0x1f1   : > { %v1682_v36 = vadd.f32 %v1578_v31, %v8668_v8  ;;  %v1829_v16 = vpop.f32.mrf.mxu1  ;;  %v2227_v22 = vor.u32 %v2225_v3, %v2223_v12  ;;  %v327_v6 = vld [vmem:[%s10812_s4 + $0xa8] sm:$0xff] }
 0x1f2   : > { %v6823_v57 = vpop.f32.mrf.mxu0 }
 0x1f3   : > { %v9016_v37 = vadd.f32 %v1829_v16, %v1682_v36  ;;  %v6899_v1 = vpop.f32.mrf.mxu1  ;;  %5252 = vperm.xlu1 %7566, %v318_v32   ;;  %v322_v57 = vld [vmem:[%s10812_s4 + $0x80] sm:$0xff]  ;;  %v329_v32 = vld [vmem:[%s10812_s4 + $0xb8] sm:$0xff] }
 0x1f4   : > { %v1583_v14 = vpop.f32.mrf.mxu0  ;;  %7013 = vmatmul.mubr.bf16.gmra.mxu0 %v10892_v4  ;;  %5267 = vperm.xlu0 %7565, %v321_v56  }
 0x1f5   : > { %v1683_v8 = vadd.f32 %v1583_v14, %v8680_v10  ;;  %v1834_v44 = vpop.f32.mrf.mxu1  ;;  %7089 = vmatmul.mubr.bf16.gmra.mxu1 %v8685_v25  ;;  %7016 = vmatprep.mubr.msk.bf16.mxu0 %vm7729_vm0, %v10880_v40 }
 0x1f6   : > { %v6826_v52 = vpop.f32.mrf.mxu0  ;;  %7092 = vmatprep.mubr.msk.bf16.mxu1 %vm7729_vm0, %v10880_v40 }
 0x1f7   : > { %v9031_v10 = vadd.f32 %v1834_v44, %v1683_v8  ;;  %v6902_v38 = vpop.f32.mrf.mxu1  ;;  %5262 = vperm.xlu1 %7566, %v320_v11  }
 0x1f8   : > { %v1586_v25 = vpop.f32.mrf.mxu0  ;;  %5277 = vperm.xlu0 %7565, %v323_v50  }
 0x1f9   : > { %v1684_v21 = vadd.f32 %v1586_v25, %v8692_v13  ;;  %v1837_v55 = vpop.f32.mrf.mxu1 }
 0x1fa   : > { %v6827_v63 = vpop.f32.mrf.mxu0 }
 0x1fb   : > { %v9042_v47 = vadd.f32 %v1837_v55, %v1684_v21  ;;  %v6903_v48 = vpop.f32.mrf.mxu1  ;;  %5272 = vperm.xlu1 %7566, %v322_v57   ;;  %v326_v55 = vld [vmem:[%s10812_s4 + $0xa0] sm:$0xff] }
 0x1fc   : > { %v1591_v45 = vpop.f32.mrf.mxu0  ;;  %7017 = vmatmul.mubr.bf16.gmra.mxu0 %v8468_v39  ;;  %5287 = vperm.xlu0 %7565, %v325_v24   ;;  %v10894_v57 = vld [vmem:[#allocation30_spill] sm:$0xff] }
 0x1fd   : > { %v1685_v13 = vadd.f32 %v1591_v45, %v8702_v5  ;;  %v1842_v19 = vpop.f32.mrf.mxu1  ;;  %7093 = vmatmul.mubr.bf16.gmra.mxu1 %v2224_v43  ;;  %7020 = vmatprep.mubr.msk.bf16.mxu0 %vm7729_vm0, %v10880_v40  ;;  %v10893_v45 = vld [vmem:[#allocation29_spill] sm:$0xff] }
 0x1fe   : > { %v6830_v31 = vpop.f32.mrf.mxu0  ;;  %7096 = vmatprep.mubr.msk.bf16.mxu1 %vm7729_vm0, %v10880_v40 }
 0x1ff   : > { %v9057_v39 = vadd.f32 %v1842_v19, %v1685_v13  ;;  %v6906_v5 = vpop.f32.mrf.mxu1  ;;  %5282 = vperm.xlu1 %7566, %v324_v0   ;;  %v328_v19 = vld [vmem:[%s10812_s4 + $0xb0] sm:$0xff] }
 0x200   : > { %v1594_v36 = vpop.f32.mrf.mxu0  ;;  %5297 = vperm.xlu0 %7565, %v327_v6  }
 0x201   : > { %v1686_v16 = vadd.f32 %v1594_v36, %v8707_v33  ;;  %v1845_v20 = vpop.f32.mrf.mxu1 }
 0x202   : > { %v6831_v1 = vpop.f32.mrf.mxu0 }
 0x203   : > { %v9066_v14 = vadd.f32 %v1845_v20, %v1686_v16  ;;  %v6907_v4 = vpop.f32.mrf.mxu1  ;;  %5292 = vperm.xlu1 %7566, %v326_v55  }
 0x204   : > { %v1599_v8 = vpop.f32.mrf.mxu0  ;;  %7021 = vmatmul.mubr.bf16.gmra.mxu0 %v9004_v17  ;;  %5307 = vperm.xlu0 %7565, %v329_v32  }
 0x205   : > { %v1687_v33 = vadd.f32 %v1599_v8, %v8716_v35  ;;  %v1850_v44 = vpop.f32.mrf.mxu1  ;;  %7097 = vmatmul.mubr.bf16.gmra.mxu1 %v2227_v22  ;;  %7116 = vmatprep.mubr.msk.bf16.mxu0 %vm7729_vm0, %v10880_v40 }
 0x206   : > { %v6834_v52 = vpop.f32.mrf.mxu0 }
 0x207   : > { %v9078_v12 = vadd.f32 %v1850_v44, %v1687_v33  ;;  %v6910_v38 = vpop.f32.mrf.mxu1  ;;  %5302 = vperm.xlu1 %7566, %v328_v19  }
 0x208   : > { %v1602_v25 = vpop.f32.mrf.mxu0 }
 0x209   : > { %v1688_v35 = vadd.f32 %v1602_v25, %v8722_v27  ;;  %v1853_v21 = vpop.f32.mrf.mxu1 }
 0x20a   : > { %v6835_v56 = vpop.f32.mrf.mxu0 }
 0x20b   : > { %v9087_v63 = vadd.f32 %v1853_v21, %v1688_v35  ;;  %v6911_v43 = vpop.f32.mrf.mxu1  ;;  %v10895_v35 = vld [vmem:[#allocation31_spill] sm:$0xff] }
 0x20c   : > { %v1607_v48 = vpop.f32.mrf.mxu0  ;;  %7117 = vmatmul.mubr.bf16.vlgmr.msra.gmra.mxu0 %v10893_v45 }
 0x20d   : > { %v1689_v27 = vadd.f32 %v1607_v48, %v8734_v58  ;;  %v1858_v13 = vpop.f32.mrf.mxu1  ;;  %7120 = vmatprep.mubr.msk.bf16.mxu0 %vm7729_vm0, %v10880_v40 }
 0x20e   : > { %v6838_v3 = vpop.f32.mrf.mxu0 }
 0x20f   : > { %v9096_v11 = vadd.f32 %v1858_v13, %v1689_v27  ;;  %v6914_v50 = vpop.f32.mrf.mxu1  ;;  %v10896_v3 = vld [vmem:[#allocation32_spill] sm:$0xff] }
 0x210   : > { %v1610_v31 = vpop.f32.mrf.mxu0 }
 0x211   : > { %v1690_v5 = vadd.f32 %v1610_v31, %v8742_v2  ;;  %v1861_v36 = vpop.f32.mrf.mxu1 }
 0x212   : > { %v6839_v16 = vpop.f32.mrf.mxu0 }
 0x213   : > { %v9099_v20 = vadd.f32 %v1861_v36, %v1690_v5  ;;  %v6915_v58 = vpop.f32.mrf.mxu1 }
 0x214   : > { %v1615_v22 = vpop.f32.mrf.mxu0  ;;  %7121 = vmatmul.mubr.bf16.gmra.mxu0 %v10894_v57 }
 0x215   : > { %v1691_v24 = vadd.f32 %v1615_v22, %v8754_v29  ;;  %v1866_v1 = vpop.f32.mrf.mxu1  ;;  %7124 = vmatprep.mubr.msk.bf16.mxu0 %vm7729_vm0, %v10880_v40 }
 0x216   : > { %v6842_v4 = vpop.f32.mrf.mxu0 }
 0x217   : > { %v9105_v8 = vadd.f32 %v1866_v1, %v1691_v24  ;;  %v6918_v33 = vpop.f32.mrf.mxu1  ;;  %v10897_v4 = vld [vmem:[#allocation33_spill] sm:$0xff] }
 0x218   : > { %v1618_v44 = vpop.f32.mrf.mxu0 }
 0x219   : > { %v1692_v2 = vadd.f32 %v1618_v44, %v8764_v53  ;;  %v1869_v0 = vpop.f32.mrf.mxu1 }
 0x21a   : > { %v6843_v6 = vpop.f32.mrf.mxu0 }
 0x21b   : > { %v9108_v52 = vadd.f32 %v1869_v0, %v1692_v2  ;;  %v6919_v38 = vpop.f32.mrf.mxu1 }
 0x21c   : > { %v1623_v25 = vpop.f32.mrf.mxu0  ;;  %7125 = vmatmul.mubr.bf16.gmra.mxu0 %v10895_v35 }
 0x21d   : > { %v1693_v29 = vadd.f32 %v1623_v25, %v8780_v23  ;;  %v1874_v21 = vpop.f32.mrf.mxu1  ;;  %7128 = vmatprep.mubr.msk.bf16.mxu0 %vm7729_vm0, %v10880_v40 }
 0x21e   : > { %v6846_v55 = vpop.f32.mrf.mxu0 }
 0x21f   : > { %v9114_v32 = vadd.f32 %v1874_v21, %v1693_v29  ;;  %v6922_v56 = vpop.f32.mrf.mxu1  ;;  %v10898_v55 = vld [vmem:[#allocation34_spill] sm:$0xff] }
 0x220   : > { %v1626_v43 = vpop.f32.mrf.mxu0 }
 0x221   : > { %v1694_v53 = vadd.f32 %v1626_v43, %v8793_v26  ;;  %v1877_v48 = vpop.f32.mrf.mxu1 }
 0x222   : > { %v6847_v45 = vpop.f32.mrf.mxu0 }
 0x223   : > { %v9117_v27 = vadd.f32 %v1877_v48, %v1694_v53  ;;  %v6923_v13 = vpop.f32.mrf.mxu1 }
 0x224   : > { %v1631_v19 = vpop.f32.mrf.mxu0  ;;  %7129 = vmatmul.mubr.bf16.gmra.mxu0 %v10896_v3 }
 0x225   : > { %v1695_v23 = vadd.f32 %v1631_v19, %v8812_v18  ;;  %v1882_v50 = vpop.f32.mrf.mxu1  ;;  %7132 = vmatprep.mubr.msk.bf16.mxu0 %vm7729_vm0, %v10880_v40 }
 0x226   : > { %v6850_v31 = vpop.f32.mrf.mxu0 }
 0x227   : > { %v9123_v5 = vadd.f32 %v1882_v50, %v1695_v23  ;;  %v6926_v36 = vpop.f32.mrf.mxu1  ;;  %v10899_v31 = vld [vmem:[#allocation35_spill] sm:$0xff] }
 0x228   : > { %v1634_v16 = vpop.f32.mrf.mxu0 }
 0x229   : > { %v1696_v26 = vadd.f32 %v1634_v16, %v8822_v60  ;;  %v1885_v58 = vpop.f32.mrf.mxu1 }
 0x22a   : > { %v6851_v22 = vpop.f32.mrf.mxu0 }
 0x22b   : > { %v9126_v57 = vadd.f32 %v1885_v58, %v1696_v26  ;;  %v6927_v24 = vpop.f32.mrf.mxu1 }
 0x22c   : > { %v1639_v1 = vpop.f32.mrf.mxu0  ;;  %7133 = vmatmul.mubr.bf16.gmra.mxu0 %v10897_v4 }
 0x22d   : > { %v1697_v18 = vadd.f32 %v1639_v1, %v8837_v46  ;;  %v1890_v33 = vpop.f32.mrf.mxu1  ;;  %7136 = vmatprep.mubr.msk.bf16.mxu0 %vm7729_vm0, %v10880_v40 }
 0x22e   : > { %v6854_v44 = vpop.f32.mrf.mxu0 }
 0x22f   : > { %v9132_v2 = vadd.f32 %v1890_v33, %v1697_v18  ;;  %v6930_v0 = vpop.f32.mrf.mxu1  ;;  %v10900_v44 = vld [vmem:[#allocation36_spill] sm:$0xff] }
 0x230   : > { %v1642_v6 = vpop.f32.mrf.mxu0 }
 0x231   : > { %v1698_v60 = vadd.f32 %v1642_v6, %v8846_v61  ;;  %v1893_v38 = vpop.f32.mrf.mxu1 }
 0x232   : > { %v6855_v25 = vpop.f32.mrf.mxu0 }
 0x233   : > { %v9135_v35 = vadd.f32 %v1893_v38, %v1698_v60  ;;  %v6931_v29 = vpop.f32.mrf.mxu1 }
 0x234   : > { %v1647_v21 = vpop.f32.mrf.mxu0  ;;  %7137 = vmatmul.mubr.bf16.gmra.mxu0 %v10898_v55 }
 0x235   : > { %v1699_v46 = vadd.f32 %v1647_v21, %v8861_v51  ;;  %v1898_v56 = vpop.f32.mrf.mxu1  ;;  %7140 = vmatprep.mubr.msk.bf16.mxu0 %vm7729_vm0, %v10880_v40 }
 0x236   : > { %v6858_v43 = vpop.f32.mrf.mxu0 }
 0x237   : > { %v9141_v53 = vadd.f32 %v1898_v56, %v1699_v46  ;;  %v6934_v48 = vpop.f32.mrf.mxu1  ;;  %v10901_v43 = vld [vmem:[#allocation37_spill] sm:$0xff] }
 0x238   : > { %v1650_v45 = vpop.f32.mrf.mxu0 }
 0x239   : > { %v1700_v61 = vadd.f32 %v1650_v45, %v8870_v15  ;;  %v1901_v13 = vpop.f32.mrf.mxu1 }
 0x23a   : > { %v6859_v19 = vpop.f32.mrf.mxu0 }
 0x23b   : > { %v9144_v3 = vadd.f32 %v1901_v13, %v1700_v61  ;;  %v6935_v23 = vpop.f32.mrf.mxu1 }
 0x23c   : > { %v1655_v50 = vpop.f32.mrf.mxu0  ;;  %7141 = vmatmul.mubr.bf16.gmra.mxu0 %v10899_v31 }
 0x23d   : > { %v1701_v51 = vadd.f32 %v1655_v50, %v8885_v54  ;;  %v1906_v36 = vpop.f32.mrf.mxu1  ;;  %7144 = vmatprep.mubr.msk.bf16.mxu0 %vm7729_vm0, %v10880_v40 }
 0x23e   : > { %v6862_v16 = vpop.f32.mrf.mxu0 }
 0x23f   : > { %v9150_v26 = vadd.f32 %v1906_v36, %v1701_v51  ;;  %v6938_v58 = vpop.f32.mrf.mxu1  ;;  %v10902_v51 = vld [vmem:[#allocation38_spill] sm:$0xff] }
 0x240   : > { %v1658_v22 = vpop.f32.mrf.mxu0 }
 0x241   : > { %v1702_v15 = vadd.f32 %v1658_v22, %v8894_v62  ;;  %v1909_v24 = vpop.f32.mrf.mxu1 }
 0x242   : > { %v6863_v1 = vpop.f32.mrf.mxu0 }
 0x243   : > { %v9153_v4 = vadd.f32 %v1909_v24, %v1702_v15  ;;  %v6939_v18 = vpop.f32.mrf.mxu1 }
 0x244   : > { %v1663_v33 = vpop.f32.mrf.mxu0  ;;  %7145 = vmatmul.mubr.bf16.gmra.mxu0 %v10900_v44 }
 0x245   : > { %v1703_v54 = vadd.f32 %v1663_v33, %v8909_v9  ;;  %v1914_v0 = vpop.f32.mrf.mxu1  ;;  %7148 = vmatprep.mubr.msk.bf16.mxu0 %vm7729_vm0, %v10880_v40 }
 0x246   : > { %v6866_v6 = vpop.f32.mrf.mxu0 }
 0x247   : > { %v9159_v60 = vadd.f32 %v1914_v0, %v1703_v54  ;;  %v6942_v38 = vpop.f32.mrf.mxu1  ;;  %v10903_v0 = vld [vmem:[#allocation39_spill] sm:$0xff] }
 0x248   : > { %v1666_v25 = vpop.f32.mrf.mxu0 }
 0x249   : > { %v1704_v62 = vadd.f32 %v1666_v25, %v8918_v30  ;;  %v1917_v29 = vpop.f32.mrf.mxu1 }
 0x24a   : > { %v6867_v21 = vpop.f32.mrf.mxu0 }
 0x24b   : > { %v9162_v55 = vadd.f32 %v1917_v29, %v1704_v62  ;;  %v6943_v46 = vpop.f32.mrf.mxu1 }
 0x24c   : > { %v1671_v56 = vpop.f32.mrf.mxu0  ;;  %7149 = vmatmul.mubr.bf16.gmra.mxu0 %v10901_v43 }
 0x24d   : > { %v1705_v9 = vadd.f32 %v1671_v56, %v8933_v41  ;;  %v1922_v48 = vpop.f32.mrf.mxu1  ;;  %7152 = vmatprep.mubr.msk.bf16.mxu0 %vm7729_vm0, %v10880_v40 }
 0x24e   : > { %v6870_v45 = vpop.f32.mrf.mxu0 }
 0x24f   : > { %v9168_v61 = vadd.f32 %v1922_v48, %v1705_v9  ;;  %v6946_v13 = vpop.f32.mrf.mxu1  ;;  %v10904_v48 = vld [vmem:[#allocation40_spill] sm:$0xff] }
 0x250   : > { %v1674_v19 = vpop.f32.mrf.mxu0 }
 0x251   : > { %v1925_v30 = vpop.f32.mrf.mxu1 }
 0x252   : > { %v6871_v23 = vpop.f32.mrf.mxu0 }
 0x253   : > { %v6947_v50 = vpop.f32.mrf.mxu1 }
 0x254   : > { %v2056_v31 = vpop.f32.mrf.mxu0  ;;  %7153 = vmatmul.mubr.bf16.gmra.mxu0 %v10902_v51 }
 0x255   : > { %v2174_v36 = vadd.f32 %v2056_v31, %v8954_v59  ;;  %v2312_v16 = vpop.f32.mrf.mxu1  ;;  %7156 = vmatprep.mubr.msk.bf16.mxu0 %vm7729_vm0, %v10880_v40 }
 0x256   : > { %v6966_v41 = vpop.f32.mrf.mxu0 }
 0x257   : > { %v9174_v58 = vadd.f32 %v2312_v16, %v2174_v36  ;;  %v7042_v22 = vpop.f32.mrf.mxu1  ;;  %v10905_v41 = vld [vmem:[#allocation43_spill] sm:$0xff] }
 0x258   : > { %v2059_v15 = vpop.f32.mrf.mxu0 }
 0x259   : > { %v2175_v24 = vadd.f32 %v2059_v15, %v8963_v34  ;;  %v2315_v1 = vpop.f32.mrf.mxu1  ;;  %v2477_v15 = vrot.slane %v9004_v17, 1 }
 0x25a   : > { %v6967_v18 = vpop.f32.mrf.mxu0 }
 0x25b   : > { %v9177_v33 = vadd.f32 %v2315_v1, %v2175_v24  ;;  %v7043_v44 = vpop.f32.mrf.mxu1 }
 0x25c   : > { %v2064_v54 = vpop.f32.mrf.mxu0  ;;  %7157 = vmatmul.mubr.bf16.gmra.mxu0 %v10903_v0  ;;  %v2478_v0 = vsel %vm930_vm3, %v8678_v28, %v2477_v15 }
 0x25d   : > { %v2176_v59 = vadd.f32 %v2064_v54, %v8978_v42  ;;  %v2320_v6 = vpop.f32.mrf.mxu1  ;;  %7160 = vmatprep.mubr.msk.bf16.mxu0 %vm7729_vm0, %v10880_v40 }
 0x25e   : > { %v6970_v38 = vpop.f32.mrf.mxu0 }
 0x25f   : > { %v9183_v25 = vadd.f32 %v2320_v6, %v2176_v59  ;;  %v7046_v62 = vpop.f32.mrf.mxu1 }
 0x260   : > { %v2067_v29 = vpop.f32.mrf.mxu0 }
 0x261   : > { %v2177_v34 = vadd.f32 %v2067_v29, %v8987_v7  ;;  %v2323_v21 = vpop.f32.mrf.mxu1 }
 0x262   : > { %v6971_v46 = vpop.f32.mrf.mxu0 }
 0x263   : > { %v9186_v56 = vadd.f32 %v2323_v21, %v2177_v34  ;;  %v7047_v43 = vpop.f32.mrf.mxu1 }
 0x264   : > { %v2072_v9 = vpop.f32.mrf.mxu0  ;;  %7161 = vmatmul.mubr.bf16.gmra.mxu0 %v10904_v48 }
 0x265   : > { %v2178_v42 = vadd.f32 %v2072_v9, %v9006_v49  ;;  %v2328_v45 = vpop.f32.mrf.mxu1  ;;  %7164 = vmatprep.mubr.msk.bf16.mxu0 %vm7729_vm0, %v10880_v40 }
 0x266   : > { %v6974_v13 = vpop.f32.mrf.mxu0 }
 0x267   : > { %v9192_v19 = vadd.f32 %v2328_v45, %v2178_v42  ;;  %v7050_v30 = vpop.f32.mrf.mxu1 }
 0x268   : > { %v2075_v23 = vpop.f32.mrf.mxu0 }
 0x269   : > { %v2179_v7 = vadd.f32 %v2075_v23, %v9016_v37  ;;  %v2331_v50 = vpop.f32.mrf.mxu1  ;;  %v7639_v23 = vld [vmem:[%s10810_s2 + $0x78] sm:$0xff]  }
 0x26a   : > { %v6975_v31 = vpop.f32.mrf.mxu0  ;;  %7176 = vmatprep.subr.bf16.mxu1 %v7639_v23 }
 0x26b   : > { %v9195_v51 = vadd.f32 %v2331_v50, %v2179_v7  ;;  %v7051_v36 = vpop.f32.mrf.mxu1  ;;  %7177 = vmatpush3.bf16.msra.mxu1 %v7639_v23 }
 0x26c   : > { %v2080_v16 = vpop.f32.mrf.mxu0  ;;  %7165 = vmatmul.mubr.bf16.gmra.mxu0 %v10905_v41 }
 0x26d   : > { %v2180_v49 = vadd.f32 %v2080_v16, %v9031_v10  ;;  %v2336_v22 = vpop.f32.mrf.mxu1  ;;  %7168 = vmatprep.mubr.msk.bf16.mxu0 %vm7729_vm0, %v10880_v40 }
 0x26e   : > { %v6978_v24 = vpop.f32.mrf.mxu0 }
 0x26f   : > { %v9202_v1 = vadd.f32 %v2336_v22, %v2180_v49  ;;  %v7054_v37 = vpop.f32.mrf.mxu1 }
 0x270   : > { %v2083_v18 = vpop.f32.mrf.mxu0 }
 0x271   : > { %v2181_v44 = vadd.f32 %v2083_v18, %v9042_v47  ;;  %v2339_v54 = vpop.f32.mrf.mxu1 }
 0x272   : > { %v6979_v59 = vpop.f32.mrf.mxu0 }
 0x273   : > { %v9207_v6 = vadd.f32 %v2339_v54, %v2181_v44  ;;  %v7055_v10 = vpop.f32.mrf.mxu1 }
 0x274   : > { %v2088_v38 = vpop.f32.mrf.mxu0  ;;  %7169 = vmatmul.mubr.bf16.gmra.mxu0 %v2478_v0 }
 0x275   : > { %v2182_v62 = vadd.f32 %v2088_v38, %v9057_v39  ;;  %v2344_v17 = vpop.f32.mrf.mxu1  ;;  %7172 = vmatprep.mubr.msk.bf16.mxu0 %vm7729_vm0, %v10880_v40 }
 0x276   : > { %v6982_v29 = vpop.f32.mrf.mxu0 }
 0x277   : > { %v9212_v34 = vadd.f32 %v2344_v17, %v2182_v62  ;;  %v7058_v47 = vpop.f32.mrf.mxu1  ;;  %v7640_v29 = vld [vmem:[%s10810_s2 + $0x70] sm:$0xff]  }
 0x278   : > { %v2091_v21 = vpop.f32.mrf.mxu0  ;;  %7178 = vmatprep.subr.bf16.mxu1 %v7640_v29 }
 0x279   : > { %v2183_v46 = vadd.f32 %v2091_v21, %v9066_v14  ;;  %v2347_v28 = vpop.f32.mrf.mxu1  ;;  %7179 = vmatpush3.bf16.msra.mxu1 %v7640_v29 }
 0x27a   : > { %v6983_v43 = vpop.f32.mrf.mxu0 }
 0x27b   : > { %v9215_v9 = vadd.f32 %v2347_v28, %v2183_v46  ;;  %v7059_v48 = vpop.f32.mrf.mxu1 }
 0x27c   : > { %v2096_v42 = vpop.f32.mrf.mxu0  ;;  %7173 = vmatmul.mubr.bf16.gmra.mxu0 %v2477_v15 }
 0x27d   : > { %v2184_v39 = vadd.f32 %v2096_v42, %v9078_v12  ;;  %v2352_v45 = vpop.f32.mrf.mxu1 }
 0x27e   : > { %v6986_v13 = vpop.f32.mrf.mxu0 }
 0x27f   : > { %v9218_v30 = vadd.f32 %v2352_v45, %v2184_v39  ;;  %v7062_v40 = vpop.f32.mrf.mxu1 }
 0x280   : > { %v2099_v7 = vpop.f32.mrf.mxu0 }
 0x281   : > { %v2185_v14 = vadd.f32 %v2099_v7, %v9087_v63  ;;  %v2355_v50 = vpop.f32.mrf.mxu1 }
 0x282   : > { %v6987_v31 = vpop.f32.mrf.mxu0 }
 0x283   : > { %v9224_v36 = vadd.f32 %v2355_v50, %v2185_v14  ;;  %v7063_v16 = vpop.f32.mrf.mxu1 }
 0x284   : > { %v2104_v12 = vpop.f32.mrf.mxu0 }
 0x285   : > { %v2186_v41 = vadd.f32 %v2104_v12, %v9096_v11  ;;  %v2360_v49 = vpop.f32.mrf.mxu1 }
 0x286   : > { %v6990_v22 = vpop.f32.mrf.mxu0 }
 0x287   : > { %v9227_v15 = vadd.f32 %v2360_v49, %v2186_v41  ;;  %v7066_v24 = vpop.f32.mrf.mxu1  ;;  %v7641_v22 = vld [vmem:[%s10810_s2 + $0x68] sm:$0xff]  }
 0x288   : > { %v2107_v37 = vpop.f32.mrf.mxu0  ;;  %7180 = vmatprep.subr.bf16.mxu1 %v7641_v22 }
 0x289   : > { %v2187_v18 = vadd.f32 %v2107_v37, %v9099_v20  ;;  %v2363_v44 = vpop.f32.mrf.mxu1  ;;  %7181 = vmatpush3.bf16.msra.mxu1 %v7641_v22 }
 0x28a   : > { %v6991_v63 = vpop.f32.mrf.mxu0 }
 0x28b   : > { %v9230_v54 = vadd.f32 %v2363_v44, %v2187_v18  ;;  %v7067_v0 = vpop.f32.mrf.mxu1 }
 0x28c   : > { %v2112_v59 = vpop.f32.mrf.mxu0 }
 0x28d   : > { %v2188_v10 = vadd.f32 %v2112_v59, %v9105_v8  ;;  %v2368_v38 = vpop.f32.mrf.mxu1 }
 0x28e   : > { %v6994_v62 = vpop.f32.mrf.mxu0 }
 0x28f   : > { %v9233_v17 = vadd.f32 %v2368_v38, %v2188_v10  ;;  %v7070_v11 = vpop.f32.mrf.mxu1 }
 0x290   : > { %v2115_v47 = vpop.f32.mrf.mxu0 }
 0x291   : > { %v2189_v20 = vadd.f32 %v2115_v47, %v9108_v52  ;;  %v2371_v21 = vpop.f32.mrf.mxu1 }
 0x292   : > { %v6995_v46 = vpop.f32.mrf.mxu0 }
 0x293   : > { %v9239_v28 = vadd.f32 %v2371_v21, %v2189_v20  ;;  %v7071_v43 = vpop.f32.mrf.mxu1 }
 0x294   : > { %v2120_v8 = vpop.f32.mrf.mxu0 }
 0x295   : > { %v2190_v48 = vadd.f32 %v2120_v8, %v9114_v32  ;;  %v2376_v42 = vpop.f32.mrf.mxu1 }
 0x296   : > { %v6998_v39 = vpop.f32.mrf.mxu0 }
 0x297   : > { %v9242_v45 = vadd.f32 %v2376_v42, %v2190_v48  ;;  %v7074_v13 = vpop.f32.mrf.mxu1  ;;  %v7642_v39 = vld [vmem:[%s10810_s2 + $0x60] sm:$0xff]  }
 0x298   : > { %v2123_v40 = vpop.f32.mrf.mxu0  ;;  %7182 = vmatprep.subr.bf16.mxu1 %v7642_v39 }
 0x299   : > { %v2191_v23 = vadd.f32 %v2123_v40, %v9117_v27  ;;  %v2379_v7 = vpop.f32.mrf.mxu1  ;;  %7183 = vmatpush3.bf16.msra.mxu1 %v7642_v39 }
 0x29a   : > { %v6999_v52 = vpop.f32.mrf.mxu0 }
 0x29b   : > { %v9245_v14 = vadd.f32 %v2379_v7, %v2191_v23  ;;  %v7075_v50 = vpop.f32.mrf.mxu1 }
 0x29c   : > { %v2128_v31 = vpop.f32.mrf.mxu0 }
 0x29d   : > { %v2192_v16 = vadd.f32 %v2128_v31, %v9123_v5  ;;  %v2384_v12 = vpop.f32.mrf.mxu1 }
 0x29e   : > { %v7002_v41 = vpop.f32.mrf.mxu0 }
 0x29f   : > { %v9248_v49 = vadd.f32 %v2384_v12, %v2192_v16  ;;  %v7078_v32 = vpop.f32.mrf.mxu1 }
 0x2a0   : > { %v2131_v24 = vpop.f32.mrf.mxu0 }
 0x2a1   : > { %v2193_v27 = vadd.f32 %v2131_v24, %v9126_v57  ;;  %v2387_v37 = vpop.f32.mrf.mxu1 }
 0x2a2   : > { %v7003_v18 = vpop.f32.mrf.mxu0 }
 0x2a3   : > { %v9254_v44 = vadd.f32 %v2387_v37, %v2193_v27  ;;  %v7079_v63 = vpop.f32.mrf.mxu1  ;;  %v7643_v18 = vld [vmem:[%s10810_s2 + $0x58] sm:$0xff]  }
 0x2a4   : > { %v2136_v5 = vpop.f32.mrf.mxu0  ;;  %7184 = vmatprep.subr.bf16.mxu1 %v7643_v18 }
 0x2a5   : > { %v2194_v0 = vadd.f32 %v2136_v5, %v9132_v2  ;;  %v2392_v59 = vpop.f32.mrf.mxu1  ;;  %7185 = vmatpush3.bf16.msra.mxu1 %v7643_v18  ;;  %v7651_v18 = vld [vmem:[%s10810_s2 + $0xd0] sm:$0xff]  }
 0x2a6   : > { %v7006_v10 = vpop.f32.mrf.mxu0 }
 0x2a7   : > { %v9257_v38 = vadd.f32 %v2392_v59, %v2194_v0  ;;  %v7082_v62 = vpop.f32.mrf.mxu1 }
 0x2a8   : > { %v2139_v11 = vpop.f32.mrf.mxu0 }
 0x2a9   : > { %v2195_v29 = vadd.f32 %v2139_v11, %v9135_v35  ;;  %v2395_v47 = vpop.f32.mrf.mxu1 }
 0x2aa   : > { %v7007_v57 = vpop.f32.mrf.mxu0 }
 0x2ab   : > { %v9260_v20 = vadd.f32 %v2395_v47, %v2195_v29  ;;  %v7083_v21 = vpop.f32.mrf.mxu1 }
 0x2ac   : > { %v2144_v46 = vpop.f32.mrf.mxu0 }
 0x2ad   : > { %v2196_v43 = vadd.f32 %v2144_v46, %v9141_v53  ;;  %v2400_v8 = vpop.f32.mrf.mxu1 }
 0x2ae   : > { %v7010_v48 = vpop.f32.mrf.mxu0 }
 0x2af   : > { %v9263_v42 = vadd.f32 %v2400_v8, %v2196_v43  ;;  %v7086_v2 = vpop.f32.mrf.mxu1 }
 0x2b0   : > { %v2147_v13 = vpop.f32.mrf.mxu0 }
 0x2b1   : > { %v2197_v35 = vadd.f32 %v2147_v13, %v9144_v3  ;;  %v2403_v40 = vpop.f32.mrf.mxu1 }
 0x2b2   : > { %v7011_v23 = vpop.f32.mrf.mxu0 }
 0x2b3   : > { %v9269_v7 = vadd.f32 %v2403_v40, %v2197_v35  ;;  %v7087_v52 = vpop.f32.mrf.mxu1 }
 0x2b4   : > { %v2152_v53 = vpop.f32.mrf.mxu0 }
 0x2b5   : > { %v2198_v50 = vadd.f32 %v2152_v53, %v9150_v26  ;;  %v2408_v31 = vpop.f32.mrf.mxu1 }
 0x2b6   : > { %v7014_v16 = vpop.f32.mrf.mxu0 }
 0x2b7   : > { %v9272_v12 = vadd.f32 %v2408_v31, %v2198_v50  ;;  %v7090_v41 = vpop.f32.mrf.mxu1  ;;  %v7647_v50 = vld [vmem:[%s10810_s2 + $0xe8] sm:$0xff]  }
 0x2b8   : > { %v2155_v32 = vpop.f32.mrf.mxu0  ;;  %v7649_v41 = vld [vmem:[%s10810_s2 + $0xe0] sm:$0xff]  }
 0x2b9   : > { %v2199_v22 = vadd.f32 %v2155_v32, %v9153_v4  ;;  %v2411_v24 = vpop.f32.mrf.mxu1 }
 0x2ba   : > { %v7015_v3 = vpop.f32.mrf.mxu0 }
 0x2bb   : > { %v9275_v27 = vadd.f32 %v2411_v24, %v2199_v22  ;;  %v7091_v37 = vpop.f32.mrf.mxu1  ;;  %v7650_v24 = vld [vmem:[%s10810_s2 + $0xd8] sm:$0xff]  }
 0x2bc   : > { %v2160_v63 = vpop.f32.mrf.mxu0 }
 0x2bd   : > { %v2200_v26 = vadd.f32 %v2160_v63, %v9159_v60  ;;  %v2416_v5 = vpop.f32.mrf.mxu1  ;;  %v2713_v63 = vpop.permute.xlu0 %2712 }
 0x2be   : > { %v7018_v0 = vpop.f32.mrf.mxu0 }
 0x2bf   : > { %v9281_v59 = vadd.f32 %v2416_v5, %v2200_v26  ;;  %v7094_v10 = vpop.f32.mrf.mxu1  ;;  %v2723_v5 = vpop.permute.xlu1 %2722 }
 0x2c0   : > { %v2163_v4 = vpop.f32.mrf.mxu0  ;;  %v7653_v10 = vld [vmem:[%s10810_s2 + $0xc8] sm:$0xff]  }
 0x2c1   : > { %v2201_v62 = vadd.f32 %v2163_v4, %v9162_v55  ;;  %v2419_v11 = vpop.f32.mrf.mxu1  ;;  %v7645_v55 = vld [vmem:[%s10810_s2 + $0xf8] sm:$0xff]  }
 0x2c2   : > { %v7019_v29 = vpop.f32.mrf.mxu0  ;;  %7296 = vmatprep.subr.bf16.mxu0 %v7645_v55 }
 0x2c3   : > { %v9284_v47 = vadd.f32 %v2419_v11, %v2201_v62  ;;  %v7095_v57 = vpop.f32.mrf.mxu1  ;;  %7297 = vmatpush3.bf16.msra.mxu0 %v7645_v55  ;;  %v2718_v62 = vpop.permute.xlu0 %2717  ;;  %v7644_v29 = vld [vmem:[%s10810_s2 + $0x50] sm:$0xff]  }
 0x2c4   : > { %v2168_v21 = vpop.f32.mrf.mxu0  ;;  %v7654_v57 = vld [vmem:[%s10810_s2 + $0xc0] sm:$0xff]   ;;  %7186 = vmatprep.subr.bf16.mxu1 %v7644_v29 }
 0x2c5   : > { %v2202_v46 = vadd.f32 %v2168_v21, %v9168_v61  ;;  %v2424_v43 = vpop.f32.mrf.mxu1  ;;  %v7646_v61 = vld [vmem:[%s10810_s2 + $0xf0] sm:$0xff]   ;;  %v2728_v21 = vpop.permute.xlu1 %2727  ;;  %7187 = vmatpush3.bf16.msra.mxu1 %v7644_v29 }
 0x2c6   : > { %v7022_v60 = vpop.f32.mrf.mxu0  ;;  %7298 = vmatprep.subr.bf16.mxu0 %v7646_v61 }
 0x2c7   : > { %v9287_v8 = vadd.f32 %v2424_v43, %v2202_v46  ;;  %v7098_v48 = vpop.f32.mrf.mxu1  ;;  %7299 = vmatpush3.bf16.msra.mxu0 %v7646_v61  ;;  %v7648_v43 = vld [vmem:[%s10810_s2 + $0x48] sm:$0xff]  }
 0x2c8   : > { %v2171_v2 = vpop.f32.mrf.mxu0  ;;  %7300 = vmatprep.subr.bf16.mxu0 %v7647_v50  ;;  %v7652_v48 = vld [vmem:[%s10810_s2 + $0x40] sm:$0xff]   ;;  %7188 = vmatprep.subr.bf16.mxu1 %v7648_v43 }
 0x2c9   : > { %v2427_v39 = vpop.f32.mrf.mxu1  ;;  %v2733_v2 = vpop.permute.xlu0 %2732  ;;  %7189 = vmatpush3.bf16.msra.mxu1 %v7648_v43 }
 0x2ca   : > { %v7023_v13 = vpop.f32.mrf.mxu0  ;;  %7190 = vmatprep.subr.bf16.mxu1 %v7652_v48 }
 0x2cb   : > { %v7099_v35 = vpop.f32.mrf.mxu1  ;;  %7301 = vmatpush3.bf16.msra.mxu0 %v7647_v50  ;;  %v2738_v13 = vpop.permute.xlu1 %2737 }
 0x2cc   : > { %v2563_v40 = vpop.f32.mrf.mxu0  ;;  %7302 = vmatprep.subr.bf16.mxu0 %v7649_v41 }
 0x2cd   : > { %7191 = vmatpush3.bf16.msra.mxu1 %v7652_v48  ;;  %v2743_v50 = vpop.permute.xlu0 %2742 }
 0x2ce   : > { %v7118_v23 = vpop.f32.mrf.mxu0 }
 0x2cf   : > { %7303 = vmatpush3.bf16.msra.mxu0 %v7649_v41  ;;  %v9326_v23 = vadd.f32 %v2563_v40, %v9174_v58 }
 0x2d0   : > { %v2566_v52 = vpop.f32.mrf.mxu0  ;;  %7304 = vmatprep.subr.bf16.mxu0 %v7650_v24 }
 0x2d1   : > { %v9323_v35 = vadd.f32 %v2566_v52, %v9177_v33  ;;  %v2855_v33 = vmul.f32 %v2713_v63, %v9326_v23 }
 0x2d2   : > { %v7119_v53 = vpop.f32.mrf.mxu0 }
 0x2d3   : > { %7305 = vmatpush3.bf16.msra.mxu0 %v7650_v24  ;;  %v2748_v24 = vpop.permute.xlu1 %2747  ;;  %v2918_v63 = vmul.f32 %v2855_v33, %v9326_v23 }
 0x2d4   : > { %v2571_v31 = vpop.f32.mrf.mxu0  ;;  %7306 = vmatprep.subr.bf16.mxu0 %v7651_v18 }
 0x2d5   : > { %v9329_v61 = vadd.f32 %v2571_v31, %v9183_v25 }
 0x2d6   : > { %v7122_v16 = vpop.f32.mrf.mxu0 }
 0x2d7   : > { %7307 = vmatpush3.bf16.msra.mxu0 %v7651_v18  ;;  %v2856_v16 = vmul.f32 %v2718_v62, %v9323_v35  ;;  %v2857_v52 = vmul.f32 %v2723_v5, %v9329_v61 }
 0x2d8   : > { %v2574_v32 = vpop.f32.mrf.mxu0  ;;  %7308 = vmatprep.subr.bf16.mxu0 %v7653_v10 }
 0x2d9   : > { %v9333_v41 = vadd.f32 %v2574_v32, %v9186_v56  ;;  %v2919_v25 = vmul.f32 %v2856_v16, %v9323_v35  ;;  %v9348_v56 = vld [vmem:[%s10810_s2 + $0x38] sm:$0xff]   ;;  %v2753_v32 = vpop.permute.xlu0 %2752 }
 0x2da   : > { %v7123_v22 = vpop.f32.mrf.mxu0  ;;  %7216 = vmatprep.subr.bf16.mxu1 %v9348_v56 }
 0x2db   : > { %7309 = vmatpush3.bf16.msra.mxu0 %v7653_v10  ;;  %v2858_v31 = vmul.f32 %v2728_v21, %v9333_v41  ;;  %v2947_v10 = vadd.f32 %v2919_v25, %v2918_v63 }
 0x2dc   : > { %v2579_v3 = vpop.f32.mrf.mxu0  ;;  %7310 = vmatprep.subr.bf16.mxu0 %v7654_v57 }
 0x2dd   : > { %v9338_v58 = vadd.f32 %v2579_v3, %v9192_v19  ;;  %v2920_v19 = vmul.f32 %v2857_v52, %v9329_v61  ;;  %v2921_v62 = vmul.f32 %v2858_v31, %v9333_v41 }
 0x2de   : > { %v7126_v37 = vpop.f32.mrf.mxu0 }
 0x2df   : > { %7311 = vmatpush3.bf16.msra.mxu0 %v7654_v57  ;;  %v2859_v3 = vmul.f32 %v2733_v2, %v9338_v58  ;;  %v2948_v43 = vadd.f32 %v2947_v10, %v2920_v19 }
 0x2e0   : > { %v2582_v26 = vpop.f32.mrf.mxu0 }
 0x2e1   : > { %v9343_v37 = vadd.f32 %v2582_v26, %v9195_v51  ;;  %v2884_v51 = vadd.f32 %v2856_v16, %v2855_v33  ;;  %v2758_v26 = vpop.permute.xlu1 %2757  ;;  %v2949_v16 = vadd.f32 %v2948_v43, %v2921_v62 }
 0x2e2   : > { %v7127_v0 = vpop.f32.mrf.mxu0 }
 0x2e3   : > { %v2885_v21 = vadd.f32 %v2884_v51, %v2857_v52 }
 0x2e4   : > { %v2587_v4 = vpop.f32.mrf.mxu0 }
 0x2e5   : > { %v9354_v5 = vadd.f32 %v2587_v4, %v9202_v1  ;;  %v2886_v2 = vadd.f32 %v2885_v21, %v2858_v31 }
 0x2e6   : > { %v7130_v11 = vpop.f32.mrf.mxu0 }
 0x2e7   : > { %v2860_v11 = vmul.f32 %v2738_v13, %v9343_v37  ;;  %v2861_v1 = vmul.f32 %v2743_v50, %v9354_v5  ;;  %v2887_v33 = vadd.f32 %v2886_v2, %v2859_v3  ;;  %v9375_v50 = vld [vmem:[%s10810_s2 + $0x178] sm:$0xff]  }
 0x2e8   : > { %v2590_v46 = vpop.f32.mrf.mxu0  ;;  %7376 = vmatprep.subr.bf16.mxu0 %v9375_v50 }
 0x2e9   : > { %v9360_v29 = vadd.f32 %v2590_v46, %v9207_v6  ;;  %v2924_v52 = vmul.f32 %v2861_v1, %v9354_v5 }
 0x2ea   : > { %v7131_v60 = vpop.f32.mrf.mxu0 }
 0x2eb   : > { %v2922_v60 = vmul.f32 %v2859_v3, %v9338_v58  ;;  %v2862_v13 = vmul.f32 %v2748_v24, %v9360_v29 }
 0x2ec   : > { %v2595_v39 = vpop.f32.mrf.mxu0 }
 0x2ed   : > { %v9365_v4 = vadd.f32 %v2595_v39, %v9212_v34  ;;  %v2768_v34 = vpop.permute.xlu1 %2767  ;;  %v2950_v39 = vadd.f32 %v2949_v16, %v2922_v60 }
 0x2ee   : > { %v7134_v55 = vpop.f32.mrf.mxu0 }
 0x2ef   : > { %v2763_v55 = vpop.permute.xlu0 %2762  ;;  %v2863_v25 = vmul.f32 %v2753_v32, %v9365_v4 }
 0x2f0   : > { %v2598_v53 = vpop.f32.mrf.mxu0 }
 0x2f1   : > { %v9370_v6 = vadd.f32 %v2598_v53, %v9215_v9  ;;  %v2925_v53 = vmul.f32 %v2862_v13, %v9360_v29  ;;  %v2926_v32 = vmul.f32 %v2863_v25, %v9365_v4  ;;  %v2778_v21 = vpop.permute.xlu1 %2777 }
 0x2f2   : > { %v7135_v22 = vpop.f32.mrf.mxu0 }
 0x2f3   : > { %v2923_v22 = vmul.f32 %v2860_v11, %v9343_v37  ;;  %v2864_v63 = vmul.f32 %v2758_v26, %v9370_v6  ;;  %v2773_v10 = vpop.permute.xlu0 %2772 }
 0x2f4   : > { %v2603_v40 = vpop.f32.mrf.mxu0 }
 0x2f5   : > { %v9380_v31 = vadd.f32 %v2603_v40, %v9218_v30  ;;  %v2951_v9 = vadd.f32 %v2950_v39, %v2923_v22  ;;  %v2927_v26 = vmul.f32 %v2864_v63, %v9370_v6 }
 0x2f6   : > { %v7138_v18 = vpop.f32.mrf.mxu0 }
 0x2f7   : > { %v2888_v18 = vadd.f32 %v2887_v33, %v2860_v11  ;;  %v2952_v62 = vadd.f32 %v2951_v9, %v2924_v52  ;;  %v2865_v30 = vmul.f32 %v2763_v55, %v9380_v31 }
 0x2f8   : > { %v2606_v0 = vpop.f32.mrf.mxu0 }
 0x2f9   : > { %v9386_v19 = vadd.f32 %v2606_v0, %v9224_v36  ;;  %v2889_v51 = vadd.f32 %v2888_v18, %v2861_v1  ;;  %v2953_v43 = vadd.f32 %v2952_v62, %v2925_v53  ;;  %v2928_v16 = vmul.f32 %v2865_v30, %v9380_v31 }
 0x2fa   : > { %v7139_v57 = vpop.f32.mrf.mxu0 }
 0x2fb   : > { %v2890_v57 = vadd.f32 %v2889_v51, %v2862_v13  ;;  %v2866_v36 = vmul.f32 %v2768_v34, %v9386_v19  ;;  %v2954_v2 = vadd.f32 %v2953_v43, %v2926_v32  ;;  %v2783_v13 = vpop.permute.xlu0 %2782 }
 0x2fc   : > { %v2611_v48 = vpop.f32.mrf.mxu0 }
 0x2fd   : > { %v9391_v40 = vadd.f32 %v2611_v48, %v9227_v15  ;;  %v2891_v60 = vadd.f32 %v2890_v57, %v2863_v25  ;;  %v2929_v33 = vmul.f32 %v2866_v36, %v9386_v19  ;;  %v2788_v25 = vpop.permute.xlu1 %2787 }
 0x2fe   : > { %v7142_v46 = vpop.f32.mrf.mxu0 }
 0x2ff   : > { %v2867_v55 = vmul.f32 %v2773_v10, %v9391_v40  ;;  %v2892_v48 = vadd.f32 %v2891_v60, %v2864_v63  ;;  %v2955_v46 = vadd.f32 %v2954_v2, %v2927_v26 }
 0x300   : > { %v2614_v24 = vpop.f32.mrf.mxu0 }
 0x301   : > { %v9396_v1 = vadd.f32 %v2614_v24, %v9230_v54  ;;  %v2893_v39 = vadd.f32 %v2892_v48, %v2865_v30  ;;  %v2956_v24 = vadd.f32 %v2955_v46, %v2928_v16  ;;  %v2930_v18 = vmul.f32 %v2867_v55, %v9391_v40 }
 0x302   : > { %v7143_v3 = vpop.f32.mrf.mxu0 }
 0x303   : > { %v2868_v52 = vmul.f32 %v2778_v21, %v9396_v1  ;;  %v2894_v53 = vadd.f32 %v2893_v39, %v2866_v36  ;;  %v2957_v3 = vadd.f32 %v2956_v24, %v2929_v33 }
 0x304   : > { %v2619_v11 = vpop.f32.mrf.mxu0 }
 0x305   : > { %v9401_v22 = vadd.f32 %v2619_v11, %v9233_v17  ;;  %v2895_v10 = vadd.f32 %v2894_v53, %v2867_v55  ;;  %v2931_v62 = vmul.f32 %v2868_v52, %v9396_v1  ;;  %v2958_v30 = vadd.f32 %v2957_v3, %v2930_v18 }
 0x306   : > { %v7146_v0 = vpop.f32.mrf.mxu0 }
 0x307   : > { %v2869_v17 = vmul.f32 %v2783_v13, %v9401_v22  ;;  %v2896_v57 = vadd.f32 %v2895_v10, %v2868_v52  ;;  %v2959_v0 = vadd.f32 %v2958_v30, %v2931_v62 }
 0x308   : > { %v2622_v15 = vpop.f32.mrf.mxu0 }
 0x309   : > { %v9406_v54 = vadd.f32 %v2622_v15, %v9239_v28  ;;  %v2793_v28 = vpop.permute.xlu0 %2792  ;;  %v2932_v21 = vmul.f32 %v2869_v17, %v9401_v22  ;;  %v2897_v60 = vadd.f32 %v2896_v57, %v2869_v17 }
 0x30a   : > { %v7147_v34 = vpop.f32.mrf.mxu0 }
 0x30b   : > { %v2870_v32 = vmul.f32 %v2788_v25, %v9406_v54  ;;  %v2960_v15 = vadd.f32 %v2959_v0, %v2932_v21 }
 0x30c   : > { %v2627_v9 = vpop.f32.mrf.mxu0 }
 0x30d   : > { %v9411_v63 = vadd.f32 %v2627_v9, %v9242_v45  ;;  %v2798_v45 = vpop.permute.xlu1 %2797  ;;  %v2933_v2 = vmul.f32 %v2870_v32, %v9406_v54  ;;  %v2898_v48 = vadd.f32 %v2897_v60, %v2870_v32  ;;  %v2803_v33 = vpop.permute.xlu0 %2802 }
 0x30e   : > { %v7150_v51 = vpop.f32.mrf.mxu0 }
 0x30f   : > { %v2871_v43 = vmul.f32 %v2793_v28, %v9411_v63 }
 0x310   : > { %v2630_v11 = vpop.f32.mrf.mxu0 }
 0x311   : > { %v9418_v26 = vadd.f32 %v2630_v11, %v9245_v14  ;;  %v2934_v13 = vmul.f32 %v2871_v43, %v9411_v63  ;;  %v2961_v14 = vadd.f32 %v2960_v15, %v2933_v2  ;;  %v2899_v39 = vadd.f32 %v2898_v48, %v2871_v43  ;;  %v2808_v3 = vpop.permute.xlu1 %2807  ;;  %v2813_v21 = vpop.permute.xlu0 %2812 }
 0x312   : > { %v7151_v36 = vpop.f32.mrf.mxu0 }
 0x313   : > { %v2872_v16 = vmul.f32 %v2798_v45, %v9418_v26  ;;  %v2962_v18 = vadd.f32 %v2961_v14, %v2934_v13 }
 0x314   : > { %v2635_v55 = vpop.f32.mrf.mxu0 }
 0x315   : > { %v9424_v46 = vadd.f32 %v2635_v55, %v9248_v49  ;;  %v2935_v52 = vmul.f32 %v2872_v16, %v9418_v26  ;;  %v2900_v9 = vadd.f32 %v2899_v39, %v2872_v16  ;;  %v2818_v16 = vpop.permute.xlu1 %2817  ;;  %v2823_v14 = vpop.permute.xlu0 %2822 }
 0x316   : > { %v7154_v34 = vpop.f32.mrf.mxu0 }
 0x317   : > { %v2873_v25 = vmul.f32 %v2803_v33, %v9424_v46  ;;  %v2963_v49 = vadd.f32 %v2962_v18, %v2935_v52 }
 0x318   : > { %v2638_v24 = vpop.f32.mrf.mxu0 }
 0x319   : > { %v2936_v53 = vmul.f32 %v2873_v25, %v9424_v46  ;;  %v9430_v17 = vadd.f32 %v2638_v24, %v9254_v44  ;;  %v2901_v10 = vadd.f32 %v2900_v9, %v2873_v25 }
 0x31a   : > { %v7155_v51 = vpop.f32.mrf.mxu0 }
 0x31b   : > { %v2874_v62 = vmul.f32 %v2808_v3, %v9430_v17  ;;  %v2964_v28 = vadd.f32 %v2963_v49, %v2936_v53  ;;  %v2828_v53 = vpop.permute.xlu1 %2827 }
 0x31c   : > { %v2643_v32 = vpop.f32.mrf.mxu0 }
 0x31d   : > { %v2902_v30 = vadd.f32 %v2901_v10, %v2874_v62  ;;  %v2937_v11 = vmul.f32 %v2874_v62, %v9430_v17  ;;  %v9435_v57 = vadd.f32 %v2643_v32, %v9257_v38 }
 0x31e   : > { %v7158_v43 = vpop.f32.mrf.mxu0 }
 0x31f   : > { %v2965_v45 = vadd.f32 %v2964_v28, %v2937_v11  ;;  %v2875_v44 = vmul.f32 %v2813_v21, %v9435_v57  ;;  %v2833_v28 = vpop.permute.xlu0 %2832 }
 0x320   : > { %v2646_v36 = vpop.f32.mrf.mxu0 }
 0x321   : > { %v2903_v0 = vadd.f32 %v2902_v30, %v2875_v44  ;;  %v2938_v60 = vmul.f32 %v2875_v44, %v9435_v57  ;;  %v9440_v2 = vadd.f32 %v2646_v36, %v9260_v20  ;;  %v2838_v36 = vpop.permute.xlu1 %2837 }
 0x322   : > { %v7159_v55 = vpop.f32.mrf.mxu0 }
 0x323   : > { %v2966_v15 = vadd.f32 %v2965_v45, %v2938_v60  ;;  %v2876_v48 = vmul.f32 %v2818_v16, %v9440_v2 }
 0x324   : > { %v2651_v13 = vpop.f32.mrf.mxu0 }
 0x325   : > { %v2904_v38 = vadd.f32 %v2903_v0, %v2876_v48  ;;  %v2939_v33 = vmul.f32 %v2876_v48, %v9440_v2  ;;  %v9445_v34 = vadd.f32 %v2651_v13, %v9263_v42  ;;  %v2843_v13 = vpop.permute.xlu0 %2842 }
 0x326   : > { %v7162_v39 = vpop.f32.mrf.mxu0 }
 0x327   : > { %v2967_v52 = vadd.f32 %v2966_v15, %v2939_v33  ;;  %v2877_v25 = vmul.f32 %v2823_v14, %v9445_v34 }
 0x328   : > { %v2654_v24 = vpop.f32.mrf.mxu0 }
 0x329   : > { %v2905_v20 = vadd.f32 %v2904_v38, %v2877_v25  ;;  %v2940_v18 = vmul.f32 %v2877_v25, %v9445_v34  ;;  %v9450_v9 = vadd.f32 %v2654_v24, %v9269_v7  ;;  %v2848_v24 = vpop.permute.xlu1 %2847 }
 0x32a   : > { %v7163_v3 = vpop.f32.mrf.mxu0 }
 0x32b   : > { %v2968_v51 = vadd.f32 %v2967_v52, %v2940_v18  ;;  %v2878_v49 = vmul.f32 %v2828_v53, %v9450_v9 }
 0x32c   : > { %v2659_v10 = vpop.f32.mrf.mxu0 }
 0x32d   : > { %v2906_v42 = vadd.f32 %v2905_v20, %v2878_v49  ;;  %v2941_v62 = vmul.f32 %v2878_v49, %v9450_v9  ;;  %v9455_v32 = vadd.f32 %v2659_v10, %v9272_v12  ;;  %v2853_v10 = vpop.permute.xlu0 %2852 }
 0x32e   : > { %v7166_v30 = vpop.f32.mrf.mxu0 }
 0x32f   : > { %v2969_v11 = vadd.f32 %v2968_v51, %v2941_v62  ;;  %v2879_v21 = vmul.f32 %v2833_v28, %v9455_v32 }
 0x330   : > { %v2662_v43 = vpop.f32.mrf.mxu0 }
 0x331   : > { %v2907_v7 = vadd.f32 %v2906_v42, %v2879_v21  ;;  %v2942_v45 = vmul.f32 %v2879_v21, %v9455_v32  ;;  %v9460_v44 = vadd.f32 %v2662_v43, %v9275_v27 }
 0x332   : > { %v7167_v0 = vpop.f32.mrf.mxu0 }
 0x333   : > { %v2970_v60 = vadd.f32 %v2969_v11, %v2942_v45  ;;  %v2880_v16 = vmul.f32 %v2838_v36, %v9460_v44 }
 0x334   : > { %v2667_v55 = vpop.f32.mrf.mxu0 }
 0x335   : > { %v2908_v12 = vadd.f32 %v2907_v7, %v2880_v16  ;;  %v2943_v15 = vmul.f32 %v2880_v16, %v9460_v44  ;;  %v9465_v48 = vadd.f32 %v2667_v55, %v9281_v59 }
 0x336   : > { %v7170_v38 = vpop.f32.mrf.mxu0 }
 0x337   : > { %v2971_v33 = vadd.f32 %v2970_v60, %v2943_v15  ;;  %v2881_v14 = vmul.f32 %v2843_v13, %v9465_v48 }
 0x338   : > { %v2670_v39 = vpop.f32.mrf.mxu0 }
 0x339   : > { %v2909_v27 = vadd.f32 %v2908_v12, %v2881_v14  ;;  %v2944_v52 = vmul.f32 %v2881_v14, %v9465_v48  ;;  %v9470_v25 = vadd.f32 %v2670_v39, %v9284_v47 }
 0x33a   : > { %v7171_v20 = vpop.f32.mrf.mxu0 }
 0x33b   : > { %v2972_v18 = vadd.f32 %v2971_v33, %v2944_v52  ;;  %v2882_v53 = vmul.f32 %v2848_v24, %v9470_v25 }
 0x33c   : > { %v2675_v3 = vpop.f32.mrf.mxu0 }
 0x33d   : > { %v2910_v59 = vadd.f32 %v2909_v27, %v2882_v53  ;;  %v2945_v51 = vmul.f32 %v2882_v53, %v9470_v25  ;;  %v2709_v49 = vadd.f32 %v2675_v3, %v9287_v8 }
 0x33e   : > { %v7174_v42 = vpop.f32.mrf.mxu0 }
 0x33f   : > { %v2973_v62 = vadd.f32 %v2972_v18, %v2945_v51  ;;  %v2883_v28 = vmul.f32 %v2853_v10, %v2709_v49 }
 0x340   : > { %v2678_v30 = vpop.f32.mrf.mxu0 }
 0x341   : > { %v2911_v11 = vadd.f32 %v2910_v59, %v2883_v28  ;;  %v2946_v21 = vmul.f32 %v2883_v28, %v2709_v49 }
 0x342   : > { %v7175_v47 = vpop.f32.mrf.mxu0 }
 0x343   : > { %v2912_v43 = vrot.slane %v2911_v11, 4  ;;  %v2974_v7 = vadd.f32 %v2973_v62, %v2946_v21 }
 0x345   : > { %v2913_v45 = vadd.f32 %v2912_v43, %v2911_v11  ;;  %v2975_v36 = vrot.slane %v2974_v7, 4 }
 0x347   : > { %v2914_v0 = vrot.slane %v2913_v45, 2  ;;  %v2976_v60 = vadd.f32 %v2975_v36, %v2974_v7 }
 0x349   : > { %v2915_v16 = vadd.f32 %v2914_v0, %v2913_v45  ;;  %v2977_v55 = vrot.slane %v2976_v60, 2 }
 0x34b   : > { %v2916_v12 = vrot.slane %v2915_v16, 1  ;;  %v2978_v15 = vadd.f32 %v2977_v55, %v2976_v60 }
 0x34d   : > { %v2917_v13 = vadd.f32 %v2916_v12, %v2915_v16  ;;  %v2979_v8 = vrot.slane %v2978_v15, 1 }
 0x34f   : > { %v2980_v38 = vadd.f32 %v2979_v8, %v2978_v15  ;;  %v9475_v33 = vmul.f32 0.0051020407, %v2917_v13 }
 0x351   : > { %v2982_v14 = vmul.f32 0.0051020407, %v2980_v38  ;;  %v2983_v39 = vmul.f32 %v9475_v33, %v9475_v33  ;;  %v3013_v27 = vsub.f32 %v2709_v49, %v9475_v33  ;;  %v3003_v20 = vsub.f32 %v9424_v46, %v9475_v33 }
 0x352   : > { %v3004_v18 = vsub.f32 %v9430_v17, %v9475_v33  ;;  %v3005_v53 = vsub.f32 %v9435_v57, %v9475_v33  ;;  %v3006_v3 = vsub.f32 %v9440_v2, %v9475_v33  ;;  %v3007_v59 = vsub.f32 %v9445_v34, %v9475_v33  ;;  %v7661_v34 = vld [vmem:[%s10810_s2 + $0x20] sm:$0xff]  }
 0x353   : > { %v2984_v52 = vsub.f32 %v2982_v14, %v2983_v39  ;;  %v3008_v51 = vsub.f32 %v9450_v9, %v9475_v33  ;;  %v3009_v49 = vsub.f32 %v9455_v32, %v9475_v33  ;;  %v3010_v10 = vsub.f32 %v9460_v44, %v9475_v33 }
 0x354   : > { %v3011_v42 = vsub.f32 %v9465_v48, %v9475_v33  ;;  %v3012_v62 = vsub.f32 %v9470_v25, %v9475_v33  ;;  %v2987_v28 = vsub.f32 %v9329_v61, %v9475_v33  ;;  %v2988_v30 = vsub.f32 %v9333_v41, %v9475_v33  ;;  %v7670_v48 = vld [vmem:[%s10810_s2] sm:$0xff]  }
 0x355   : > { %v3014_v24 = vadd.f32 1e-05, %v2984_v52  ;;  %v2989_v11 = vsub.f32 %v9338_v58, %v9475_v33  ;;  %v2990_v21 = vsub.f32 %v9343_v37, %v9475_v33  ;;  %v2991_v47 = vsub.f32 %v9354_v5, %v9475_v33 }
 0x356   : > { %v2992_v7 = vsub.f32 %v9360_v29, %v9475_v33  ;;  %v2985_v61 = vsub.f32 %v9326_v23, %v9475_v33  ;;  %v2986_v41 = vsub.f32 %v9323_v35, %v9475_v33  ;;  %v2993_v58 = vsub.f32 %v9365_v4, %v9475_v33 }
 0x357   : > { %7711 = vrsqrt.f32 %v3014_v24  ;;  %v2994_v55 = vsub.f32 %v9370_v6, %v9475_v33 }
 0x364   : > { %v9510_v43 = vpop.eup %7711 }
 0x365   : > { %v9521_v45 = vmul.f32 %v9510_v43, %v3013_v27  ;;  %v3018_v37 = vmul.f32 %v9510_v43, %v2987_v28  ;;  %v3019_v5 = vmul.f32 %v9510_v43, %v2988_v30  ;;  %v3020_v36 = vmul.f32 %v9510_v43, %v2989_v11  ;;  %v7659_v30 = vld [vmem:[%s10810_s2 + $0x170] sm:$0xff]  }
 0x366   : > { %v3021_v29 = vmul.f32 %v9510_v43, %v2990_v21  ;;  %v3022_v0 = vmul.f32 %v9510_v43, %v2991_v47  ;;  %v3023_v23 = vmul.f32 %v9510_v43, %v2992_v7  ;;  %v3016_v35 = vmul.f32 %v9510_v43, %v2985_v61 }
 0x367   : > { %v3047_v60 = vmax.f32 %v3018_v37, 0.0  ;;  %v3048_v16 = vmax.f32 %v3019_v5, 0.0  ;;  %v3049_v4 = vmax.f32 %v3020_v36, 0.0  ;;  %v3017_v8 = vmul.f32 %v9510_v43, %v2986_v41 }
 0x368   : > { %v3050_v12 = vmax.f32 %v3021_v29, 0.0  ;;  %v3051_v15 = vmax.f32 %v3022_v0, 0.0  ;;  %v3052_v13 = vmax.f32 %v3023_v23, 0.0  ;;  %v3045_v14 = vmax.f32 %v3016_v35, 0.0 }
 0x369   : > { %v9533_v38 = vpack.c.bf16 %v3048_v16, %v3047_v60  ;;  %v3024_v39 = vmul.f32 %v9510_v43, %v2993_v58  ;;  %v2995_v27 = vsub.f32 %v9380_v31, %v9475_v33  ;;  %v3046_v28 = vmax.f32 %v3017_v8, 0.0 }
 0x36a   : > { %v9538_v52 = vpack.c.bf16 %v3050_v12, %v3049_v4  ;;  %v9540_v24 = vpack.c.bf16 %v3052_v13, %v3051_v15  ;;  %v3025_v6 = vmul.f32 %v9510_v43, %v2994_v55  ;;  %v2996_v47 = vsub.f32 %v9386_v19, %v9475_v33 }
 0x36b   : > { %7312 = vmatprep.mubr.bf16.mxu0 %v9533_v38  ;;  %v3130_v11 = vshll.u32 %v9533_v38, 16  ;;  %v3053_v21 = vmax.f32 %v3024_v39, 0.0  ;;  %v3026_v31 = vmul.f32 %v9510_v43, %v2995_v27  ;;  %v9552_v7 = vpack.c.bf16 %v3046_v28, %v3045_v14 }
 0x36c   : > { %7313 = vmatmul.mubr.bf16.vlgmr.msra.gmra.mxu0 %v9538_v52  ;;  %v3134_v61 = vshrl.u32 %v9533_v38, 16  ;;  %v3138_v41 = vshll.u32 %v9538_v52, 16  ;;  %v2997_v58 = vsub.f32 %v9391_v40, %v9475_v33  ;;  %v3054_v5 = vmax.f32 %v3025_v6, 0.0  ;;  %v7660_v40 = vld [vmem:[%s10810_s2 + $0x168] sm:$0xff]  }
 0x36d   : > { %7316 = vmatprep.mubr.bf16.mxu0 %v9540_v24  ;;  %v3132_v37 = vrot.slane %v3130_v11, 1  ;;  %v3027_v36 = vmul.f32 %v9510_v43, %v2996_v47  ;;  %v3055_v19 = vmax.f32 %v3026_v31, 0.0  ;;  %7377 = vmatpush3.bf16.msra.mxu0 %v9375_v50  ;;  %v3125_v29 = vshll.u32 %v9552_v7, 16 }
 0x36e   : > { %v3140_v0 = vrot.slane %v3138_v41, 1  ;;  %v3142_v23 = vshrl.u32 %v9538_v52, 16  ;;  %v2998_v35 = vsub.f32 %v9396_v1, %v9475_v33  ;;  %7378 = vmatprep.subr.bf16.mxu0 %v7659_v30  ;;  %v3146_v16 = vshll.u32 %v9540_v24, 16 }
 0x36f   : > { %v3136_v60 = vor.u32 %v3134_v61, %v3132_v37  ;;  %v9569_v4 = vpack.c.bf16 %v3054_v5, %v3053_v21  ;;  %v3056_v55 = vmax.f32 %v3027_v36, 0.0  ;;  %v3123_v50 = vshrl.u32 %v9552_v7, 16 }
 0x370   : > { %v3127_v12 = vrot.slane %v3125_v29, 1  ;;  %v3028_v15 = vmul.f32 %v9510_v43, %v2997_v58  ;;  %v3029_v13 = vmul.f32 %v9510_v43, %v2998_v35  ;;  %v3144_v8 = vor.u32 %v3142_v23, %v3140_v0  ;;  %v7662_v58 = vld [vmem:[%s10810_s2 + $0x160] sm:$0xff]  }
 0x371   : > { %v9574_v1 = vpack.c.bf16 %v3056_v55, %v3055_v19  ;;  %v3154_v14 = vshll.u32 %v9569_v4, 16  ;;  %v2999_v39 = vsub.f32 %v9401_v22, %v9475_v33  ;;  %7379 = vmatpush3.bf16.msra.mxu0 %v7659_v30  ;;  %v3000_v6 = vsub.f32 %v9406_v54, %v9475_v33  ;;  %v7656_v22 = vld [vmem:[%s10810_s2 + $0x30] sm:$0xff]   ;;  %v7664_v55 = vld [vmem:[%s10810_s2 + $0x158] sm:$0xff]  }
 0x372   : > { %v3128_v27 = vor.u32 %v3127_v12, %v3123_v50  ;;  %v3057_v28 = vmax.f32 %v3028_v15, 0.0  ;;  %v3001_v11 = vsub.f32 %v9411_v63, %v9475_v33  ;;  %7380 = vmatprep.subr.bf16.mxu0 %v7660_v40  ;;  %v9584_v21 = vsel %vm363_vm2, %v3136_v60, %v3140_v0 }
 0x373   : > { %v3148_v47 = vrot.slane %v3146_v16, 1  ;;  %v3058_v31 = vmax.f32 %v3029_v13, 0.0  ;;  %v3030_v61 = vmul.f32 %v9510_v43, %v2999_v39  ;;  %v3031_v54 = vmul.f32 %v9510_v43, %v3000_v6 }
 0x374   : > { %v3133_v41 = vsel %vm363_vm2, %v3128_v27, %v3132_v37  ;;  %7317 = vmatmul.mubr.bf16.gmra.mxu0 %v9569_v4  ;;  %v3002_v63 = vsub.f32 %v9418_v26, %v9475_v33  ;;  %v3032_v30 = vmul.f32 %v9510_v43, %v3001_v11  ;;  %v3150_v5 = vshrl.u32 %v9540_v24, 16 }
 0x375   : > { %7192 = vmatprep.mubr.bf16.mxu1 %v3133_v41  ;;  %v9600_v37 = vsel %vm363_vm2, %v3144_v8, %v3148_v47  ;;  %7320 = vmatprep.mubr.bf16.mxu0 %v9574_v1  ;;  %v3156_v36 = vrot.slane %v3154_v14, 1  ;;  %v9604_v19 = vpack.c.bf16 %v3058_v31, %v3057_v28  ;;  %v3059_v26 = vmax.f32 %v3030_v61, 0.0 }
 0x376   : > { %7193 = vmatmul.mubr.bf16.vlgmr.msra.gmra.mxu1 %v9584_v21  ;;  %v3060_v29 = vmax.f32 %v3031_v54, 0.0  ;;  %v3033_v0 = vmul.f32 %v9510_v43, %v3002_v63  ;;  %v3061_v23 = vmax.f32 %v3032_v30, 0.0  ;;  %7381 = vmatpush3.bf16.msra.mxu0 %v7660_v40  ;;  %v3152_v35 = vor.u32 %v3150_v5, %v3148_v47  ;;  %v7658_v40 = vld [vmem:[%s10810_s2 + $0x28] sm:$0xff]   ;;  %v7663_v54 = vld [vmem:[%s10810_s2 + $0x18] sm:$0xff]  }
 0x377   : > { %7196 = vmatprep.mubr.bf16.mxu1 %v9600_v37  ;;  %7217 = vmatpush3.bf16.msra.mxu1 %v9348_v56  ;;  %v3158_v60 = vshrl.u32 %v9569_v4, 16  ;;  %v3162_v16 = vshll.u32 %v9574_v1, 16  ;;  %v3034_v56 = vmul.f32 %v9510_v43, %v3003_v20  ;;  %v3035_v15 = vmul.f32 %v9510_v43, %v3004_v18 }
 0x378   : > { %7218 = vmatprep.subr.bf16.mxu1 %v7656_v22  ;;  %v9615_v50 = vpack.c.bf16 %v3060_v29, %v3059_v26  ;;  %v3062_v12 = vmax.f32 %v3033_v0, 0.0  ;;  %7382 = vmatprep.subr.bf16.mxu0 %v7662_v58  ;;  %v3036_v8 = vmul.f32 %v9510_v43, %v3005_v53  ;;  %v3037_v14 = vmul.f32 %v9510_v43, %v3006_v3  ;;  %v7666_v29 = vld [vmem:[%s10810_s2 + $0x10] sm:$0xff]   ;;  %v7669_v0 = vld [vmem:[%s10810_s2 + $0x140] sm:$0xff]  }
 0x379   : > { %v3160_v13 = vor.u32 %v3158_v60, %v3156_v36  ;;  %v3038_v46 = vmul.f32 %v9510_v43, %v3007_v59  ;;  %v3170_v17 = vshll.u32 %v9604_v19, 16  ;;  %v3063_v18 = vmax.f32 %v3034_v56, 0.0  ;;  %v7665_v59 = vld [vmem:[%s10810_s2 + $0x150] sm:$0xff]  }
 0x37a   : > { %v9641_v20 = vpack.c.bf16 %v3062_v12, %v3061_v23  ;;  %v3064_v39 = vmax.f32 %v3035_v15, 0.0  ;;  %7383 = vmatpush3.bf16.msra.mxu0 %v7662_v58  ;;  %v3065_v57 = vmax.f32 %v3036_v8, 0.0  ;;  %v9644_v53 = vsel %vm363_vm2, %v3152_v35, %v3156_v36  ;;  %v7668_v15 = vld [vmem:[%s10810_s2 + $0x8] sm:$0xff]  }
 0x37b   : > { %7219 = vmatpush3.bf16.msra.mxu1 %v7656_v22  ;;  %7384 = vmatprep.subr.bf16.mxu0 %v7664_v55  ;;  %v3164_v2 = vrot.slane %v3162_v16, 1  ;;  %v3066_v27 = vmax.f32 %v3037_v14, 0.0  ;;  %v3039_v28 = vmul.f32 %v9510_v43, %v3008_v51  ;;  %v3067_v6 = vmax.f32 %v3038_v46, 0.0 }
 0x37c   : > { %7321 = vmatmul.mubr.bf16.gmra.mxu0 %v9604_v19  ;;  %7220 = vmatprep.subr.bf16.mxu1 %v7658_v40  ;;  %v9650_v3 = vpack.c.bf16 %v3064_v39, %v3063_v18  ;;  %v3040_v11 = vmul.f32 %v9510_v43, %v3009_v49  ;;  %v3172_v31 = vrot.slane %v3170_v17, 1  ;;  %v3166_v9 = vshrl.u32 %v9574_v1, 16  ;;  %v7667_v49 = vld [vmem:[%s10810_s2 + $0x148] sm:$0xff]  }
 0x37d   : > { %7324 = vmatprep.mubr.bf16.mxu0 %v9615_v50  ;;  %v9666_v47 = vsel %vm363_vm2, %v3160_v13, %v3164_v2  ;;  %v9670_v61 = vpack.c.bf16 %v3066_v27, %v3065_v57  ;;  %v3068_v51 = vmax.f32 %v3039_v28, 0.0  ;;  %v3041_v32 = vmul.f32 %v9510_v43, %v3010_v10 }
 0x37e   : > { %7197 = vmatmul.mubr.bf16.gmra.mxu1 %v9644_v53  ;;  %7385 = vmatpush3.bf16.msra.mxu0 %v7664_v55  ;;  %v3174_v41 = vshrl.u32 %v9604_v19, 16  ;;  %v3178_v22 = vshll.u32 %v9615_v50, 16  ;;  %v3069_v63 = vmax.f32 %v3040_v11, 0.0  ;;  %v3168_v30 = vor.u32 %v3166_v9, %v3164_v2 }
 0x37f   : > { %7200 = vmatprep.mubr.bf16.mxu1 %v9666_v47  ;;  %7221 = vmatpush3.bf16.msra.mxu1 %v7658_v40  ;;  %v9684_v58 = vpack.c.bf16 %v3068_v51, %v3067_v6  ;;  %v3070_v44 = vmax.f32 %v3041_v32, 0.0  ;;  %v3186_v5 = vshll.u32 %v9641_v20, 16  ;;  %v3073_v16 = vmax.f32 %v9521_v45, 0.0  ;;  %v9710_v40 = vld [vmem:[%s10810_s2 + $0x1f8] sm:$0xff]  }
 0x380   : > { %7222 = vmatprep.subr.bf16.mxu1 %v7661_v34  ;;  %7386 = vmatprep.subr.bf16.mxu0 %v7665_v59  ;;  %v3176_v10 = vor.u32 %v3174_v41, %v3172_v31  ;;  %v3180_v26 = vrot.slane %v3178_v22, 1  ;;  %v9697_v23 = vsel %vm363_vm2, %v3168_v30, %v3172_v31  ;;  %v3182_v55 = vshrl.u32 %v9615_v50, 16  ;;  %v7671_v31 = vld [vmem:[%s10810_s2 + $0xb8] sm:$0xff]  }
 0x381   : > { %v9687_v36 = vpack.c.bf16 %v3070_v44, %v3069_v63  ;;  %v3188_v60 = vrot.slane %v3186_v5, 1  ;;  %v3190_v12 = vshrl.u32 %v9641_v20, 16  ;;  %v3194_v56 = vshll.u32 %v9650_v3, 16 }
 0x382   : > { %7387 = vmatpush3.bf16.msra.mxu0 %v7665_v59  ;;  %v9702_v35 = vsel %vm363_vm2, %v3176_v10, %v3180_v26  ;;  %v3184_v45 = vor.u32 %v3182_v55, %v3180_v26  ;;  %v3619_v13 = vrot.slane %v9533_v38, 1  ;;  %v3202_v14 = vshll.u32 %v9670_v61, 16 }
 0x383   : > { %7223 = vmatpush3.bf16.msra.mxu1 %v7661_v34  ;;  %7388 = vmatprep.subr.bf16.mxu0 %v7667_v49  ;;  %v3192_v8 = vor.u32 %v3190_v12, %v3188_v60  ;;  %v3042_v46 = vmul.f32 %v9510_v43, %v3011_v42  ;;  %v9723_v17 = vpack.c.bf16 %v3073_v16, %v3073_v16  ;;  %v3618_v39 = vrot.slane %v9552_v7, 1  ;;  %v7676_v12 = vld [vmem:[%s10810_s2 + $0x1e8] sm:$0xff]  }
 0x384   : > { %7325 = vmatmul.mubr.bf16.gmra.mxu0 %v9641_v20  ;;  %7224 = vmatprep.subr.bf16.mxu1 %v7663_v54  ;;  %v3043_v18 = vmul.f32 %v9510_v43, %v3012_v62  ;;  %v3196_v57 = vrot.slane %v3194_v56, 1  ;;  %v9736_v2 = vsel %vm363_vm2, %v3184_v45, %v3188_v60  ;;  %v3204_v62 = vrot.slane %v3202_v14, 1  ;;  %v7678_v45 = vld [vmem:[%s10810_s2 + $0x1e0] sm:$0xff]  }
 0x385   : > { %7328 = vmatprep.mubr.bf16.mxu0 %v9650_v3  ;;  %v3071_v42 = vmax.f32 %v3042_v46, 0.0  ;;  %v9740_v25 = vsel %vm930_vm3, %v3618_v39, %v3619_v13  ;;  %v3198_v43 = vshrl.u32 %v9650_v3, 16  ;;  %v4986_v27 = vrot.slane %v9723_v17, 1 }
 0x386   : > { %7201 = vmatmul.mubr.bf16.gmra.mxu1 %v9697_v23  ;;  %7389 = vmatpush3.bf16.msra.mxu0 %v7667_v49  ;;  %v3072_v34 = vmax.f32 %v3043_v18, 0.0  ;;  %v9744_v33 = vsel %vm363_vm2, %v3192_v8, %v3196_v57  ;;  %v3206_v28 = vshrl.u32 %v9670_v61, 16  ;;  %v3210_v6 = vshll.u32 %v9684_v58, 16  ;;  %v7680_v8 = vld [vmem:[%s10810_s2 + $0x1d8] sm:$0xff]   ;;  %v7674_v18 = vld [vmem:[%s10810_s2 + $0xa8] sm:$0xff]  }
 0x387   : > { %7204 = vmatprep.mubr.bf16.mxu1 %v9702_v35  ;;  %7225 = vmatpush3.bf16.msra.mxu1 %v7663_v54  ;;  %v3621_v11 = vrot.slane %v9538_v52, 1  ;;  %v3200_v9 = vor.u32 %v3198_v43, %v3196_v57  ;;  %v3214_v30 = vshrl.u32 %v9684_v58, 16  ;;  %v3218_v44 = vshll.u32 %v9687_v36, 16  ;;  %v7679_v43 = vld [vmem:[%s10810_s2 + $0x98] sm:$0xff]  }
 0x388   : > { %7226 = vmatprep.subr.bf16.mxu1 %v7666_v29  ;;  %7390 = vmatprep.subr.bf16.mxu0 %v7669_v0  ;;  %v9748_v59 = vpack.c.bf16 %v3072_v34, %v3071_v42  ;;  %v3208_v32 = vor.u32 %v3206_v28, %v3204_v62  ;;  %v3212_v41 = vrot.slane %v3210_v6, 1  ;;  %v3623_v10 = vrot.slane %v9540_v24, 1  ;;  %v7683_v42 = vld [vmem:[%s10810_s2 + $0x1c8] sm:$0xff]  }
 0x389   : > { %v9765_v22 = vsel %vm930_vm3, %v3619_v13, %v3621_v11  ;;  %v9768_v54 = vsel %vm363_vm2, %v3200_v9, %v3204_v62  ;;  %v3625_v5 = vrot.slane %v9569_v4, 1  ;;  %v3627_v56 = vrot.slane %v9574_v1, 1 }
 0x38a   : > { %7391 = vmatpush3.bf16.msra.mxu0 %v7669_v0  ;;  %v4319_v51 = vrot.slane %v9748_v59, 1  ;;  %v9773_v63 = vsel %vm363_vm2, %v3208_v32, %v3212_v41  ;;  %v3216_v26 = vor.u32 %v3214_v30, %v3212_v41  ;;  %v9783_v0 = vrot.slane %v3218_v44, 1  ;;  %v7684_v41 = vld [vmem:[%s10810_s2 + $0x88] sm:$0xff]  }
 0x38b   : > { %7227 = vmatpush3.bf16.msra.mxu1 %v7666_v29  ;;  %7456 = vmatprep.subr.bf16.mxu0 %v9710_v40  ;;  %v7675_v29 = vld [vmem:[%s10810_s2 + $0x1f0] sm:$0xff]   ;;  %v9786_v60 = vsel %vm930_vm3, %v3621_v11, %v3623_v10  ;;  %v9790_v16 = vsel %vm930_vm3, %v3623_v10, %v3625_v5  ;;  %v3631_v14 = vrot.slane %v9615_v50, 1  ;;  %v3633_v46 = vrot.slane %v9641_v20, 1  ;;  %v7686_v10 = vld [vmem:[%s10810_s2 + $0x80] sm:$0xff]  }
 0x38c   : > { %7329 = vmatmul.mubr.bf16.gmra.mxu0 %v9670_v61  ;;  %7228 = vmatprep.subr.bf16.mxu1 %v7668_v15  ;;  %v9761_v49 = vsel %vm930_vm3, %v4319_v51, %v4986_v27  ;;  %v9794_v55 = vsel %vm363_vm2, %v3216_v26, %v9783_v0  ;;  %v3635_v34 = vrot.slane %v9650_v3, 1  ;;  %v3637_v62 = vrot.slane %v9670_v61, 1  ;;  %v7685_v27 = vld [vmem:[%s10810_s2 + $0x1c0] sm:$0xff]   ;;  %v7682_v11 = vld [vmem:[%s10810_s2 + $0x90] sm:$0xff]  }
 0x38d   : > { %7332 = vmatprep.mubr.bf16.mxu0 %v9684_v58  ;;  %v9837_v57 = vsel %vm930_vm3, %v3631_v14, %v3633_v46  ;;  %v3639_v9 = vrot.slane %v9684_v58, 1  ;;  %v3641_v32 = vrot.slane %v9687_v36, 1 }
 0x38e   : > { %7205 = vmatmul.mubr.bf16.gmra.mxu1 %v9736_v2  ;;  %v9857_v28 = vsel %vm930_vm3, %v3633_v46, %v3635_v34  ;;  %v9861_v6 = vsel %vm930_vm3, %v3635_v34, %v3637_v62  ;;  %v7698_v46 = vld [vmem:[%s10810_s2 + $0x110] sm:$0xff]  }
 0x38f   : > { %7208 = vmatprep.mubr.bf16.mxu1 %v9744_v33  ;;  %7229 = vmatpush3.bf16.msra.mxu1 %v7668_v15  ;;  %v3629_v15 = vrot.slane %v9604_v19, 1  ;;  %v9881_v30 = vsel %vm930_vm3, %v3637_v62, %v3639_v9  ;;  %v9885_v44 = vsel %vm930_vm3, %v3639_v9, %v3641_v32  ;;  %v9899_v26 = vsel %vm930_vm3, %v3641_v32, %v4319_v51  ;;  %v9918_v51 = vld [vmem:[%s10810_s2 + $0x228] sm:$0xff]   ;;  %v7703_v9 = vld [vmem:[%s10810_s2 + $0x1b8] sm:$0xff]  }
 0x390   : > { %7230 = vmatprep.subr.bf16.mxu1 %v7670_v48 }
 0x391   : > { %v9813_v13 = vsel %vm930_vm3, %v3627_v56, %v3629_v15  ;;  %v9833_v39 = vsel %vm930_vm3, %v3629_v15, %v3631_v14  ;;  %v7690_v15 = vld [vmem:[%s10810_s2 + $0x128] sm:$0xff]   ;;  %v9974_v14 = vld [vmem:[%s10810_s2 + $0x200] sm:$0xff]  }
 0x393   : > { %7231 = vmatpush3.bf16.msra.mxu1 %v7670_v48  ;;  %v7677_v48 = vld [vmem:[%s10810_s2 + $0xa0] sm:$0xff]  }
 0x394   : > { %7333 = vmatmul.mubr.bf16.gmra.mxu0 %v9687_v36  ;;  %7256 = vmatprep.subr.bf16.mxu1 %v7671_v31 }
 0x395   : > { %7392 = vmatprep.mubr.bf16.mxu0 %v9765_v22 }
 0x396   : > { %7209 = vmatmul.mubr.bf16.gmra.mxu1 %v9768_v54 }
 0x397   : > { %7212 = vmatprep.mubr.bf16.mxu1 %v9773_v63 }
 0x39c   : > { %7393 = vmatmul.mubr.bf16.vlgmr.msra.gmra.mxu0 %v9786_v60 }
 0x39d   : > { %7396 = vmatprep.mubr.bf16.mxu0 %v9790_v16  ;;  %7457 = vmatpush3.bf16.msra.mxu0 %v9710_v40  ;;  %v9809_v40 = vsel %vm930_vm3, %v3625_v5, %v3627_v56  ;;  %v7687_v5 = vld [vmem:[%s10810_s2 + $0x138] sm:$0xff]   ;;  %v7688_v56 = vld [vmem:[%s10810_s2 + $0x130] sm:$0xff]  }
 0x39e   : > { %7213 = vmatmul.mubr.bf16.gmra.mxu1 %v9794_v55  ;;  %7458 = vmatprep.subr.bf16.mxu0 %v7675_v29 }
 0x39f   : > { %7232 = vmatprep.mubr.bf16.mxu1 %v9552_v7  ;;  %v7672_v7 = vld [vmem:[%s10810_s2 + $0xb0] sm:$0xff]  }
 0x3a1   : > { %7459 = vmatpush3.bf16.msra.mxu0 %v7675_v29  ;;  %v9908_v29 = vld [vmem:[%s10810_s2 + $0x230] sm:$0xff]  }
 0x3a2   : > { %7460 = vmatprep.subr.bf16.mxu0 %v7676_v12 }
 0x3a4   : > { %7397 = vmatmul.mubr.bf16.gmra.mxu0 %v9809_v40 }
 0x3a5   : > { %7400 = vmatprep.mubr.bf16.mxu0 %v9813_v13  ;;  %7461 = vmatpush3.bf16.msra.mxu0 %v7676_v12  ;;  %v9926_v12 = vld [vmem:[%s10810_s2 + $0x220] sm:$0xff]  }
 0x3a6   : > { %7233 = vmatmul.mubr.bf16.vlgmr.msra.gmra.mxu1 %v9533_v38  ;;  %7462 = vmatprep.subr.bf16.mxu0 %v7678_v45  ;;  %v7681_v38 = vld [vmem:[%s10810_s2 + $0x1d0] sm:$0xff]  }
 0x3a7   : > { %7236 = vmatprep.mubr.bf16.mxu1 %v9538_v52  ;;  %7257 = vmatpush3.bf16.msra.mxu1 %v7671_v31  ;;  %v9871_v31 = vld [vmem:[%s10810_s2 + $0x238] sm:$0xff]  }
 0x3a8   : > { %7258 = vmatprep.subr.bf16.mxu1 %v7672_v7 }
 0x3a9   : > { %7463 = vmatpush3.bf16.msra.mxu0 %v7678_v45  ;;  %v7693_v45 = vld [vmem:[%s10810_s2 + $0x120] sm:$0xff]  }
 0x3aa   : > { %7464 = vmatprep.subr.bf16.mxu0 %v7680_v8 }
 0x3ab   : > { %7259 = vmatpush3.bf16.msra.mxu1 %v7672_v7  ;;  %v9963_v7 = vld [vmem:[%s10810_s2 + $0x208] sm:$0xff]  }
 0x3ac   : > { %7401 = vmatmul.mubr.bf16.gmra.mxu0 %v9833_v39  ;;  %7260 = vmatprep.subr.bf16.mxu1 %v7674_v18 }
 0x3ad   : > { %7404 = vmatprep.mubr.bf16.mxu0 %v9837_v57  ;;  %7465 = vmatpush3.bf16.msra.mxu0 %v7680_v8  ;;  %v7695_v8 = vld [vmem:[%s10810_s2 + $0x118] sm:$0xff]  }
 0x3ae   : > { %7237 = vmatmul.mubr.bf16.gmra.mxu1 %v9540_v24  ;;  %7466 = vmatprep.subr.bf16.mxu0 %v7681_v38 }
 0x3af   : > { %7240 = vmatprep.mubr.bf16.mxu1 %v9569_v4  ;;  %7261 = vmatpush3.bf16.msra.mxu1 %v7674_v18  ;;  %v4091_v18 = vshrl.u32 %v9687_v36, 16 }
 0x3b0   : > { %7262 = vmatprep.subr.bf16.mxu1 %v7677_v48 }
 0x3b1   : > { %7467 = vmatpush3.bf16.msra.mxu0 %v7681_v38  ;;  %v4095_v38 = vshll.u32 %v9748_v59, 16 }
 0x3b2   : > { %7468 = vmatprep.subr.bf16.mxu0 %v7683_v42 }
 0x3b3   : > { %7263 = vmatpush3.bf16.msra.mxu1 %v7677_v48  ;;  %v4093_v48 = vor.u32 %v4091_v18, %v9783_v0  ;;  %v4097_v34 = vrot.slane %v4095_v38, 1  ;;  %v4758_v0 = vshrl.u32 %v9748_v59, 16 }
 0x3b4   : > { %7405 = vmatmul.mubr.bf16.gmra.mxu0 %v9857_v28  ;;  %7264 = vmatprep.subr.bf16.mxu1 %v7679_v43 }
 0x3b5   : > { %7408 = vmatprep.mubr.bf16.mxu0 %v9861_v6  ;;  %7469 = vmatpush3.bf16.msra.mxu0 %v7683_v42  ;;  %v7700_v42 = vld [vmem:[%s10810_s2 + $0x108] sm:$0xff]   ;;  %v4098_v62 = vsel %vm363_vm2, %v4093_v48, %v4097_v34 }
 0x3b6   : > { %7241 = vmatmul.mubr.bf16.gmra.mxu1 %v9574_v1  ;;  %7470 = vmatprep.subr.bf16.mxu0 %v7685_v27 }
 0x3b7   : > { %7244 = vmatprep.mubr.bf16.mxu1 %v9604_v19  ;;  %7265 = vmatpush3.bf16.msra.mxu1 %v7679_v43  ;;  %v7702_v43 = vld [vmem:[%s10810_s2 + $0x100] sm:$0xff]  }
 0x3b8   : > { %7266 = vmatprep.subr.bf16.mxu1 %v7682_v11 }
 0x3b9   : > { %7471 = vmatpush3.bf16.msra.mxu0 %v7685_v27  ;;  %v4762_v27 = vshll.u32 %v9723_v17, 16  ;;  %v7704_v17 = vld [vmem:[%s10810_s2 + $0x1b0] sm:$0xff]  }
 0x3ba   : > { %7496 = vmatprep.subr.bf16.mxu0 %v9871_v31 }
 0x3bb   : > { %7267 = vmatpush3.bf16.msra.mxu1 %v7682_v11  ;;  %v4760_v11 = vor.u32 %v4758_v0, %v4097_v34  ;;  %v4764_v32 = vrot.slane %v4762_v27, 1 }
 0x3bc   : > { %7409 = vmatmul.mubr.bf16.gmra.mxu0 %v9881_v30  ;;  %7268 = vmatprep.subr.bf16.mxu1 %v7684_v41 }
 0x3bd   : > { %7412 = vmatprep.mubr.bf16.mxu0 %v9885_v44 }
 0x3be   : > { %7245 = vmatmul.mubr.bf16.gmra.mxu1 %v9615_v50 }
 0x3bf   : > { %7248 = vmatprep.mubr.bf16.mxu1 %v9641_v20  ;;  %7269 = vmatpush3.bf16.msra.mxu1 %v7684_v41  ;;  %v4765_v41 = vsel %vm363_vm2, %v4760_v11, %v4764_v32 }
 0x3c0   : > { %7270 = vmatprep.subr.bf16.mxu1 %v7686_v10 }
 0x3c3   : > { %7271 = vmatpush3.bf16.msra.mxu1 %v7686_v10 }
 0x3c4   : > { %7413 = vmatmul.mubr.bf16.gmra.mxu0 %v9899_v26  ;;  %7336 = vmatprep.subr.bf16.mxu1 %v7687_v5 }
 0x3c5   : > { %7472 = vmatprep.mubr.bf16.mxu0 %v9600_v37 }
 0x3c6   : > { %7249 = vmatmul.mubr.bf16.gmra.mxu1 %v9650_v3 }
 0x3c7   : > { %7252 = vmatprep.mubr.bf16.mxu1 %v9670_v61 }
 0x3cc   : > { %7473 = vmatmul.mubr.bf16.vlgmr.msra.gmra.mxu0 %v9644_v53 }
 0x3cd   : > { %7476 = vmatprep.mubr.bf16.mxu0 %v9666_v47  ;;  %7497 = vmatpush3.bf16.msra.mxu0 %v9871_v31 }
 0x3ce   : > { %7253 = vmatmul.mubr.bf16.gmra.mxu1 %v9684_v58  ;;  %7498 = vmatprep.subr.bf16.mxu0 %v9908_v29 }
 0x3cf   : > { %7272 = vmatprep.mubr.bf16.mxu1 %v9740_v25  ;;  %v9939_v25 = vld [vmem:[%s10810_s2 + $0x218] sm:$0xff]  }
 0x3d1   : > { %7499 = vmatpush3.bf16.msra.mxu0 %v9908_v29 }
 0x3d2   : > { %7500 = vmatprep.subr.bf16.mxu0 %v9918_v51 }
 0x3d4   : > { %7477 = vmatmul.mubr.bf16.gmra.mxu0 %v9697_v23 }
 0x3d5   : > { %7480 = vmatprep.mubr.bf16.mxu0 %v9702_v35  ;;  %7501 = vmatpush3.bf16.msra.mxu0 %v9918_v51 }
 0x3d6   : > { %7273 = vmatmul.mubr.bf16.vlgmr.msra.gmra.mxu1 %v9765_v22  ;;  %7502 = vmatprep.subr.bf16.mxu0 %v9926_v12  ;;  %v9950_v22 = vld [vmem:[%s10810_s2 + $0x210] sm:$0xff]  }
 0x3d7   : > { %7276 = vmatprep.mubr.bf16.mxu1 %v9786_v60  ;;  %7337 = vmatpush3.bf16.msra.mxu1 %v7687_v5 }
 0x3d8   : > { %7338 = vmatprep.subr.bf16.mxu1 %v7688_v56 }
 0x3d9   : > { %7503 = vmatpush3.bf16.msra.mxu0 %v9926_v12 }
 0x3da   : > { %7504 = vmatprep.subr.bf16.mxu0 %v9939_v25 }
 0x3db   : > { %7339 = vmatpush3.bf16.msra.mxu1 %v7688_v56 }
 0x3dc   : > { %7481 = vmatmul.mubr.bf16.gmra.mxu0 %v9736_v2  ;;  %7340 = vmatprep.subr.bf16.mxu1 %v7690_v15 }
 0x3dd   : > { %7484 = vmatprep.mubr.bf16.mxu0 %v9744_v33  ;;  %7505 = vmatpush3.bf16.msra.mxu0 %v9939_v25 }
 0x3de   : > { %7277 = vmatmul.mubr.bf16.gmra.mxu1 %v9790_v16  ;;  %7506 = vmatprep.subr.bf16.mxu0 %v9950_v22 }
 0x3df   : > { %7280 = vmatprep.mubr.bf16.mxu1 %v9809_v40  ;;  %7341 = vmatpush3.bf16.msra.mxu1 %v7690_v15 }
 0x3e0   : > { %7342 = vmatprep.subr.bf16.mxu1 %v7693_v45 }
 0x3e1   : > { %7507 = vmatpush3.bf16.msra.mxu0 %v9950_v22 }
 0x3e2   : > { %7508 = vmatprep.subr.bf16.mxu0 %v9963_v7 }
 0x3e3   : > { %7343 = vmatpush3.bf16.msra.mxu1 %v7693_v45 }
 0x3e4   : > { %7485 = vmatmul.mubr.bf16.gmra.mxu0 %v9768_v54  ;;  %7344 = vmatprep.subr.bf16.mxu1 %v7695_v8 }
 0x3e5   : > { %7488 = vmatprep.mubr.bf16.mxu0 %v9773_v63  ;;  %7509 = vmatpush3.bf16.msra.mxu0 %v9963_v7 }
 0x3e6   : > { %7281 = vmatmul.mubr.bf16.gmra.mxu1 %v9813_v13  ;;  %7510 = vmatprep.subr.bf16.mxu0 %v9974_v14 }
 0x3e7   : > { %7284 = vmatprep.mubr.bf16.mxu1 %v9833_v39  ;;  %7345 = vmatpush3.bf16.msra.mxu1 %v7695_v8 }
 0x3e8   : > { %7346 = vmatprep.subr.bf16.mxu1 %v7698_v46 }
 0x3e9   : > { %7511 = vmatpush3.bf16.msra.mxu0 %v9974_v14 }
 0x3eb   : > { %7347 = vmatpush3.bf16.msra.mxu1 %v7698_v46 }
 0x3ec   : > { %7489 = vmatmul.mubr.bf16.gmra.mxu0 %v9794_v55  ;;  %7348 = vmatprep.subr.bf16.mxu1 %v7700_v42 }
 0x3ed   : > { %7492 = vmatprep.mubr.bf16.mxu0 %v4098_v62 }
 0x3ee   : > { %7285 = vmatmul.mubr.bf16.gmra.mxu1 %v9837_v57 }
 0x3ef   : > { %7288 = vmatprep.mubr.bf16.mxu1 %v9857_v28  ;;  %7349 = vmatpush3.bf16.msra.mxu1 %v7700_v42 }
 0x3f0   : > { %7350 = vmatprep.subr.bf16.mxu1 %v7702_v43 }
 0x3f3   : > { %7351 = vmatpush3.bf16.msra.mxu1 %v7702_v43 }
 0x3f4   : > { %7493 = vmatmul.mubr.bf16.gmra.mxu0 %v4765_v41  ;;  %7416 = vmatprep.subr.bf16.mxu1 %v7703_v9 }
 0x3f5   : > { %7512 = vmatprep.mubr.bf16.mxu0 %v9786_v60  ;;  %v7705_v60 = vld [vmem:[%s10810_s2 + $0x1a8] sm:$0xff]  }
 0x3f6   : > { %7289 = vmatmul.mubr.bf16.gmra.mxu1 %v9861_v6 }
 0x3f7   : > { %7292 = vmatprep.mubr.bf16.mxu1 %v9881_v30 }
 0x3fc   : > { %7513 = vmatmul.mubr.bf16.vlgmr.msra.gmra.mxu0 %v9790_v16 }
 0x3fe   : > { %7293 = vmatmul.mubr.bf16.gmra.mxu1 %v9885_v44 }
 0x3ff   : > { %7352 = vmatprep.mubr.bf16.mxu1 %v9584_v21  ;;  %v7706_v21 = vld [vmem:[%s10810_s2 + $0x1a0] sm:$0xff]  }
 0x406   : > { %7353 = vmatmul.mubr.bf16.vlgmr.msra.gmra.mxu1 %v9600_v37  ;;  %v7707_v37 = vld [vmem:[%s10810_s2 + $0x198] sm:$0xff]  }
 0x407   : > { %7356 = vmatprep.mubr.bf16.mxu1 %v9644_v53  ;;  %7417 = vmatpush3.bf16.msra.mxu1 %v7703_v9  ;;  %v7708_v53 = vld [vmem:[%s10810_s2 + $0x190] sm:$0xff]  }
 0x408   : > { %7418 = vmatprep.subr.bf16.mxu1 %v7704_v17 }
 0x40b   : > { %7419 = vmatpush3.bf16.msra.mxu1 %v7704_v17 }
 0x40c   : > { %7420 = vmatprep.subr.bf16.mxu1 %v7705_v60 }
 0x40e   : > { %7357 = vmatmul.mubr.bf16.gmra.mxu1 %v9666_v47  ;;  %v7709_v47 = vld [vmem:[%s10810_s2 + $0x188] sm:$0xff]  }
 0x40f   : > { %7360 = vmatprep.mubr.bf16.mxu1 %v9697_v23  ;;  %7421 = vmatpush3.bf16.msra.mxu1 %v7705_v60  ;;  %v7710_v23 = vld [vmem:[%s10810_s2 + $0x180] sm:$0xff]  }
 0x410   : > { %7422 = vmatprep.subr.bf16.mxu1 %v7706_v21 }
 0x413   : > { %7423 = vmatpush3.bf16.msra.mxu1 %v7706_v21 }
 0x414   : > { %7424 = vmatprep.subr.bf16.mxu1 %v7707_v37 }
 0x416   : > { %7361 = vmatmul.mubr.bf16.gmra.mxu1 %v9702_v35 }
 0x417   : > { %7364 = vmatprep.mubr.bf16.mxu1 %v9736_v2  ;;  %7425 = vmatpush3.bf16.msra.mxu1 %v7707_v37 }
 0x418   : > { %7426 = vmatprep.subr.bf16.mxu1 %v7708_v53 }
 0x41b   : > { %7427 = vmatpush3.bf16.msra.mxu1 %v7708_v53 }
 0x41c   : > { %7428 = vmatprep.subr.bf16.mxu1 %v7709_v47 }
 0x41e   : > { %7365 = vmatmul.mubr.bf16.gmra.mxu1 %v9744_v33 }
 0x41f   : > { %7368 = vmatprep.mubr.bf16.mxu1 %v9768_v54  ;;  %7429 = vmatpush3.bf16.msra.mxu1 %v7709_v47 }
 0x420   : > { %7430 = vmatprep.subr.bf16.mxu1 %v7710_v23 }
 0x423   : > { %7431 = vmatpush3.bf16.msra.mxu1 %v7710_v23 }
 0x424   : > { %7536 = vmatprep.subr.bf16.mxu1 %v9871_v31 }
 0x426   : > { %7369 = vmatmul.mubr.bf16.gmra.mxu1 %v9773_v63 }
 0x427   : > { %7372 = vmatprep.mubr.bf16.mxu1 %v9794_v55 }
 0x42c   : > { %v10043_v35 = vpop.f32.mrf.mxu0 }
 0x42e   : > { %7373 = vmatmul.mubr.bf16.gmra.mxu1 %v4098_v62  ;;  %v10045_v2 = vpop.f32.mrf.mxu0 }
 0x42f   : > { %7432 = vmatprep.mubr.bf16.mxu1 %v9538_v52 }
 0x430   : > { %v10048_v16 = vpop.f32.mrf.mxu0 }
 0x432   : > { %v10050_v33 = vpop.f32.mrf.mxu0 }
 0x434   : > { %v10052_v54 = vpop.f32.mrf.mxu0 }
 0x436   : > { %v10054_v10 = vpop.f32.mrf.mxu1  ;;  %7433 = vmatmul.mubr.bf16.vlgmr.msra.gmra.mxu1 %v9540_v24  ;;  %v10057_v63 = vpop.f32.mrf.mxu0 }
 0x437   : > { %7436 = vmatprep.mubr.bf16.mxu1 %v9569_v4  ;;  %7544 = vmatpush3.bf16.msra.mxu1 %v9871_v31 }
 0x438   : > { %v10061_v55 = vpop.f32.mrf.mxu1  ;;  %v10063_v5 = vpop.f32.mrf.mxu0  ;;  %7537 = vmatprep.subr.bf16.mxu1 %v9908_v29 }
 0x43a   : > { %v10066_v52 = vpop.f32.mrf.mxu1  ;;  %v10068_v56 = vpop.f32.mrf.mxu0 }
 0x43b   : > { %7545 = vmatpush3.bf16.msra.mxu1 %v9908_v29 }
 0x43c   : > { %v10071_v15 = vpop.f32.mrf.mxu1  ;;  %v10073_v24 = vpop.f32.mrf.mxu0  ;;  %7538 = vmatprep.subr.bf16.mxu1 %v9918_v51 }
 0x43e   : > { %v10076_v4 = vpop.f32.mrf.mxu1  ;;  %7437 = vmatmul.mubr.bf16.gmra.mxu1 %v9574_v1  ;;  %v10079_v31 = vpop.f32.mrf.mxu0 }
 0x43f   : > { %7440 = vmatprep.mubr.bf16.mxu1 %v9604_v19  ;;  %7546 = vmatpush3.bf16.msra.mxu1 %v9918_v51 }
 0x440   : > { %v10083_v45 = vpop.f32.mrf.mxu1  ;;  %v10085_v8 = vpop.f32.mrf.mxu0  ;;  %7539 = vmatprep.subr.bf16.mxu1 %v9926_v12 }
 0x442   : > { %v10088_v29 = vpop.f32.mrf.mxu1  ;;  %v10090_v46 = vpop.f32.mrf.mxu0 }
 0x443   : > { %7547 = vmatpush3.bf16.msra.mxu1 %v9926_v12 }
 0x444   : > { %v10093_v18 = vpop.f32.mrf.mxu1  ;;  %v10095_v1 = vpop.f32.mrf.mxu0  ;;  %7540 = vmatprep.subr.bf16.mxu1 %v9939_v25 }
 0x446   : > { %v10098_v19 = vpop.f32.mrf.mxu1  ;;  %7441 = vmatmul.mubr.bf16.gmra.mxu1 %v9615_v50  ;;  %v10101_v51 = vpop.f32.mrf.mxu0 }
 0x447   : > { %7444 = vmatprep.mubr.bf16.mxu1 %v9641_v20  ;;  %7548 = vmatpush3.bf16.msra.mxu1 %v9939_v25 }
 0x448   : > { %v10105_v38 = vpop.f32.mrf.mxu1  ;;  %v10107_v48 = vpop.f32.mrf.mxu0  ;;  %7541 = vmatprep.subr.bf16.mxu1 %v9950_v22 }
 0x44a   : > { %v10110_v12 = vpop.f32.mrf.mxu1  ;;  %v10112_v42 = vpop.f32.mrf.mxu0 }
 0x44b   : > { %7549 = vmatpush3.bf16.msra.mxu1 %v9950_v22 }
 0x44c   : > { %v10115_v34 = vpop.f32.mrf.mxu1  ;;  %v10117_v50 = vpop.f32.mrf.mxu0  ;;  %7542 = vmatprep.subr.bf16.mxu1 %v9963_v7 }
 0x44e   : > { %v10120_v20 = vpop.f32.mrf.mxu1  ;;  %7445 = vmatmul.mubr.bf16.gmra.mxu1 %v9650_v3  ;;  %v10123_v25 = vpop.f32.mrf.mxu0 }
 0x44f   : > { %7448 = vmatprep.mubr.bf16.mxu1 %v9670_v61  ;;  %7550 = vmatpush3.bf16.msra.mxu1 %v9963_v7 }
 0x450   : > { %v10127_v62 = vpop.f32.mrf.mxu1  ;;  %v10129_v43 = vpop.f32.mrf.mxu0  ;;  %7543 = vmatprep.subr.bf16.mxu1 %v9974_v14 }
 0x452   : > { %v10132_v22 = vpop.f32.mrf.mxu1  ;;  %v10134_v0 = vpop.f32.mrf.mxu0 }
 0x453   : > { %7551 = vmatpush3.bf16.msra.mxu1 %v9974_v14 }
 0x454   : > { %v10137_v27 = vpop.f32.mrf.mxu1  ;;  %v10139_v3 = vpop.f32.mrf.mxu0 }
 0x456   : > { %v10141_v11 = vpop.f32.mrf.mxu1  ;;  %7449 = vmatmul.mubr.bf16.gmra.mxu1 %v9684_v58  ;;  %v10144_v61 = vpop.f32.mrf.mxu0 }
 0x457   : > { %7452 = vmatprep.mubr.bf16.mxu1 %v9687_v36 }
 0x458   : > { %v10147_v7 = vpop.f32.mrf.mxu1  ;;  %v10149_v9 = vpop.f32.mrf.mxu0 }
 0x459   : > { %10906 = vst [vmem:[#allocation22_spill] sm:$0xff] %v10149_v9 }
 0x45a   : > { %v10151_v32 = vpop.f32.mrf.mxu1  ;;  %v10153_v41 = vpop.f32.mrf.mxu0 }
 0x45b   : > { %10907 = vst [vmem:[#allocation41_spill] sm:$0xff] %v10153_v41 }
 0x45c   : > { %v10155_v14 = vpop.f32.mrf.mxu1  ;;  %v10157_v17 = vpop.f32.mrf.mxu0 }
 0x45d   : > { %10908 = vst [vmem:[#allocation23_spill] sm:$0xff] %v10157_v17 }
 0x45e   : > { %v10159_v60 = vpop.f32.mrf.mxu1  ;;  %7453 = vmatmul.mubr.bf16.gmra.mxu1 %v9748_v59  ;;  %v10162_v58 = vpop.f32.mrf.mxu0 }
 0x45f   : > { %10909 = vst [vmem:[#allocation42_spill] sm:$0xff] %v10162_v58  ;;  %7516 = vmatprep.mubr.bf16.mxu1 %v9809_v40 }
 0x460   : > { %v10165_v36 = vpop.f32.mrf.mxu1  ;;  %v10167_v21 = vpop.f32.mrf.mxu0 }
 0x461   : > { %10910 = vst [vmem:[#allocation24_spill] sm:$0xff] %v10167_v21 }
 0x462   : > { %v10169_v37 = vpop.f32.mrf.mxu1  ;;  %v10171_v53 = vpop.f32.mrf.mxu0 }
 0x463   : > { %10911 = vst [vmem:[#allocation25_spill] sm:$0xff] %v10171_v53 }
 0x464   : > { %v10173_v47 = vpop.f32.mrf.mxu1  ;;  %v10175_v23 = vpop.f32.mrf.mxu0 }
 0x465   : > { %10912 = vst [vmem:[#allocation26_spill] sm:$0xff] %v10175_v23 }
 0x466   : > { %v7234_v17 = vpop.f32.mrf.mxu1  ;;  %7517 = vmatmul.mubr.bf16.vlgmr.msra.gmra.mxu1 %v9813_v13  ;;  %v10178_v59 = vpop.f32.mrf.mxu0 }
 0x467   : > { %10913 = vst [vmem:[#allocation27_spill] sm:$0xff] %v10178_v59  ;;  %v10181_v58 = vadd.f32 %v7234_v17, %v10054_v10  ;;  %7520 = vmatprep.mubr.bf16.mxu1 %v9833_v39 }
 0x468   : > { %v3493_v40 = vpop.f32.mrf.mxu1  ;;  %v10184_v21 = vpop.f32.mrf.mxu0 }
 0x469   : > { %10914 = vst [vmem:[#allocation28_spill] sm:$0xff] %v10184_v21  ;;  %v10187_v41 = vadd.f32 %v3493_v40, %v10061_v55 }
 0x46a   : > { %v7235_v53 = vpop.f32.mrf.mxu1  ;;  %v10189_v9 = vpop.f32.mrf.mxu0 }
 0x46b   : > { %10915 = vst [vmem:[#allocation29_spill] sm:$0xff] %v10189_v9  ;;  %v10192_v23 = vadd.f32 %v7235_v53, %v10066_v52 }
 0x46c   : > { %v3496_v13 = vpop.f32.mrf.mxu1  ;;  %v10197_v10 = vpop.f32.mrf.mxu0 }
 0x46d   : > { %v10195_v59 = vadd.f32 %v3496_v13, %v10071_v15  ;;  %10916 = vst [vmem:[#allocation30_spill] sm:$0xff] %v10197_v10 }
 0x46e   : > { %v7238_v17 = vpop.f32.mrf.mxu1  ;;  %7521 = vmatmul.mubr.bf16.gmra.mxu1 %v9837_v57  ;;  %v10207_v52 = vpop.f32.mrf.mxu0 }
 0x46f   : > { %v10201_v39 = vadd.f32 %v7238_v17, %v10076_v4  ;;  %7524 = vmatprep.mubr.bf16.mxu1 %v9857_v28  ;;  %10917 = vst [vmem:[#allocation31_spill] sm:$0xff] %v10207_v52 }
 0x470   : > { %v3509_v55 = vpop.f32.mrf.mxu1  ;;  %v10212_v10 = vpop.f32.mrf.mxu0 }
 0x471   : > { %v10205_v40 = vadd.f32 %v3509_v55, %v10083_v45  ;;  %10918 = vst [vmem:[#allocation32_spill] sm:$0xff] %v10212_v10 }
 0x472   : > { %v7239_v53 = vpop.f32.mrf.mxu1  ;;  %v10222_v17 = vpop.f32.mrf.mxu0 }
 0x473   : > { %v10210_v15 = vadd.f32 %v7239_v53, %v10088_v29  ;;  %10919 = vst [vmem:[#allocation33_spill] sm:$0xff] %v10222_v17 }
 0x474   : > { %v3512_v13 = vpop.f32.mrf.mxu1 }
 0x475   : > { %v10215_v57 = vadd.f32 %v3512_v13, %v10093_v18  ;;  %v10230_v13 = vpop.f32.mrf.mxu0 }
 0x476   : > { %v7242_v4 = vpop.f32.mrf.mxu1  ;;  %7525 = vmatmul.mubr.bf16.gmra.mxu1 %v9861_v6  ;;  %10920 = vst [vmem:[#allocation34_spill] sm:$0xff] %v10230_v13 }
 0x477   : > { %v10219_v28 = vadd.f32 %v7242_v4, %v10098_v19  ;;  %7528 = vmatprep.mubr.bf16.mxu1 %v9881_v30 }
 0x478   : > { %v3525_v45 = vpop.f32.mrf.mxu1 }
 0x479   : > { %v10225_v29 = vadd.f32 %v3525_v45, %v10105_v38  ;;  %v10238_v38 = vpop.f32.mrf.mxu0 }
 0x47a   : > { %v7243_v55 = vpop.f32.mrf.mxu1  ;;  %10921 = vst [vmem:[#allocation35_spill] sm:$0xff] %v10238_v38 }
 0x47b   : > { %v10228_v53 = vadd.f32 %v7243_v55, %v10110_v12  ;;  %v10242_v13 = vpop.f32.mrf.mxu0 }
 0x47c   : > { %v3528_v18 = vpop.f32.mrf.mxu1  ;;  %10922 = vst [vmem:[#allocation36_spill] sm:$0xff] %v10242_v13 }
 0x47d   : > { %v10233_v6 = vadd.f32 %v3528_v18, %v10115_v34 }
 0x47e   : > { %v7246_v19 = vpop.f32.mrf.mxu1  ;;  %7529 = vmatmul.mubr.bf16.gmra.mxu1 %v9885_v44 }
 0x47f   : > { %v3550_v30 = vadd.f32 %v7246_v19, %v10120_v20  ;;  %7532 = vmatprep.mubr.bf16.mxu1 %v9899_v26  ;;  %v10247_v26 = vpop.f32.mrf.mxu0 }
 0x480   : > { %v3541_v4 = vpop.f32.mrf.mxu1  ;;  %10923 = vst [vmem:[#allocation37_spill] sm:$0xff] %v10247_v26 }
 0x481   : > { %v3542_v45 = vadd.f32 %v3541_v4, %v10127_v62 }
 0x482   : > { %v7247_v12 = vpop.f32.mrf.mxu1 }
 0x483   : > { %v3553_v55 = vadd.f32 %v7247_v12, %v10132_v22  ;;  %v10251_v22 = vpop.f32.mrf.mxu0 }
 0x484   : > { %v3544_v17 = vpop.f32.mrf.mxu1  ;;  %10924 = vst [vmem:[#allocation38_spill] sm:$0xff] %v10251_v22 }
 0x485   : > { %v3545_v34 = vadd.f32 %v3544_v17, %v10137_v27 }
 0x486   : > { %v7250_v18 = vpop.f32.mrf.mxu1  ;;  %7533 = vmatmul.mubr.bf16.gmra.mxu1 %v9761_v49  ;;  %v10255_v49 = vpop.f32.mrf.mxu0 }
 0x487   : > { %v3566_v44 = vadd.f32 %v7250_v18, %v10141_v11  ;;  %10925 = vst [vmem:[#allocation39_spill] sm:$0xff] %v10255_v49 }
 0x488   : > { %v3557_v20 = vpop.f32.mrf.mxu1 }
 0x489   : > { %v3558_v19 = vadd.f32 %v3557_v20, %v10147_v7  ;;  %v10259_v20 = vpop.f32.mrf.mxu0 }
 0x48a   : > { %v7251_v38 = vpop.f32.mrf.mxu1  ;;  %10926 = vst [vmem:[#allocation40_spill] sm:$0xff] %v10259_v20 }
 0x48b   : > { %v3569_v62 = vadd.f32 %v7251_v38, %v10151_v32 }
 0x48c   : > { %v3560_v4 = vpop.f32.mrf.mxu1 }
 0x48d   : > { %v3561_v12 = vadd.f32 %v3560_v4, %v10155_v14  ;;  %v10263_v4 = vpop.f32.mrf.mxu0 }
 0x48e   : > { %v7254_v13 = vpop.f32.mrf.mxu1  ;;  %10927 = vst [vmem:[#allocation43_spill] sm:$0xff] %v10263_v4 }
 0x48f   : > { %v3582_v27 = vadd.f32 %v7254_v13, %v10159_v60 }
 0x490   : > { %v3573_v17 = vpop.f32.mrf.mxu1 }
 0x491   : > { %v3574_v11 = vadd.f32 %v3573_v17, %v10165_v36  ;;  %v10267_v17 = vpop.f32.mrf.mxu0 }
 0x492   : > { %v7255_v18 = vpop.f32.mrf.mxu1  ;;  %10928 = vst [vmem:[#allocation44_spill] sm:$0xff] %v10267_v17 }
 0x493   : > { %v3585_v26 = vadd.f32 %v7255_v18, %v10169_v37 }
 0x494   : > { %v3576_v7 = vpop.f32.mrf.mxu1 }
 0x495   : > { %v3577_v32 = vadd.f32 %v3576_v7, %v10173_v47  ;;  %v10273_v7 = vpop.f32.mrf.mxu0 }
 0x496   : > { %v7274_v38 = vpop.f32.mrf.mxu1  ;;  %10929 = vst [vmem:[#allocation45_spill] sm:$0xff] %v10273_v7 }
 0x497   : > { %v3834_v22 = vadd.f32 %v7274_v38, %v10181_v58 }
 0x498   : > { %v3737_v14 = vpop.f32.mrf.mxu1 }
 0x499   : > { %v3832_v60 = vadd.f32 %v3737_v14, %v10187_v41  ;;  %v10281_v14 = vpop.f32.mrf.mxu0 }
 0x49a   : > { %v7275_v13 = vpop.f32.mrf.mxu1  ;;  %10930 = vst [vmem:[#allocation46_spill] sm:$0xff] %v10281_v14 }
 0x49b   : > { %v3835_v49 = vadd.f32 %v7275_v13, %v10192_v23 }
 0x49c   : > { %v3740_v36 = vpop.f32.mrf.mxu1 }
 0x49d   : > { %v3833_v37 = vadd.f32 %v3740_v36, %v10195_v59 }
 0x49e   : > { %v7278_v18 = vpop.f32.mrf.mxu1 }
 0x49f   : > { %v10271_v20 = vadd.f32 %v7278_v18, %v10201_v39  ;;  %v10289_v18 = vpop.f32.mrf.mxu0 }
 0x4a0   : > { %v3753_v47 = vpop.f32.mrf.mxu1  ;;  %10931 = vst [vmem:[#allocation47_spill] sm:$0xff] %v10289_v18 }
 0x4a1   : > { %v10276_v58 = vadd.f32 %v3753_v47, %v10205_v40  ;;  %v10297_v17 = vpop.f32.mrf.mxu0 }
 0x4a2   : > { %v7279_v38 = vpop.f32.mrf.mxu1 }
 0x4a3   : > { %v10279_v41 = vadd.f32 %v7279_v38, %v10210_v15 }
 0x4a4   : > { %v3756_v23 = vpop.f32.mrf.mxu1 }
 0x4a5   : > { %v10284_v13 = vadd.f32 %v3756_v23, %v10215_v57 }
 0x4a6   : > { %v7282_v59 = vpop.f32.mrf.mxu1 }
 0x4a7   : > { %v10287_v39 = vadd.f32 %v7282_v59, %v10219_v28  ;;  %v10304_v59 = vpop.f32.mrf.mxu0 }
 0x4a8   : > { %v3769_v36 = vpop.f32.mrf.mxu1 }
 0x4a9   : > { %v10292_v40 = vadd.f32 %v3769_v36, %v10225_v29 }
 0x4aa   : > { %v7283_v47 = vpop.f32.mrf.mxu1 }
 0x4ab   : > { %v10295_v15 = vadd.f32 %v7283_v47, %v10228_v53  ;;  %v10310_v53 = vpop.f32.mrf.mxu0 }
 0x4ac   : > { %v3772_v38 = vpop.f32.mrf.mxu1 }
 0x4ad   : > { %v10300_v57 = vadd.f32 %v3772_v38, %v10233_v6  ;;  %v10316_v38 = vpop.f32.mrf.mxu0 }
 0x4ae   : > { %v7286_v23 = vpop.f32.mrf.mxu1 }
 0x4af   : > { %v10302_v14 = vadd.f32 %v7286_v23, %v3550_v30 }
 0x4b0   : > { %v3785_v28 = vpop.f32.mrf.mxu1 }
 0x4b1   : > { %v10306_v18 = vadd.f32 %v3785_v28, %v3542_v45  ;;  %v10322_v28 = vpop.f32.mrf.mxu0 }
 0x4b2   : > { %v7287_v29 = vpop.f32.mrf.mxu1  ;;  %10932 = vst [vmem:[#allocation48_spill] sm:$0xff] %v10322_v28 }
 0x4b3   : > { %v10308_v36 = vadd.f32 %v7287_v29, %v3553_v55 }
 0x4b4   : > { %v3788_v7 = vpop.f32.mrf.mxu1 }
 0x4b5   : > { %v10312_v47 = vadd.f32 %v3788_v7, %v3545_v34  ;;  %v10328_v7 = vpop.f32.mrf.mxu0 }
 0x4b6   : > { %v7290_v4 = vpop.f32.mrf.mxu1 }
 0x4b7   : > { %v10314_v10 = vadd.f32 %v7290_v4, %v3566_v44 }
 0x4b8   : > { %v3801_v6 = vpop.f32.mrf.mxu1 }
 0x4b9   : > { %v10318_v30 = vadd.f32 %v3801_v6, %v3558_v19  ;;  %v10334_v6 = vpop.f32.mrf.mxu0 }
 0x4ba   : > { %v7291_v23 = vpop.f32.mrf.mxu1  ;;  %10933 = vst [vmem:[#allocation49_spill] sm:$0xff] %v10334_v6 }
 0x4bb   : > { %v10320_v52 = vadd.f32 %v7291_v23, %v3569_v62  ;;  %v4052_v23 = vadd.f32 %v10043_v35, %v3834_v22  ;;  %v10342_v28 = vpop.f32.mrf.mxu0 }
 0x4bc   : > { %v3804_v45 = vpop.f32.mrf.mxu1 }
 0x4bd   : > { %v10324_v55 = vadd.f32 %v3804_v45, %v3561_v12  ;;  %v10350_v6 = vpop.f32.mrf.mxu0 }
 0x4be   : > { %v7294_v29 = vpop.f32.mrf.mxu1 }
 0x4bf   : > { %v10326_v9 = vadd.f32 %v7294_v29, %v3582_v27  ;;  %v4050_v27 = vadd.f32 %v10045_v2, %v3832_v60  ;;  %v4056_v2 = vadd.f32 %v10052_v54, %v10271_v20  ;;  %v4055_v54 = vadd.f32 %v10068_v56, %v10284_v13 }
 0x4c0   : > { %v3817_v34 = vpop.f32.mrf.mxu1  ;;  %v4061_v56 = vadd.f32 %v10085_v8, %v10295_v15  ;;  %v4062_v8 = vadd.f32 %v10101_v51, %v10306_v18  ;;  %v4068_v51 = vadd.f32 %v10117_v50, %v10314_v10  ;;  %v4067_v50 = vadd.f32 %v10134_v0, %v10324_v55  ;;  %v10943_v0 = vld [vmem:[#allocation22_spill] sm:$0xff] }
 0x4c1   : > { %v10330_v44 = vadd.f32 %v3817_v34, %v3574_v11 }
 0x4c2   : > { %v7295_v4 = vpop.f32.mrf.mxu1 }
 0x4c3   : > { %v10332_v21 = vadd.f32 %v7295_v4, %v3585_v26  ;;  %v4053_v26 = vadd.f32 %v10048_v16, %v3835_v49  ;;  %v10360_v49 = vpop.f32.mrf.mxu0 }
 0x4c4   : > { %v3820_v19 = vpop.f32.mrf.mxu1 }
 0x4c5   : > { %v10336_v62 = vadd.f32 %v3820_v19, %v3577_v32  ;;  %v4051_v32 = vadd.f32 %v10050_v33, %v3833_v37  ;;  %v4057_v33 = vadd.f32 %v10063_v5, %v10279_v41  ;;  %v4058_v5 = vadd.f32 %v10079_v31, %v10292_v40 }
 0x4c6   : > { %v7354_v12 = vpop.f32.mrf.mxu1  ;;  %v4064_v31 = vadd.f32 %v10095_v1, %v10302_v14  ;;  %v4063_v1 = vadd.f32 %v10112_v42, %v10312_v47  ;;  %v4069_v42 = vadd.f32 %v10129_v43, %v10320_v52  ;;  %v4070_v43 = vadd.f32 %v10144_v61, %v10330_v44 }
 0x4c7   : > { %v10339_v45 = vadd.f32 %v7354_v12, %v4052_v23  ;;  %v4054_v23 = vadd.f32 %v10057_v63, %v10276_v58  ;;  %v4060_v63 = vadd.f32 %v10073_v24, %v10287_v39  ;;  %v4059_v24 = vadd.f32 %v10090_v46, %v10300_v57 }
 0x4c8   : > { %v4182_v29 = vpop.f32.mrf.mxu1  ;;  %v4065_v46 = vadd.f32 %v10107_v48, %v10308_v36  ;;  %v4066_v48 = vadd.f32 %v10123_v25, %v10318_v30  ;;  %v4072_v25 = vadd.f32 %v10139_v3, %v10326_v9  ;;  %v4073_v55 = vadd.f32 %v10943_v0, %v10332_v21  ;;  %v5193_v0 = vpop.permute.xlu1 %5192 }
 0x4c9   : > { %v10344_v11 = vadd.f32 %v4182_v29, %v4050_v27  ;;  %v10370_v29 = vpop.f32.mrf.mxu0 }
 0x4ca   : > { %v7355_v34 = vpop.f32.mrf.mxu1 }
 0x4cb   : > { %v10347_v4 = vadd.f32 %v7355_v34, %v4053_v26 }
 0x4cc   : > { %v4185_v19 = vpop.f32.mrf.mxu1 }
 0x4cd   : > { %v10352_v35 = vadd.f32 %v4185_v19, %v4051_v32  ;;  %v10380_v32 = vpop.f32.mrf.mxu0 }
 0x4ce   : > { %v7358_v22 = vpop.f32.mrf.mxu1 }
 0x4cf   : > { %v10356_v60 = vadd.f32 %v7358_v22, %v4056_v2  ;;  %v10390_v22 = vpop.f32.mrf.mxu0 }
 0x4d0   : > { %v4198_v16 = vpop.f32.mrf.mxu1 }
 0x4d1   : > { %v10362_v12 = vadd.f32 %v4198_v16, %v4054_v23 }
 0x4d2   : > { %v7359_v37 = vpop.f32.mrf.mxu1 }
 0x4d3   : > { %v10366_v27 = vadd.f32 %v7359_v37, %v4057_v33  ;;  %v10400_v33 = vpop.f32.mrf.mxu0 }
 0x4d4   : > { %v4201_v20 = vpop.f32.mrf.mxu1  ;;  %10934 = vst [vmem:[#allocation50_spill] sm:$0xff] %v10400_v33 }
 0x4d5   : > { %v10372_v26 = vadd.f32 %v4201_v20, %v4055_v54  ;;  %v10410_v20 = vpop.f32.mrf.mxu0 }
 0x4d6   : > { %v7362_v58 = vpop.f32.mrf.mxu1  ;;  %10935 = vst [vmem:[#allocation51_spill] sm:$0xff] %v10410_v20 }
 0x4d7   : > { %v10376_v34 = vadd.f32 %v7362_v58, %v4060_v63 }
 0x4d8   : > { %v4214_v41 = vpop.f32.mrf.mxu1 }
 0x4d9   : > { %v10382_v19 = vadd.f32 %v4214_v41, %v4058_v5  ;;  %v10420_v5 = vpop.f32.mrf.mxu0 }
 0x4da   : > { %v7363_v13 = vpop.f32.mrf.mxu1  ;;  %10936 = vst [vmem:[#allocation52_spill] sm:$0xff] %v10420_v5 }
 0x4db   : > { %v10386_v2 = vadd.f32 %v7363_v13, %v4061_v56  ;;  %v10430_v13 = vpop.f32.mrf.mxu0 }
 0x4dc   : > { %v4217_v39 = vpop.f32.mrf.mxu1  ;;  %10938 = vst [vmem:[#allocation54_spill] sm:$0xff] %v10430_v13 }
 0x4dd   : > { %v10392_v23 = vadd.f32 %v4217_v39, %v4059_v24 }
 0x4de   : > { %v7366_v40 = vpop.f32.mrf.mxu1 }
 0x4df   : > { %v10396_v16 = vadd.f32 %v7366_v40, %v4064_v31  ;;  %v10440_v31 = vpop.f32.mrf.mxu0 }
 0x4e0   : > { %v4230_v15 = vpop.f32.mrf.mxu1  ;;  %10941 = vst [vmem:[#allocation57_spill] sm:$0xff] %v10440_v31 }
 0x4e1   : > { %v10402_v37 = vadd.f32 %v4230_v15, %v4062_v8 }
 0x4e2   : > { %v7367_v57 = vpop.f32.mrf.mxu1 }
 0x4e3   : > { %v10406_v54 = vadd.f32 %v7367_v57, %v4065_v46  ;;  %v10945_v46 = vld [vmem:[#allocation41_spill] sm:$0xff]  ;;  %v10450_v57 = vpop.f32.mrf.mxu0 }
 0x4e4   : > { %v4233_v14 = vpop.f32.mrf.mxu1  ;;  %v4071_v3 = vadd.f32 %v10945_v46, %v10336_v62  ;;  %10946 = vst [vmem:[#allocation41_spill] sm:$0xff] %v10450_v57  ;;  %v5198_v46 = vpop.permute.xlu0 %5197 }
 0x4e5   : > { %v10412_v63 = vadd.f32 %v4233_v14, %v4063_v1  ;;  %v10454_v14 = vpop.f32.mrf.mxu0 }
 0x4e6   : > { %v7370_v18 = vpop.f32.mrf.mxu1  ;;  %10948 = vst [vmem:[#allocation60_spill] sm:$0xff] %v10454_v14 }
 0x4e7   : > { %v10416_v58 = vadd.f32 %v7370_v18, %v4068_v51 }
 0x4e8   : > { %v4246_v36 = vpop.f32.mrf.mxu1  ;;  %v5208_v13 = vpop.permute.xlu0 %5207 }
 0x4e9   : > { %v10422_v41 = vadd.f32 %v4246_v36, %v4066_v48  ;;  %v10456_v48 = vpop.f32.mrf.mxu0 }
 0x4ea   : > { %v7371_v47 = vpop.f32.mrf.mxu1  ;;  %10949 = vst [vmem:[#allocation61_spill] sm:$0xff] %v10456_v48 }
 0x4eb   : > { %v10426_v56 = vadd.f32 %v7371_v47, %v4069_v42  ;;  %v10458_v42 = vpop.f32.mrf.mxu0 }
 0x4ec   : > { %v4249_v10 = vpop.f32.mrf.mxu1  ;;  %10950 = vst [vmem:[#allocation62_spill] sm:$0xff] %v10458_v42  ;;  %v10954_v42 = vld [vmem:[#allocation42_spill] sm:$0xff]  ;;  %v10500_v33 = vpop.permute.xlu0 %5217 }
 0x4ed   : > { %10937 = vst [vmem:[#allocation53_spill] sm:$0xff] %v10426_v56  ;;  %v10432_v24 = vadd.f32 %v4249_v10, %v4067_v50  ;;  %v10462_v62 = vpop.f32.mrf.mxu0  ;;  %v4499_v14 = vadd.f32 %v10954_v42, %v10344_v11 }
 0x4ee   : > { %v7374_v30 = vpop.f32.mrf.mxu1  ;;  %10951 = vst [vmem:[#allocation63_spill] sm:$0xff] %v10462_v62 }
 0x4ef   : > { %10939 = vst [vmem:[#allocation55_spill] sm:$0xff] %v10432_v24  ;;  %v10436_v39 = vadd.f32 %v7374_v30, %v4072_v25  ;;  %v10468_v30 = vpop.f32.mrf.mxu0 }
 0x4f0   : > { %v4262_v52 = vpop.f32.mrf.mxu1  ;;  %10952 = vst [vmem:[#allocation64_spill] sm:$0xff] %v10468_v30 }
 0x4f1   : > { %10940 = vst [vmem:[#allocation56_spill] sm:$0xff] %v10436_v39  ;;  %v10442_v40 = vadd.f32 %v4262_v52, %v4070_v43 }
 0x4f2   : > { %v7375_v8 = vpop.f32.mrf.mxu1 }
 0x4f3   : > { %10942 = vst [vmem:[#allocation58_spill] sm:$0xff] %v10442_v40  ;;  %v10446_v15 = vadd.f32 %v7375_v8, %v4073_v55  ;;  %v7514_v55 = vpop.f32.mrf.mxu0  ;;  %v10955_v40 = vld [vmem:[#allocation23_spill] sm:$0xff] }
 0x4f4   : > { %v4265_v9 = vpop.f32.mrf.mxu1  ;;  %v4501_v24 = vadd.f32 %v10955_v40, %v10339_v45 }
 0x4f5   : > { %10944 = vst [vmem:[#allocation22_spill] sm:$0xff] %v10446_v15  ;;  %v10452_v1 = vadd.f32 %v4265_v9, %v4071_v3  ;;  %v10953_v3 = vld [vmem:[#allocation25_spill] sm:$0xff]  ;;  %v5071_v62 = vpop.f32.mrf.mxu0 }
 0x4f6   : > { %v7434_v61 = vpop.f32.mrf.mxu1  ;;  %v4500_v9 = vadd.f32 %v10953_v3, %v10352_v35 }
 0x4f7   : > { %10947 = vst [vmem:[#allocation59_spill] sm:$0xff] %v10452_v1  ;;  %v5203_v1 = vpop.permute.xlu1 %5202  ;;  %v7515_v31 = vpop.f32.mrf.mxu0  ;;  %v4719_v56 = vadd.f32 %v7434_v61, %v4501_v24 }
 0x4f8   : > { %v4622_v44 = vpop.f32.mrf.mxu1 }
 0x4f9   : > { %v4717_v15 = vadd.f32 %v4622_v44, %v4499_v14  ;;  %v5074_v42 = vpop.f32.mrf.mxu0  ;;  %v10956_v44 = vld [vmem:[#allocation24_spill] sm:$0xff] }
 0x4fa   : > { %v7435_v51 = vpop.f32.mrf.mxu1  ;;  %v4502_v14 = vadd.f32 %v10956_v44, %v10347_v4  ;;  %v5228_v44 = vpop.permute.xlu0 %5227 }
 0x4fb   : > { %v4944_v5 = vadd.f32 %v10304_v59, %v4717_v15 }
 0x4fc   : > { %v4625_v18 = vpop.f32.mrf.mxu1  ;;  %v4720_v24 = vadd.f32 %v7435_v51, %v4502_v14 }
 0x4fd   : > { %v4718_v57 = vadd.f32 %v4625_v18, %v4500_v9  ;;  %v5213_v18 = vpop.permute.xlu1 %5212  ;;  %v10503_v45 = vadd.f32 %v5071_v62, %v4944_v5  ;;  %v10964_v62 = vld [vmem:[#allocation26_spill] sm:$0xff] }
 0x4fe   : > { %v7438_v21 = vpop.f32.mrf.mxu1 }
 0x4ff   : > { %v4945_v35 = vadd.f32 %v10316_v38, %v4718_v57  ;;  %v4946_v38 = vadd.f32 %v10297_v17, %v4719_v56  ;;  %10958 = vst [vmem:[#allocation42_spill] sm:$0xff] %v10503_v45  ;;  %v5310_v4 = vmul.f32 %v5193_v0, %v10503_v45  ;;  %v10962_v17 = vld [vmem:[#allocation27_spill] sm:$0xff] }
 0x500   : > { %v4638_v36 = vpop.f32.mrf.mxu1  ;;  %v4503_v5 = vadd.f32 %v10962_v17, %v10362_v12 }
 0x501   : > { %v10496_v9 = vadd.f32 %v5074_v42, %v4945_v35  ;;  %v5223_v57 = vpop.permute.xlu1 %5222  ;;  %v10510_v61 = vadd.f32 %v7514_v55, %v4946_v38  ;;  %v4947_v35 = vadd.f32 %v10310_v53, %v4720_v24  ;;  %v5363_v0 = vmul.f32 %v5310_v4, %v10503_v45  ;;  %v10965_v53 = vld [vmem:[#allocation28_spill] sm:$0xff] }
 0x502   : > { %v7439_v47 = vpop.f32.mrf.mxu1  ;;  %v4721_v14 = vadd.f32 %v4638_v36, %v4503_v5  ;;  %v4506_v24 = vadd.f32 %v10965_v53, %v10366_v27 }
 0x503   : > { %10957 = vst [vmem:[#allocation25_spill] sm:$0xff] %v10496_v9  ;;  %v5311_v59 = vmul.f32 %v5198_v46, %v10496_v9  ;;  %10960 = vst [vmem:[#allocation24_spill] sm:$0xff] %v10510_v61  ;;  %v4505_v46 = vadd.f32 %v10964_v62, %v10356_v60  ;;  %v5312_v55 = vmul.f32 %v5203_v1, %v10510_v61  ;;  %v10535_v1 = vpop.permute.xlu0 %5237 }
 0x504   : > { %v10460_v50 = vpop.f32.mrf.mxu1  ;;  %v10525_v38 = vadd.f32 %v7515_v31, %v4947_v35  ;;  %v4724_v36 = vadd.f32 %v7439_v47, %v4506_v24  ;;  %v4948_v35 = vadd.f32 %v10328_v7, %v4721_v14  ;;  %v10971_v14 = vld [vmem:[#allocation49_spill] sm:$0xff] }
 0x505   : > { %v5364_v56 = vmul.f32 %v5311_v59, %v10496_v9  ;;  %v10531_v12 = vpop.permute.xlu1 %5232  ;;  %v5334_v17 = vadd.f32 %v5311_v59, %v5310_v4  ;;  %v4723_v9 = vadd.f32 %v7438_v21, %v4505_v46  ;;  %v5365_v27 = vmul.f32 %v5312_v55, %v10510_v61  ;;  %v10967_v59 = vld [vmem:[#allocation31_spill] sm:$0xff]  ;;  %v10968_v4 = vld [vmem:[#allocation48_spill] sm:$0xff] }
 0x506   : > { %v10464_v10 = vpop.f32.mrf.mxu1  ;;  %v5313_v62 = vmul.f32 %v5208_v13, %v10525_v38  ;;  %v4507_v21 = vadd.f32 %v10967_v59, %v10382_v19 }
 0x507   : > { %v5387_v60 = vadd.f32 %v5364_v56, %v5363_v0  ;;  %v4950_v46 = vadd.f32 %v10968_v4, %v4723_v9  ;;  %v5335_v47 = vadd.f32 %v5334_v17, %v5312_v55  ;;  %v10969_v56 = vld [vmem:[#allocation30_spill] sm:$0xff]  ;;  %v4951_v0 = vadd.f32 %v10971_v14, %v4724_v36  ;;  %v10972_v17 = vld [vmem:[#allocation33_spill] sm:$0xff] }
 0x508   : > { %v10466_v25 = vpop.f32.mrf.mxu1  ;;  %v5366_v55 = vmul.f32 %v5313_v62, %v10525_v38 }
 0x509   : > { %v5388_v7 = vadd.f32 %v5387_v60, %v5365_v27  ;;  %v5243_v13 = vpop.permute.xlu1 %5242  ;;  %v4725_v61 = vadd.f32 %v10466_v25, %v4507_v21  ;;  %v5336_v27 = vadd.f32 %v5335_v47, %v5313_v62  ;;  %v10973_v62 = vld [vmem:[#allocation34_spill] sm:$0xff] }
 0x50a   : > { %v10470_v43 = vpop.f32.mrf.mxu1  ;;  %v4513_v4 = vadd.f32 %v10973_v62, %v10396_v16 }
 0x50b   : > { %v4952_v21 = vadd.f32 %v10360_v49, %v4725_v61  ;;  %v10975_v49 = vld [vmem:[#allocation36_spill] sm:$0xff] }
 0x50c   : > { %v10472_v52 = vpop.f32.mrf.mxu1 }
 0x50e   : > { %v10474_v8 = vpop.f32.mrf.mxu1 }
 0x510   : > { %v10478_v48 = vpop.f32.mrf.mxu1 }
 0x512   : > { %v10482_v30 = vpop.f32.mrf.mxu1 }
 0x514   : > { %v10484_v39 = vpop.f32.mrf.mxu1 }
 0x516   : > { %v10489_v3 = vpop.f32.mrf.mxu1 }
 0x518   : > { %v10492_v11 = vpop.f32.mrf.mxu1 }
 0x51a   : > { %v10498_v20 = vpop.f32.mrf.mxu1 }
 0x51c   : > { %v10505_v40 = vpop.f32.mrf.mxu1 }
 0x51e   : > { %v10508_v15 = vpop.f32.mrf.mxu1 }
 0x51f   : > { %10959 = vst [vmem:[#allocation23_spill] sm:$0xff] %v10508_v15 }
 0x520   : > { %v10514_v42 = vpop.f32.mrf.mxu1 }
 0x521   : > { %10961 = vst [vmem:[#allocation65_spill] sm:$0xff] %v10514_v42 }
 0x522   : > { %v10519_v51 = vpop.f32.mrf.mxu1 }
 0x523   : > { %10963 = vst [vmem:[#allocation27_spill] sm:$0xff] %v10519_v51  ;;  %v10966_v51 = vld [vmem:[#allocation29_spill] sm:$0xff] }
 0x524   : > { %v10529_v15 = vpop.f32.mrf.mxu1  ;;  %v4504_v42 = vadd.f32 %v10966_v51, %v10372_v26  ;;  %v4509_v51 = vadd.f32 %v10969_v56, %v10376_v34 }
 0x526   : > { %v7518_v5 = vpop.f32.mrf.mxu1  ;;  %v4722_v31 = vadd.f32 %v10460_v50, %v4504_v42  ;;  %v10970_v50 = vld [vmem:[#allocation32_spill] sm:$0xff]  ;;  %v4727_v34 = vadd.f32 %v10464_v10, %v4509_v51  ;;  %v5253_v51 = vpop.permute.xlu1 %5252 }
 0x527   : > { %v4510_v42 = vadd.f32 %v10970_v50, %v10386_v2  ;;  %v10552_v45 = vadd.f32 %v7518_v5, %v4950_v46  ;;  %v4508_v2 = vadd.f32 %v10972_v17, %v10392_v23  ;;  %v10974_v46 = vld [vmem:[#allocation35_spill] sm:$0xff] }
 0x528   : > { %v5087_v53 = vpop.f32.mrf.mxu1  ;;  %v4949_v9 = vadd.f32 %v10342_v28, %v4722_v31  ;;  %v5389_v31 = vadd.f32 %v5388_v7, %v5366_v55  ;;  %v4511_v47 = vadd.f32 %v10974_v46, %v10402_v37 }
 0x529   : > { %v10544_v26 = vadd.f32 %v5087_v53, %v4948_v35  ;;  %v5248_v35 = vpop.permute.xlu0 %5247  ;;  %v4726_v28 = vadd.f32 %v10472_v52, %v4508_v2  ;;  %v5316_v10 = vmul.f32 %v5223_v57, %v10552_v45  ;;  %v4954_v52 = vadd.f32 %v10350_v6, %v4727_v34 }
 0x52a   : > { %v7519_v24 = vpop.f32.mrf.mxu1  ;;  %v4729_v55 = vadd.f32 %v10478_v48, %v4511_v47  ;;  %v5263_v48 = vpop.permute.xlu1 %5262 }
 0x52b   : > { %v5314_v19 = vmul.f32 %v5213_v18, %v10544_v26  ;;  %v10560_v60 = vadd.f32 %v7519_v24, %v4951_v0  ;;  %v4728_v18 = vadd.f32 %v10470_v43, %v4510_v42  ;;  %v5369_v6 = vmul.f32 %v5316_v10, %v10552_v45 }
 0x52c   : > { %v5090_v36 = vpop.f32.mrf.mxu1 }
 0x52d   : > { %v5367_v25 = vmul.f32 %v5314_v19, %v10544_v26  ;;  %v10563_v5 = vadd.f32 %v5090_v36, %v4949_v9  ;;  %v5337_v59 = vadd.f32 %v5336_v27, %v5314_v19  ;;  %v5317_v43 = vmul.f32 %v5228_v44, %v10560_v60  ;;  %v5258_v14 = vpop.permute.xlu0 %5257 }
 0x52e   : > { %v7522_v53 = vpop.f32.mrf.mxu1  ;;  %v4955_v16 = vadd.f32 %v10370_v29, %v4728_v18  ;;  %v4953_v44 = vadd.f32 %v10380_v32, %v4726_v28  ;;  %v4731_v9 = vadd.f32 %v10474_v8, %v4513_v4 }
 0x52f   : > { %v5315_v23 = vmul.f32 %v10500_v33, %v10563_v5  ;;  %v5390_v50 = vadd.f32 %v5389_v31, %v5367_v25  ;;  %v4514_v33 = vadd.f32 %v10975_v49, %v10406_v54  ;;  %v10582_v61 = vadd.f32 %v7522_v53, %v4954_v52  ;;  %v10976_v54 = vld [vmem:[#allocation37_spill] sm:$0xff] }
 0x530   : > { %v5103_v56 = vpop.f32.mrf.mxu1  ;;  %v4512_v34 = vadd.f32 %v10976_v54, %v10412_v63  ;;  %v5370_v29 = vmul.f32 %v5317_v43, %v10560_v60 }
 0x531   : > { %v5338_v57 = vadd.f32 %v5337_v59, %v5315_v23  ;;  %v5368_v42 = vmul.f32 %v5315_v23, %v10563_v5  ;;  %v10578_v7 = vadd.f32 %v5103_v56, %v4952_v21  ;;  %v4732_v25 = vadd.f32 %v10482_v30, %v4514_v33  ;;  %v10978_v23 = vld [vmem:[#allocation39_spill] sm:$0xff]  ;;  %v5268_v4 = vpop.permute.xlu0 %5267  ;;  %v10981_v33 = vld [vmem:[#allocation52_spill] sm:$0xff] }
 0x532   : > { %v7523_v37 = vpop.f32.mrf.mxu1  ;;  %v5320_v8 = vmul.f32 %v5243_v13, %v10582_v61  ;;  %v4515_v21 = vadd.f32 %v10978_v23, %v10422_v41  ;;  %v4958_v30 = vadd.f32 %v10390_v22, %v4731_v9 }
 0x533   : > { %v5339_v0 = vadd.f32 %v5338_v57, %v5316_v10  ;;  %v5391_v24 = vadd.f32 %v5390_v50, %v5368_v42  ;;  %v5318_v19 = vmul.f32 %v10531_v12, %v10578_v7  ;;  %v10594_v36 = vadd.f32 %v7523_v37, %v4955_v16  ;;  %v10977_v10 = vld [vmem:[#allocation38_spill] sm:$0xff]  ;;  %v10980_v50 = vld [vmem:[#allocation51_spill] sm:$0xff]  ;;  %v10982_v37 = vld [vmem:[#allocation53_spill] sm:$0xff] }
 0x534   : > { %v5106_v17 = vpop.f32.mrf.mxu1  ;;  %v4730_v12 = vadd.f32 %v10484_v39, %v4512_v34  ;;  %v4517_v59 = vadd.f32 %v10977_v10, %v10416_v58  ;;  %v10979_v39 = vld [vmem:[#allocation50_spill] sm:$0xff]  ;;  %v4959_v41 = vadd.f32 %v10980_v50, %v4732_v25  ;;  %v5373_v22 = vmul.f32 %v5320_v8, %v10582_v61  ;;  %v10992_v50 = vld [vmem:[#allocation65_spill] sm:$0xff] }
 0x535   : > { %v5392_v2 = vadd.f32 %v5391_v24, %v5369_v6  ;;  %v5340_v32 = vadd.f32 %v5339_v0, %v5317_v43  ;;  %v10596_v27 = vadd.f32 %v5106_v17, %v4953_v44  ;;  %v5371_v63 = vmul.f32 %v5318_v19, %v10578_v7  ;;  %v10983_v44 = vld [vmem:[#allocation40_spill] sm:$0xff]  ;;  %v10985_v17 = vld [vmem:[#allocation43_spill] sm:$0xff] }
 0x536   : > { %v7526_v18 = vpop.f32.mrf.mxu1  ;;  %v4956_v62 = vadd.f32 %v10979_v39, %v4729_v55  ;;  %v5321_v47 = vmul.f32 %v5248_v35, %v10594_v36  ;;  %v4957_v16 = vadd.f32 %v10981_v33, %v4730_v12  ;;  %v4735_v35 = vadd.f32 %v10489_v3, %v4517_v59  ;;  %v10987_v3 = vld [vmem:[#allocation45_spill] sm:$0xff] }
 0x537   : > { %v5341_v28 = vadd.f32 %v5340_v32, %v5318_v19  ;;  %v5393_v31 = vadd.f32 %v5392_v2, %v5370_v29  ;;  %v5319_v53 = vmul.f32 %v10535_v1, %v10596_v27  ;;  %v4733_v1 = vadd.f32 %v10492_v11, %v4515_v21  ;;  %v5273_v19 = vpop.permute.xlu1 %5272  ;;  %v10984_v29 = vld [vmem:[#allocation55_spill] sm:$0xff]  ;;  %v10986_v32 = vld [vmem:[#allocation58_spill] sm:$0xff] }
 0x538   : > { %v5119_v13 = vpop.f32.mrf.mxu1  ;;  %v10613_v56 = vadd.f32 %v7526_v18, %v4958_v30  ;;  %v4518_v6 = vadd.f32 %v10983_v44, %v10982_v37  ;;  %v5374_v9 = vmul.f32 %v5321_v47, %v10594_v36  ;;  %v4516_v2 = vadd.f32 %v10985_v17, %v10984_v29  ;;  %v10989_v30 = vld [vmem:[#allocation54_spill] sm:$0xff]  ;;  %v10996_v44 = vld [vmem:[#allocation59_spill] sm:$0xff] }
 0x539   : > { %v5394_v46 = vadd.f32 %v5393_v31, %v5371_v63  ;;  %v5342_v43 = vadd.f32 %v5341_v28, %v5319_v53  ;;  %v5372_v52 = vmul.f32 %v5319_v53, %v10596_v27  ;;  %v10615_v58 = vadd.f32 %v5119_v13, %v4956_v62  ;;  %v5278_v28 = vpop.permute.xlu0 %5277 }
 0x53a   : > { %v7527_v57 = vpop.f32.mrf.mxu1  ;;  %v4519_v25 = vadd.f32 %v10987_v3, %v10986_v32  ;;  %v5324_v12 = vmul.f32 %v5263_v48, %v10613_v56  ;;  %v4736_v59 = vadd.f32 %v10498_v20, %v4518_v6  ;;  %v4734_v23 = vadd.f32 %v10505_v40, %v4516_v2  ;;  %v10994_v20 = vld [vmem:[#allocation46_spill] sm:$0xff]  ;;  %v10997_v6 = vld [vmem:[#allocation47_spill] sm:$0xff] }
 0x53b   : > { %v5343_v42 = vadd.f32 %v5342_v43, %v5320_v8  ;;  %v5395_v49 = vadd.f32 %v5394_v46, %v5372_v52  ;;  %v5322_v11 = vmul.f32 %v5253_v51, %v10615_v58  ;;  %v10624_v0 = vadd.f32 %v7527_v57, %v4959_v41  ;;  %v10988_v51 = vld [vmem:[#allocation57_spill] sm:$0xff]  ;;  %v10990_v43 = vld [vmem:[#allocation56_spill] sm:$0xff]  ;;  %v10993_v41 = vld [vmem:[#allocation22_spill] sm:$0xff] }
 0x53c   : > { %v5122_v24 = vpop.f32.mrf.mxu1  ;;  %v4960_v18 = vadd.f32 %v10988_v51, %v4733_v1  ;;  %v4962_v39 = vadd.f32 %v10989_v30, %v4735_v35  ;;  %v10991_v52 = vld [vmem:[#allocation44_spill] sm:$0xff]  ;;  %v4522_v57 = vadd.f32 %v10994_v20, %v10993_v41  ;;  %v5377_v40 = vmul.f32 %v5324_v12, %v10613_v56  ;;  %v10995_v35 = vld [vmem:[#allocation23_spill] sm:$0xff] }
 0x53d   : > { %v5396_v55 = vadd.f32 %v5395_v49, %v5373_v22  ;;  %v5344_v54 = vadd.f32 %v5343_v42, %v5321_v47  ;;  %v10627_v34 = vadd.f32 %v5122_v24, %v4957_v16  ;;  %v5375_v31 = vmul.f32 %v5322_v11, %v10615_v58  ;;  %v5283_v22 = vpop.permute.xlu1 %5282  ;;  %v10998_v24 = vld [vmem:[#allocation41_spill] sm:$0xff]  ;;  %v5288_v17 = vpop.permute.xlu0 %5287  ;;  %v11000_v2 = vld [vmem:[#allocation27_spill] sm:$0xff] }
 0x53e   : > { %v7530_v8 = vpop.f32.mrf.mxu1  ;;  %v5325_v21 = vmul.f32 %v5268_v4, %v10624_v0  ;;  %v4521_v1 = vadd.f32 %v10991_v52, %v10990_v43  ;;  %v4740_v32 = vadd.f32 %v11000_v2, %v4522_v57  ;;  %v11002_v43 = vld [vmem:[#allocation61_spill] sm:$0xff]  ;;  %v11003_v41 = vld [vmem:[#allocation63_spill] sm:$0xff]  ;;  %v11004_v57 = vld [vmem:[#allocation64_spill] sm:$0xff] }
 0x53f   : > { %v5345_v63 = vadd.f32 %v5344_v54, %v5322_v11  ;;  %v5397_v53 = vadd.f32 %v5396_v55, %v5374_v9  ;;  %v5323_v10 = vmul.f32 %v5258_v14, %v10627_v34  ;;  %v4737_v14 = vadd.f32 %v10992_v50, %v4519_v25  ;;  %v10999_v55 = vld [vmem:[#allocation60_spill] sm:$0xff] }
 0x540   : > { %v5135_v62 = vpop.f32.mrf.mxu1  ;;  %v10650_v33 = vadd.f32 %v7530_v8, %v4962_v39  ;;  %v4739_v37 = vadd.f32 %v10995_v35, %v4521_v1  ;;  %v4520_v11 = vadd.f32 %v10997_v6, %v10996_v44  ;;  %v4963_v9 = vadd.f32 %v10998_v24, %v4736_v59 }
 0x541   : > { %v5398_v48 = vadd.f32 %v5397_v53, %v5375_v31  ;;  %v5346_v13 = vadd.f32 %v5345_v63, %v5323_v10  ;;  %v5376_v46 = vmul.f32 %v5323_v10, %v10627_v34  ;;  %v10642_v47 = vadd.f32 %v5135_v62, %v4960_v18  ;;  %v11001_v63 = vld [vmem:[#allocation62_spill] sm:$0xff]  ;;  %v5293_v62 = vpop.permute.xlu1 %5292  ;;  %v5298_v50 = vpop.permute.xlu0 %5297 }
 0x542   : > { %v7531_v4 = vpop.f32.mrf.mxu1  ;;  %v4961_v54 = vadd.f32 %v10999_v55, %v4734_v23  ;;  %v5378_v3 = vmul.f32 %v5325_v21, %v10624_v0  ;;  %v4738_v8 = vadd.f32 %v10529_v15, %v4520_v11  ;;  %v4964_v31 = vadd.f32 %v11001_v63, %v4737_v14 }
 0x543   : > { %v5347_v42 = vadd.f32 %v5346_v13, %v5324_v12  ;;  %v5399_v49 = vadd.f32 %v5398_v48, %v5376_v46  ;;  %v5326_v16 = vmul.f32 %v5273_v19, %v10642_v47  ;;  %v10661_v19 = vadd.f32 %v7531_v4, %v4963_v9 }
 0x544   : > { %v5138_v29 = vpop.f32.mrf.mxu1  ;;  %v5328_v53 = vmul.f32 %v5283_v22, %v10650_v33  ;;  %v4966_v52 = vadd.f32 %v11002_v43, %v4739_v37  ;;  %v4967_v20 = vadd.f32 %v11003_v41, %v4740_v32 }
 0x545   : > { %v5400_v25 = vadd.f32 %v5399_v49, %v5377_v40  ;;  %v5348_v12 = vadd.f32 %v5347_v42, %v5325_v21  ;;  %v10663_v51 = vadd.f32 %v5138_v29, %v4961_v54  ;;  %v5379_v59 = vmul.f32 %v5326_v16, %v10642_v47  ;;  %v5303_v11 = vpop.permute.xlu1 %5302 }
 0x546   : > { %v7534_v18 = vpop.f32.mrf.mxu1  ;;  %v5329_v15 = vmul.f32 %v5288_v17, %v10661_v19  ;;  %v5381_v14 = vmul.f32 %v5328_v53, %v10650_v33  ;;  %v5308_v17 = vpop.permute.xlu0 %5307 }
 0x547   : > { %v5349_v10 = vadd.f32 %v5348_v12, %v5326_v16  ;;  %v5401_v23 = vadd.f32 %v5400_v25, %v5378_v3  ;;  %v5327_v30 = vmul.f32 %v5278_v28, %v10663_v51  ;;  %v4965_v28 = vadd.f32 %v11004_v57, %v4738_v8 }
 0x548   : > { %v5151_v39 = vpop.f32.mrf.mxu1  ;;  %v10677_v22 = vadd.f32 %v7534_v18, %v4966_v52  ;;  %v5382_v35 = vmul.f32 %v5329_v15, %v10661_v19 }
 0x549   : > { %v5402_v21 = vadd.f32 %v5401_v23, %v5379_v59  ;;  %v10669_v48 = vadd.f32 %v5151_v39, %v4964_v31  ;;  %v5350_v13 = vadd.f32 %v5349_v10, %v5327_v30  ;;  %v5380_v46 = vmul.f32 %v5327_v30, %v10663_v51 }
 0x54a   : > { %v7535_v1 = vpop.f32.mrf.mxu1  ;;  %v5332_v9 = vmul.f32 %v5303_v11, %v10677_v22 }
 0x54b   : > { %v5351_v40 = vadd.f32 %v5350_v13, %v5328_v53  ;;  %v5403_v4 = vadd.f32 %v5402_v21, %v5380_v46  ;;  %v5330_v42 = vmul.f32 %v5293_v62, %v10669_v48  ;;  %v10683_v6 = vadd.f32 %v7535_v1, %v4967_v20 }
 0x54c   : > { %v5154_v49 = vpop.f32.mrf.mxu1  ;;  %v5385_v12 = vmul.f32 %v5332_v9, %v10677_v22 }
 0x54d   : > { %v10680_v16 = vadd.f32 %v5154_v49, %v4965_v28  ;;  %v5404_v37 = vadd.f32 %v5403_v4, %v5381_v14  ;;  %v5352_v44 = vadd.f32 %v5351_v40, %v5329_v15  ;;  %v5383_v54 = vmul.f32 %v5330_v42, %v10669_v48 }
 0x54e   : > { %v5333_v3 = vmul.f32 %v5308_v17, %v10683_v6 }
 0x54f   : > { %v5331_v24 = vmul.f32 %v5298_v50, %v10680_v16  ;;  %v5353_v55 = vadd.f32 %v5352_v44, %v5330_v42  ;;  %v5405_v29 = vadd.f32 %v5404_v37, %v5382_v35  ;;  %v7715_v37 = vld [vmem:[%s7811_s14 + $0xc0] sm:$0xff] }
 0x550   : > { %v5386_v63 = vmul.f32 %v5333_v3, %v10683_v6  ;;  %v7716_v44 = vld [vmem:[%s7811_s14 + $0xe0] sm:$0xff] }
 0x551   : > { %v5384_v2 = vmul.f32 %v5331_v24, %v10680_v16  ;;  %v5406_v32 = vadd.f32 %v5405_v29, %v5383_v54  ;;  %v5354_v25 = vadd.f32 %v5353_v55, %v5331_v24  ;;  %v5543_v11 = vrot.slane %v7716_v44, 2  ;;  %v7717_v24 = vld [vmem:[%s7811_s14 + $0xc8] sm:$0xff]  ;;  %v11005_v29 = vld [vmem:[#allocation18_spill] sm:$0xff] }
 0x553   : > { %v5355_v8 = vadd.f32 %v5354_v25, %v5332_v9  ;;  %v5407_v18 = vadd.f32 %v5406_v32, %v5384_v2  ;;  %v7718_v9 = vld [vmem:[%s7811_s14 + $0xd0] sm:$0xff] }
 0x554   : > { %v5539_v55 = vrot.slane %v7718_v9, 2 }
 0x555   : > { %v5356_v31 = vadd.f32 %v5355_v8, %v5333_v3  ;;  %v5408_v53 = vadd.f32 %v5407_v18, %v5385_v12  ;;  %v11009_v3 = vld [vmem:[#allocation24_spill] sm:$0xff] }
 0x557   : > { %v5357_v10 = vrot.slane %v5356_v31, 4  ;;  %v5409_v59 = vadd.f32 %v5408_v53, %v5386_v63 }
 0x559   : > { %v5358_v23 = vadd.f32 %v5357_v10, %v5356_v31  ;;  %v5410_v30 = vrot.slane %v5409_v59, 4 }
 0x55b   : > { %v5359_v39 = vrot.slane %v5358_v23, 2  ;;  %v5411_v62 = vadd.f32 %v5410_v30, %v5409_v59 }
 0x55d   : > { %v5360_v21 = vadd.f32 %v5359_v39, %v5358_v23  ;;  %v5412_v15 = vrot.slane %v5411_v62, 2 }
 0x55f   : > { %v5361_v13 = vrot.slane %v5360_v21, 1  ;;  %v5413_v46 = vadd.f32 %v5412_v15, %v5411_v62 }
 0x561   : > { %v5362_v43 = vadd.f32 %v5361_v13, %v5360_v21  ;;  %v5414_v52 = vrot.slane %v5413_v46, 1 }
 0x563   : > { %v5415_v1 = vadd.f32 %v5414_v52, %v5413_v46  ;;  %v10692_v50 = vmul.f32 0.0069444445, %v5362_v43 }
 0x565   : > { %v5417_v14 = vmul.f32 0.0069444445, %v5415_v1  ;;  %v5418_v41 = vmul.f32 %v10692_v50, %v10692_v50  ;;  %v5424_v20 = vsub.f32 %v10544_v26, %v10692_v50  ;;  %v5425_v57 = vsub.f32 %v10563_v5, %v10692_v50 }
 0x566   : > { %v5426_v40 = vsub.f32 %v10552_v45, %v10692_v50  ;;  %v5427_v4 = vsub.f32 %v10560_v60, %v10692_v50  ;;  %v5428_v42 = vsub.f32 %v10578_v7, %v10692_v50  ;;  %v5429_v49 = vsub.f32 %v10596_v27, %v10692_v50 }
 0x567   : > { %v5419_v28 = vsub.f32 %v5417_v14, %v5418_v41  ;;  %v5430_v35 = vsub.f32 %v10582_v61, %v10692_v50  ;;  %v5431_v26 = vsub.f32 %v10594_v36, %v10692_v50  ;;  %v5432_v5 = vsub.f32 %v10615_v58, %v10692_v50 }
 0x568   : > { %v5433_v45 = vsub.f32 %v10627_v34, %v10692_v50  ;;  %v5434_v60 = vsub.f32 %v10613_v56, %v10692_v50  ;;  %v5435_v7 = vsub.f32 %v10624_v0, %v10692_v50  ;;  %v5436_v61 = vsub.f32 %v10642_v47, %v10692_v50 }
 0x569   : > { %v5437_v36 = vsub.f32 %v10663_v51, %v10692_v50  ;;  %v5438_v27 = vsub.f32 %v10650_v33, %v10692_v50  ;;  %v5439_v58 = vsub.f32 %v10661_v19, %v10692_v50  ;;  %v5440_v56 = vsub.f32 %v10669_v48, %v10692_v50  ;;  %v7719_v48 = vld [vmem:[%s7811_s14 + $0xd8] sm:$0xff]  ;;  %s7553_s14 = smul.u32 192, %s11030_s19 }
 0x56a   : > { %v5441_v0 = vsub.f32 %v10680_v16, %v10692_v50  ;;  %v5442_v34 = vsub.f32 %v10677_v22, %v10692_v50  ;;  %v5443_v47 = vsub.f32 %v10683_v6, %v10692_v50  ;;  %v5444_v51 = vadd.f32 1e-05, %v5419_v28  ;;  %v11007_v22 = vld [vmem:[#allocation42_spill] sm:$0xff]  ;;  %v11008_v6 = vld [vmem:[#allocation25_spill] sm:$0xff] }
 0x56b   : > { %v5535_v33 = vrot.slane %v7715_v37, 2  ;;  %v5537_v19 = vrot.slane %v7717_v24, 2  ;;  %v5541_v54 = vrot.slane %v7719_v48, 2  ;;  %v11006_v16 = vrot.slane %v11005_v29, 2  ;;  %s10779_s22 = scalar_lea.vmem %s10813_s5, %s7553_s14 }
 0x56c   : > { %7713 = vrsqrt.f32 %v5444_v51  ;;  %v5420_v2 = vsub.f32 %v11007_v22, %v10692_v50  ;;  %v5421_v32 = vsub.f32 %v11008_v6, %v10692_v50  ;;  %v5422_v25 = vsub.f32 %v11009_v3, %v10692_v50 }
 0x56d   : > { %v5536_v17 = vsel %vm5495_vm1, %v11006_v16, %v5535_v33  ;;  %v5423_v12 = vsub.f32 %v10525_v38, %v10692_v50  ;;  %v5538_v18 = vsel %vm5495_vm1, %v5535_v33, %v5537_v19  ;;  %v5540_v63 = vsel %vm5495_vm1, %v5537_v19, %v5539_v55  ;;  %v11020_v19 = vld [vmem:[#allocation12_spill] sm:$0xff]  ;;  %v11023_v16 = vld [vmem:[#allocation15_spill] sm:$0xff] }
 0x56e   : > { %v5542_v31 = vsel %vm5495_vm1, %v5539_v55, %v5541_v54  ;;  %v5544_v53 = vsel %vm5495_vm1, %v5541_v54, %v5543_v11  ;;  %v11021_v55 = vld [vmem:[#allocation13_spill] sm:$0xff]  ;;  %v11022_v54 = vld [vmem:[#allocation14_spill] sm:$0xff] }
 0x579   : > { %v7714_v8 = vpop.eup %7713 }
 0x57a   : > { %v5446_v10 = vmul.f32 %v7714_v8, %v5420_v2  ;;  %v5447_v59 = vmul.f32 %v7714_v8, %v5421_v32  ;;  %v5448_v23 = vmul.f32 %v7714_v8, %v5422_v25  ;;  %v5449_v30 = vmul.f32 %v7714_v8, %v5423_v12  ;;  %v11024_v2 = vld [vmem:[#allocation16_spill] sm:$0xff]  ;;  %v11025_v32 = vld [vmem:[#allocation17_spill] sm:$0xff]  ;;  %v11026_v25 = vld [vmem:[#allocation19_spill] sm:$0xff] }
 0x57b   : > { %v5450_v39 = vmul.f32 %v7714_v8, %v5424_v20  ;;  %v5451_v62 = vmul.f32 %v7714_v8, %v5425_v57  ;;  %v5452_v21 = vmul.f32 %v7714_v8, %v5426_v40  ;;  %v5453_v15 = vmul.f32 %v7714_v8, %v5427_v4  ;;  %v11010_v57 = vld [vmem:[#allocation2_spill] sm:$0xff]  ;;  %v11011_v4 = vld [vmem:[#allocation3_spill] sm:$0xff] }
 0x57c   : > { %v5454_v13 = vmul.f32 %v7714_v8, %v5428_v42  ;;  %v5455_v46 = vmul.f32 %v7714_v8, %v5429_v49  ;;  %v5456_v38 = vmul.f32 %v7714_v8, %v5430_v35  ;;  %v5457_v43 = vmul.f32 %v7714_v8, %v5431_v26  ;;  %v11012_v49 = vld [vmem:[#allocation4_spill] sm:$0xff]  ;;  %v11013_v26 = vld [vmem:[#allocation5_spill] sm:$0xff] }
 0x57d   : > { %v5458_v52 = vmul.f32 %v7714_v8, %v5432_v5  ;;  %v5459_v1 = vmul.f32 %v7714_v8, %v5433_v45  ;;  %v5460_v50 = vmul.f32 %v7714_v8, %v5434_v60  ;;  %v5461_v14 = vmul.f32 %v7714_v8, %v5435_v7  ;;  %v11014_v45 = vld [vmem:[#allocation6_spill] sm:$0xff]  ;;  %v11015_v7 = vld [vmem:[#allocation7_spill] sm:$0xff] }
 0x57e   : > { %v5462_v41 = vmul.f32 %v7714_v8, %v5436_v61  ;;  %v5463_v28 = vmul.f32 %v7714_v8, %v5437_v36  ;;  %v5464_v51 = vmul.f32 %v7714_v8, %v5438_v27  ;;  %v5465_v37 = vmul.f32 %v7714_v8, %v5439_v58  ;;  %v11016_v36 = vld [vmem:[#allocation8_spill] sm:$0xff]  ;;  %v11017_v58 = vld [vmem:[#allocation9_spill] sm:$0xff] }
 0x57f   : > { %v5466_v33 = vmul.f32 %v7714_v8, %v5440_v56  ;;  %v5467_v44 = vmul.f32 %v7714_v8, %v5441_v0  ;;  %v5468_v11 = vmul.f32 %v7714_v8, %v5442_v34  ;;  %v5469_v20 = vmul.f32 %v7714_v8, %v5443_v47  ;;  %v11018_v0 = vld [vmem:[#allocation10_spill] sm:$0xff]  ;;  %v11019_v47 = vld [vmem:[#allocation11_spill] sm:$0xff]  ;;  %v11027_v8 = vld [vmem:[#allocation20_spill] sm:$0xff] }
 0x580   : > { %v5569_v40 = vadd.f32 %v11010_v57, %v5446_v10  ;;  %v5570_v42 = vadd.f32 %v11011_v4, %v5447_v59  ;;  %v5571_v35 = vadd.f32 %v11012_v49, %v5448_v23  ;;  %v5572_v5 = vadd.f32 %v11013_v26, %v5449_v30  ;;  %v11028_v59 = vld [vmem:[#allocation21_spill] sm:$0xff] }
 0x581   : > { %v5573_v60 = vadd.f32 %v11014_v45, %v5450_v39  ;;  %v5574_v61 = vadd.f32 %v11015_v7, %v5451_v62  ;;  %v5575_v27 = vadd.f32 %v11016_v36, %v5452_v21  ;;  %v5576_v56 = vadd.f32 %v11017_v58, %v5453_v15 }
 0x582   : > { %v5577_v34 = vadd.f32 %v11018_v0, %v5454_v13  ;;  %v5578_v24 = vadd.f32 %v11019_v47, %v5455_v46  ;;  %v5579_v9 = vadd.f32 %v11020_v19, %v5456_v38  ;;  %v5580_v48 = vadd.f32 %v11021_v55, %v5457_v43 }
 0x583   : > { %v5581_v29 = vadd.f32 %v11022_v54, %v5458_v52  ;;  %v5582_v22 = vadd.f32 %v11023_v16, %v5459_v1  ;;  %v5583_v6 = vadd.f32 %v11024_v2, %v5460_v50  ;;  %v5584_v3 = vadd.f32 %v11025_v32, %v5461_v14 }
 0x584   : > { %v5585_v12 = vadd.f32 %v11026_v25, %v5462_v41  ;;  %v5586_v10 = vadd.f32 %v11027_v8, %v5463_v28  ;;  %v5587_v23 = vadd.f32 %v11028_v59, %v5464_v51  ;;  %v5588_v30 = vadd.f32 %v5536_v17, %v5465_v37 }
 0x585   : > { %v5589_v39 = vadd.f32 %v5538_v18, %v5466_v33  ;;  %v5590_v62 = vadd.f32 %v5540_v63, %v5467_v44  ;;  %v5591_v21 = vadd.f32 %v5542_v31, %v5468_v11  ;;  %v5592_v15 = vadd.f32 %v5544_v53, %v5469_v20 }
 0x586   : > { %v5593_v13 = vmax.f32 %v5569_v40, 0.0  ;;  %v5594_v46 = vmax.f32 %v5570_v42, 0.0  ;;  %v5595_v38 = vmax.f32 %v5571_v35, 0.0  ;;  %v5596_v43 = vmax.f32 %v5572_v5, 0.0 }
 0x587   : > { %v5597_v52 = vmax.f32 %v5573_v60, 0.0  ;;  %v5598_v17 = vmax.f32 %v5574_v61, 0.0  ;;  %v5599_v1 = vmax.f32 %v5575_v27, 0.0  ;;  %v5600_v50 = vmax.f32 %v5576_v56, 0.0 }
 0x588   : > { %v5601_v18 = vmax.f32 %v5577_v34, 0.0  ;;  %v5602_v14 = vmax.f32 %v5578_v24, 0.0  ;;  %v5603_v63 = vmax.f32 %v5579_v9, 0.0  ;;  %v5604_v41 = vmax.f32 %v5580_v48, 0.0  ;;  %5617 = vst [vmem:[%s10779_s22] sm:$0xff] %v5593_v13  ;;  %5618 = vst [vmem:[%s10779_s22 + $0x8] sm:$0xff] %v5594_v46 }
 0x589   : > { %5619 = vst [vmem:[%s10779_s22 + $0x10] sm:$0xff] %v5595_v38  ;;  %5620 = vst [vmem:[%s10779_s22 + $0x18] sm:$0xff] %v5596_v43  ;;  %v5605_v31 = vmax.f32 %v5581_v29, 0.0  ;;  %v5606_v53 = vmax.f32 %v5582_v22, 0.0  ;;  %v5607_v28 = vmax.f32 %v5583_v6, 0.0  ;;  %v5608_v51 = vmax.f32 %v5584_v3, 0.0 }
 0x58a   : > { %5621 = vst [vmem:[%s10779_s22 + $0x20] sm:$0xff] %v5597_v52  ;;  %5622 = vst [vmem:[%s10779_s22 + $0x28] sm:$0xff] %v5598_v17  ;;  %v5609_v37 = vmax.f32 %v5585_v12, 0.0  ;;  %v5610_v33 = vmax.f32 %v5586_v10, 0.0  ;;  %v5611_v44 = vmax.f32 %v5587_v23, 0.0  ;;  %v5612_v11 = vmax.f32 %v5588_v30, 0.0 }
 0x58b   : > { %5623 = vst [vmem:[%s10779_s22 + $0x30] sm:$0xff] %v5599_v1  ;;  %5624 = vst [vmem:[%s10779_s22 + $0x38] sm:$0xff] %v5600_v50  ;;  %v5613_v20 = vmax.f32 %v5589_v39, 0.0  ;;  %v5614_v57 = vmax.f32 %v5590_v62, 0.0  ;;  %v5615_v40 = vmax.f32 %v5591_v21, 0.0  ;;  %v5616_v4 = vmax.f32 %v5592_v15, 0.0 }
 0x58c   : > { %5625 = vst [vmem:[%s10779_s22 + $0x40] sm:$0xff] %v5601_v18  ;;  %5626 = vst [vmem:[%s10779_s22 + $0x48] sm:$0xff] %v5602_v14 }
 0x58d   : > { %5627 = vst [vmem:[%s10779_s22 + $0x50] sm:$0xff] %v5603_v63  ;;  %5628 = vst [vmem:[%s10779_s22 + $0x58] sm:$0xff] %v5604_v41 }
 0x58e   : > { %5629 = vst [vmem:[%s10779_s22 + $0x60] sm:$0xff] %v5605_v31  ;;  %5630 = vst [vmem:[%s10779_s22 + $0x68] sm:$0xff] %v5606_v53 }
 0x58f   : > { %5631 = vst [vmem:[%s10779_s22 + $0x70] sm:$0xff] %v5607_v28  ;;  %5632 = vst [vmem:[%s10779_s22 + $0x78] sm:$0xff] %v5608_v51 }
 0x590   : > { %5633 = vst [vmem:[%s10779_s22 + $0x80] sm:$0xff] %v5609_v37  ;;  %5634 = vst [vmem:[%s10779_s22 + $0x88] sm:$0xff] %v5610_v33 }
 0x591   : > { %5635 = vst [vmem:[%s10779_s22 + $0x90] sm:$0xff] %v5611_v44  ;;  %5636 = vst [vmem:[%s10779_s22 + $0x98] sm:$0xff] %v5612_v11 }
 0x592   : > { %5637 = vst [vmem:[%s10779_s22 + $0xa0] sm:$0xff] %v5613_v20  ;;  %5638 = vst [vmem:[%s10779_s22 + $0xa8] sm:$0xff] %v5614_v57 }
 0x593   : > { %5639 = vst [vmem:[%s10779_s22 + $0xb0] sm:$0xff] %v5615_v40  ;;  %5640 = vst [vmem:[%s10779_s22 + $0xb8] sm:$0xff] %v5616_v4 }
 0x594 PF: > { %s15_s18 = sadd.s32 1, %s7726_s18  }
 0x595   : > { %p12_p4 = scmp.ge.s32.totalorder %s15_s18, 4  }
 0x597   :  { %14 = sbr.rel (!%p12_p4) target bundleno = 1 (0x1), region = 86 }

</bundles_post_ra>
